<compile_context>
chip_gen: v5e
topology: v5e:2x2
jax: 0.10.0
libtpu: 0.0.40
codegen_flags: <defaults>
</compile_context>

<pallas_src>
import functools

import jax
import jax.numpy as jnp
from jax.experimental import pallas as pl
from jax.experimental.pallas import tpu as pltpu

# Polynomial-surrogate constants (from DRAM_MAC_temporal_encoding_surrogate_*).
C_COEF = (0.17393044, 0.15653739, 0.14088365, 0.12679529, 5.51975209,
          4.96777688, 4.4709992, -1.44776001, -1.30298401, 46.05483778)
MAX_ORDER = 3              # int((2 * len(c)) ** 0.5 - 1)
X_MAX = 0.9
OFFSET = 0.45
ATT_SCORE_SCALE = 1.0 / 80.0    # att_score_scaler (a clamped to [1/80,1/80], b=0)
WEIGHT_AVG_SCALE = 1.0 / 40.0   # weight_average_scaler (a clamped to [1/40,1/40], b=0)
INPUT_CLAMP = (0.0, 1.0)
WEIGHT_CLAMP = (0.0, 0.9)
OUTPUT_CLAMP = (-1.0, 1.0)
ARRAY_LENGTH = 64


def _fold_coefficients():
    """coef[i] = sum_j x_max**j * c[idx]  (inner j-loop folded at trace time)."""
    coef = []
    idx = 0
    for i in range(MAX_ORDER + 1):
        s = 0.0
        for j in range(MAX_ORDER - i + 1):
            s += (X_MAX ** j) * C_COEF[idx]
            idx += 1
        coef.append(s)
    return tuple(coef)


COEF = _fold_coefficients()


# ----------------------------------------------------------------------------
# Linear projection kernel (bias=False), M-tiled, bf16 MXU operands
# ----------------------------------------------------------------------------
def _linear_kernel(x_ref, w_ref, o_ref):
    o_ref[...] = jnp.dot(x_ref[...].astype(jnp.bfloat16),
                         w_ref[...].astype(jnp.bfloat16),
                         preferred_element_type=jnp.float32).astype(o_ref.dtype)


def linear(x, w_t, *, block_m=128):
    """x: (M, K) @ w_t: (K, N) -> (M, N).  Weights are passed pre-transposed."""
    M, K = x.shape
    K2, N = w_t.shape
    assert K == K2
    bm = block_m if (M % block_m == 0) else M
    return pl.pallas_call(
        _linear_kernel,
        out_shape=jax.ShapeDtypeStruct((M, N), jnp.float32),
        grid=(M // bm,),
        in_specs=[pl.BlockSpec((bm, K), lambda i: (i, 0)),
                  pl.BlockSpec((K, N), lambda i: (0, 0))],
        out_specs=pl.BlockSpec((bm, N), lambda i: (i, 0)),
        compiler_params=pltpu.CompilerParams(
            dimension_semantics=("parallel",),
            vmem_limit_bytes=32 * 1024 * 1024),
    )(x, w_t)


# ----------------------------------------------------------------------------
# DRAM attention core kernel (sliding-window banded)
# ----------------------------------------------------------------------------
def _dram_attn_kernel(chan_ref, q_ref, kp_ref, kd_ref, vp_ref, vd_ref, o_ref, *,
                      n_head, head_dim, array_length, window, decay_factor):
    """One (batch, query-block) program; K/V restricted to the window band."""
    TQ, C = q_ref.shape
    D = head_dim
    AL = array_length
    n_diag = TQ // AL
    qi = pl.program_id(1)
    q0 = qi * TQ

    # Per-channel range_scaler rows (1, C): scale+clip runs once on the packed
    # channels-last tensors instead of per-head lane-sliced VPU work.
    q_a, q_b = chan_ref[0:1, :], chan_ref[1:2, :]
    k_a, k_b = chan_ref[2:3, :], chan_ref[3:4, :]
    v_a, v_b = chan_ref[4:5, :], chan_ref[5:6, :]
    o_a, o_b = chan_ref[6:7, :], chan_ref[7:8, :]

    qh = jnp.clip(q_a * q_ref[...] + q_b, INPUT_CLAMP[0], INPUT_CLAMP[1])
    q_bf = qh.astype(jnp.bfloat16)

    def prep(ref, a, b):
        # range_scaler -> clamp -> (quantization disabled) -> offset; powers are
        # head-invariant, so they are computed once per program (hoisted).
        x1 = jnp.clip(a * ref[...] + b, WEIGHT_CLAMP[0], WEIGHT_CLAMP[1]) - OFFSET
        x2 = x1 * x1
        x3 = x2 * x1
        return (x1.astype(jnp.bfloat16), x2.astype(jnp.bfloat16),
                x3.astype(jnp.bfloat16))

    km_prev = prep(kp_ref, k_a, k_b)     # 3 x (AL, C)
    km_diag = prep(kd_ref, k_a, k_b)     # 3 x (TQ, C)
    vm_prev = prep(vp_ref, v_a, v_b)
    vm_diag = prep(vd_ref, v_a, v_b)

    # Order-0 QK term: q @ ones^T == rowsum(q) per head (XLU reduce, no MXU).
    qsum = [COEF[0] * jnp.sum(qh[:, h * D:(h + 1) * D], axis=1, keepdims=True)
            for h in range(n_head)]

    row = q0 + jax.lax.broadcasted_iota(jnp.int32, (TQ, AL), 0)
    acc = [jnp.zeros((TQ, D), jnp.float32) for _ in range(n_head)]

    # Band tiles: tile 0 = the array_length columns immediately before the
    # query block (fully masked when qi == 0); tiles 1..n_diag = the block's
    # own columns.  Requires window <= array_length (asserted in the wrapper).
    for tt in range(n_diag + 1):
        if tt == 0:
            col0 = (qi * n_diag - 1) * AL            # negative when qi == 0
            km_t, vm_t = km_prev, vm_prev
        else:
            lo = (tt - 1) * AL
            col0 = q0 + lo
            km_t = tuple(x[lo:lo + AL, :] for x in km_diag)
            vm_t = tuple(x[lo:lo + AL, :] for x in vm_diag)

        col = col0 + jax.lax.broadcasted_iota(jnp.int32, (TQ, AL), 1)
        diff = row - col
        # col >= 0 masks the aliased previous tile of the first query block.
        allowed = (diff >= 0) & (diff < window) & (col >= 0)
        # decay kept in f32 (torch casts the QK decay to bf16; the difference
        # is far below tolerance and f32 avoids convert ops on v5e).
        d1 = jnp.where(allowed,
                       jnp.exp((-decay_factor) * diff.astype(jnp.float32)), 0.0)
        d2 = d1 * d1
        dc1 = d1 * COEF[1]
        dc2 = d2 * COEF[2]
        dc3 = (d2 * d1) * COEF[3]

        for h in range(n_head):
            sl = slice(h * D, (h + 1) * D)
            q_h = q_bf[:, sl]
            dims = (((1,), (1,)), ((), ()))

            # similarity (QK surrogate): per-order matmul + immediate
            # accumulate; live score state is one (TQ, AL) tile.
            sc = qsum[h] + jax.lax.dot_general(
                q_h, km_t[0][:, sl], dims,
                preferred_element_type=jnp.float32) * dc1
            sc = sc + jax.lax.dot_general(
                q_h, km_t[1][:, sl], dims,
                preferred_element_type=jnp.float32) * dc2
            sc = sc + jax.lax.dot_general(
                q_h, km_t[2][:, sl], dims,
                preferred_element_type=jnp.float32) * dc3
            # masked_fill(mask==0, 0) -> att_score_scaler -> NL=Identity -> clamp
            sc = jnp.where(allowed, sc, 0.0)
            attn = jnp.clip(sc * ATT_SCORE_SCALE, INPUT_CLAMP[0], INPUT_CLAMP[1])

            # weight_average (AV surrogate); order-0 term is rowsum(attn).
            av = COEF[0] * jnp.sum(attn, axis=1, keepdims=True)
            av = av + jnp.dot((attn * dc1).astype(jnp.bfloat16), vm_t[0][:, sl],
                              preferred_element_type=jnp.float32)
            av = av + jnp.dot((attn * dc2).astype(jnp.bfloat16), vm_t[1][:, sl],
                              preferred_element_type=jnp.float32)
            av = av + jnp.dot((attn * dc3).astype(jnp.bfloat16), vm_t[2][:, sl],
                              preferred_element_type=jnp.float32)
            # weight_average_scaler -> clamp per array_length tile, then sum
            # over tiles (torch's sum(dim=2)).
            acc[h] = acc[h] + jnp.clip(av * WEIGHT_AVG_SCALE,
                                       OUTPUT_CLAMP[0], OUTPUT_CLAMP[1])

    y = jnp.concatenate(acc, axis=1)                   # (TQ, C), heads packed
    o_ref[...] = (o_a * y + o_b).astype(o_ref.dtype)   # output_scaler, dense store


def attention_core(q, k, v, head_params, *, n_head, sliding_window,
                   decay_factor, array_length=ARRAY_LENGTH, q_block=64):
    """q, k, v: (B, T, C) channels-last (heads packed); head_params: (H, 8)."""
    B, T, C = q.shape
    assert C % n_head == 0
    D = C // n_head
    AL = array_length
    # TODO(synk): zero-padding for T % array_length != 0 and the
    # window > array_length case (more than one previous band tile) are omitted.
    assert T % AL == 0
    assert sliding_window <= AL
    tq = q_block if (q_block % AL == 0 and T % q_block == 0) else AL
    n_diag = tq // AL

    # Per-channel (8, C) table: rows = q_a, q_b, k_a, k_b, v_a, v_b, o_a, o_b.
    chan_params = jnp.repeat(jnp.asarray(head_params, jnp.float32), D, axis=0).T

    kernel = functools.partial(
        _dram_attn_kernel, n_head=n_head, head_dim=D, array_length=AL,
        window=sliding_window, decay_factor=float(decay_factor))

    chan_spec = pl.BlockSpec((8, C), lambda b, qi: (0, 0))
    diag_spec = pl.BlockSpec((None, tq, C), lambda b, qi: (b, qi, 0))
    prev_spec = pl.BlockSpec(
        (None, AL, C), lambda b, qi: (b, jnp.maximum(qi * n_diag - 1, 0), 0))

    return pl.pallas_call(
        kernel,
        out_shape=jax.ShapeDtypeStruct((B, T, C), jnp.float32),
        grid=(B, T // tq),
        in_specs=[chan_spec, diag_spec, prev_spec, diag_spec, prev_spec, diag_spec],
        out_specs=diag_spec,
        compiler_params=pltpu.CompilerParams(
            dimension_semantics=("parallel", "parallel"),
            vmem_limit_bytes=32 * 1024 * 1024),
    )(chan_params, q, k, k, v, v)


# ----------------------------------------------------------------------------
# Module wrapper (reshape / split plumbing in plain JAX)
# ----------------------------------------------------------------------------
def dram_attention_forward(x, w_attn_t, w_proj_t, head_params, *, n_head,
                           sliding_window, decay_factor,
                           array_length=ARRAY_LENGTH, q_block=64):
    B, T, C = x.shape
    # c_attn (bias=False), weights pre-transposed to (C, 3C).
    qkv = linear(x.reshape(B * T, C), w_attn_t).reshape(B, T, 3 * C)
    q, k, v = jnp.split(qkv, 3, axis=-1)        # (B, T, C), heads stay packed
    y = attention_core(q, k, v, head_params, n_head=n_head,
                       sliding_window=sliding_window, decay_factor=decay_factor,
                       array_length=array_length, q_block=q_block)
    # c_proj (resid_dropout p=0, qkv_out_norm=False)
    y = linear(y.reshape(B * T, C), w_proj_t).reshape(B, T, C)
    return y


# ----------------------------------------------------------------------------
# Faithful f32 reference of the attention core (validation only)
# ----------------------------------------------------------------------------
def reference_attention_core(q, k, v, head_params, *, n_head, sliding_window,
                             decay_factor, array_length=ARRAY_LENGTH):
    B, T, C = q.shape
    H, D = n_head, C // n_head
    hp = jax.lax.Precision.HIGHEST

    def heads(t):
        return t.reshape(B, T, H, D).transpose(0, 2, 1, 3)     # (B,H,T,D)

    def sc(i):
        return head_params[:, i].reshape(1, H, 1, 1)

    q, k, v = heads(q), heads(k), heads(v)
    q = jnp.clip(sc(0) * q + sc(1), *INPUT_CLAMP)
    k = jnp.clip(sc(2) * k + sc(3), *WEIGHT_CLAMP)
    v = jnp.clip(sc(4) * v + sc(5), *WEIGHT_CLAMP)

    i = jnp.arange(T)[:, None]
    j = jnp.arange(T)[None, :]
    allowed = (j <= i) & (j > i - sliding_window)
    decay = jnp.where(allowed,
                      jnp.exp(-decay_factor * (i - j).astype(jnp.float32)), 0.0)
    # NOTE: torch casts the QK decay mask to bfloat16; f32 is used here (and in
    # the kernel) -- the difference is far below the validation tolerance.

    km = k - OFFSET
    scores = jnp.zeros((B, H, T, T), jnp.float32)
    idx = 0
    for oi in range(MAX_ORDER + 1):
        tmp = jnp.einsum('bhtd,bhsd->bhts', q, km ** oi, precision=hp)
        tmp = tmp * (decay ** oi)
        for oj in range(MAX_ORDER - oi + 1):
            scores = scores + tmp * (X_MAX ** oj) * C_COEF[idx]
            idx += 1
    scores = jnp.where(allowed, scores, 0.0)
    scores = scores * ATT_SCORE_SCALE
    scores = jnp.where(allowed, scores, 0.0)
    attn = jnp.clip(scores, *INPUT_CLAMP)

    vm = v - OFFSET
    out = jnp.zeros((B, H, T, D), jnp.float32)
    for t in range(T // array_length):
        lo, hi = t * array_length, (t + 1) * array_length
        x_t = attn[..., lo:hi]
        d_t = decay[:, lo:hi]
        v_t = vm[..., lo:hi, :]
        tile = jnp.zeros((B, H, T, D), jnp.float32)
        idx = 0
        for oi in range(MAX_ORDER + 1):
            tmp = jnp.einsum('bhta,bhad->bhtd', x_t * (d_t ** oi), v_t ** oi,
                             precision=hp)
            for oj in range(MAX_ORDER - oi + 1):
                tile = tile + tmp * (X_MAX ** oj) * C_COEF[idx]
                idx += 1
        tile = jnp.clip(tile * WEIGHT_AVG_SCALE, *OUTPUT_CLAMP)
        out = out + tile
    out = sc(6) * out + sc(7)
    return out.transpose(0, 2, 1, 3).reshape(B, T, C)


# ----------------------------------------------------------------------------
# Deterministic example
# ----------------------------------------------------------------------------
if __name__ == "__main__":
    # Small config: B=2, T=block_size=128 (multiple of array_length=64),
    # n_head=2, n_embd=128 -> head_dim=64 (lane-dense C, decent MXU depth),
    # sliding_window=16, decay_factor=0.1.
    B, T, C, H = 2, 128, 128, 2
    sliding_window = 16
    decay_factor = 0.1

    key = jax.random.PRNGKey(0)
    kx, kw1, kw2 = jax.random.split(key, 3)
    x = jax.random.normal(kx, (B, T, C), jnp.float32)
    w_attn = jax.random.normal(kw1, (3 * C, C), jnp.float32) * 0.02  # c_attn.weight
    w_proj = jax.random.normal(kw2, (C, C), jnp.float32) * 0.02      # c_proj.weight
    # Pre-transposed once (avoid a .T per forward).
    w_attn_t = w_attn.T
    w_proj_t = w_proj.T

    # Per-head range_scaler (a, b) init values from DRAMAttention.__init__:
    #   q: (1.0, 0.0), k: (1.0, 0.45), v: (1.0, 0.45), output: (1.0, 0.0)
    head_params = jnp.tile(
        jnp.array([1.0, 0.0, 1.0, 0.45, 1.0, 0.45, 1.0, 0.0], jnp.float32),
        (H, 1))

    fwd = jax.jit(functools.partial(
        dram_attention_forward, n_head=H, sliding_window=sliding_window,
        decay_factor=decay_factor))
    y = fwd(x, w_attn_t, w_proj_t, head_params)
    jax.block_until_ready(y)
    assert y.shape == (B, T, C) and y.dtype == jnp.float32
    assert bool(jnp.all(jnp.isfinite(y)))

    # Validate the banded bf16-MXU Pallas core against a faithful f32 reference
    # (both consume the same Pallas c_attn projection output).
    qkv = linear(x.reshape(B * T, C), w_attn_t).reshape(B, T, 3 * C)
    q, k, v = jnp.split(qkv, 3, axis=-1)
    y_core = attention_core(q, k, v, head_params, n_head=H,
                            sliding_window=sliding_window,
                            decay_factor=decay_factor)
    y_ref = reference_attention_core(q, k, v, head_params, n_head=H,
                                     sliding_window=sliding_window,
                                     decay_factor=decay_factor)
    err = float(jnp.max(jnp.abs(y_core - y_ref)))
    scale = float(jnp.max(jnp.abs(y_ref)))
    assert err <= 0.05 * scale + 1e-5, (err, scale)

    print("KERNEL_OK")
</pallas_src>

<mosaic_0001>
module attributes {stable_mosaic.version = 11 : i64} {
  func.func @_linear_kernel(%arg0: i32, %arg1: memref<128x128xf32, #tpu.memory_space<vmem>>, %arg2: memref<128x384xf32, #tpu.memory_space<vmem>>, %arg3: memref<128x384xf32, #tpu.memory_space<vmem>>) attributes {dimension_semantics = [#tpu.dimension_semantics<parallel>], iteration_bounds = array<i64: 2>, scalar_prefetch = 0 : i64, scratch_operands = 0 : i64, tpu.core_type = #tpu.core_type<tc>, window_params = [{transform_indices = @transform_0, window_bounds = array<i64: 128, 128>}, {pipeline_mode = #tpu.pipeline_mode<synchronous>, transform_indices = @transform_1, window_bounds = array<i64: 128, 384>}, {transform_indices = @transform_2, window_bounds = array<i64: 128, 384>}]} {
    %c0 = arith.constant 0 : index
    %c0_0 = arith.constant 0 : index
    %0 = vector.load %arg1[%c0, %c0_0] : memref<128x128xf32, #tpu.memory_space<vmem>>, vector<128x128xf32>
    %1 = arith.truncf %0 : vector<128x128xf32> to vector<128x128xbf16>
    %c0_1 = arith.constant 0 : index
    %c0_2 = arith.constant 0 : index
    %2 = vector.load %arg2[%c0_1, %c0_2] : memref<128x384xf32, #tpu.memory_space<vmem>>, vector<128x384xf32>
    %3 = arith.truncf %2 : vector<128x384xf32> to vector<128x384xbf16>
    %cst = arith.constant dense<0.000000e+00> : vector<128x384xf32>
    %4 = tpu.matmul %1, %3, %cst {dimension_numbers = #tpu.dot_dimension_numbers<[1], [0], [0], [1], [0, 0, 1, 1], [], []>} : vector<128x128xbf16>, vector<128x384xbf16>, vector<128x384xf32> -> vector<128x384xf32>
    %c0_3 = arith.constant 0 : index
    %c0_4 = arith.constant 0 : index
    %5 = vector.load %arg3[%c0_3, %c0_4] : memref<128x384xf32, #tpu.memory_space<vmem>>, vector<128x384xf32>
    tpu.vector_store %arg3[%c0_3, %c0_4], %4 {strides = array<i32>} : memref<128x384xf32, #tpu.memory_space<vmem>>, vector<128x384xf32>,
    return
  }
  func.func @transform_0(%arg0: i32) -> (i32, i32) {
    %c0_i32 = arith.constant 0 : i32
    %c0_i32_0 = arith.constant 0 : i32
    return %arg0, %c0_i32 : i32, i32
  }
  func.func @transform_1(%arg0: i32) -> (i32, i32) {
    %c0_i32 = arith.constant 0 : i32
    %c0_i32_0 = arith.constant 0 : i32
    %c0_i32_1 = arith.constant 0 : i32
    return %c0_i32, %c0_i32_0 : i32, i32
  }
  func.func @transform_2(%arg0: i32) -> (i32, i32) {
    %c0_i32 = arith.constant 0 : i32
    %c0_i32_0 = arith.constant 0 : i32
    return %arg0, %c0_i32 : i32, i32
  }
}

module attributes {stable_mosaic.version = 11 : i64} {
  func.func @_linear_kernel(%arg0: i32, %arg1: memref<128x128xf32, #tpu.memory_space<vmem>>, %arg2: memref<128x128xf32, #tpu.memory_space<vmem>>, %arg3: memref<128x128xf32, #tpu.memory_space<vmem>>) attributes {dimension_semantics = [#tpu.dimension_semantics<parallel>], iteration_bounds = array<i64: 2>, scalar_prefetch = 0 : i64, scratch_operands = 0 : i64, tpu.core_type = #tpu.core_type<tc>, window_params = [{transform_indices = @transform_0, window_bounds = array<i64: 128, 128>}, {pipeline_mode = #tpu.pipeline_mode<synchronous>, transform_indices = @transform_1, window_bounds = array<i64: 128, 128>}, {transform_indices = @transform_2, window_bounds = array<i64: 128, 128>}]} {
    %c0 = arith.constant 0 : index
    %c0_0 = arith.constant 0 : index
    %0 = vector.load %arg1[%c0, %c0_0] : memref<128x128xf32, #tpu.memory_space<vmem>>, vector<128x128xf32>
    %1 = arith.truncf %0 : vector<128x128xf32> to vector<128x128xbf16>
    %c0_1 = arith.constant 0 : index
    %c0_2 = arith.constant 0 : index
    %2 = vector.load %arg2[%c0_1, %c0_2] : memref<128x128xf32, #tpu.memory_space<vmem>>, vector<128x128xf32>
    %3 = arith.truncf %2 : vector<128x128xf32> to vector<128x128xbf16>
    %cst = arith.constant dense<0.000000e+00> : vector<128x128xf32>
    %4 = tpu.matmul %1, %3, %cst {dimension_numbers = #tpu.dot_dimension_numbers<[1], [0], [0], [1], [0, 0, 1, 1], [], []>} : vector<128x128xbf16>, vector<128x128xbf16>, vector<128x128xf32> -> vector<128x128xf32>
    %c0_3 = arith.constant 0 : index
    %c0_4 = arith.constant 0 : index
    %5 = vector.load %arg3[%c0_3, %c0_4] : memref<128x128xf32, #tpu.memory_space<vmem>>, vector<128x128xf32>
    tpu.vector_store %arg3[%c0_3, %c0_4], %4 {strides = array<i32>} : memref<128x128xf32, #tpu.memory_space<vmem>>, vector<128x128xf32>,
    return
  }
  func.func @transform_0(%arg0: i32) -> (i32, i32) {
    %c0_i32 = arith.constant 0 : i32
    %c0_i32_0 = arith.constant 0 : i32
    return %arg0, %c0_i32 : i32, i32
  }
  func.func @transform_1(%arg0: i32) -> (i32, i32) {
    %c0_i32 = arith.constant 0 : i32
    %c0_i32_0 = arith.constant 0 : i32
    %c0_i32_1 = arith.constant 0 : i32
    return %c0_i32, %c0_i32_0 : i32, i32
  }
  func.func @transform_2(%arg0: i32) -> (i32, i32) {
    %c0_i32 = arith.constant 0 : i32
    %c0_i32_0 = arith.constant 0 : i32
    return %arg0, %c0_i32 : i32, i32
  }
}

module attributes {stable_mosaic.version = 11 : i64} {
  func.func @_dram_attn_kernel(%arg0: i32, %arg1: i32, %arg2: memref<8x128xf32, #tpu.memory_space<vmem>>, %arg3: memref<1x64x128xf32, #tpu.memory_space<vmem>>, %arg4: memref<1x64x128xf32, #tpu.memory_space<vmem>>, %arg5: memref<1x64x128xf32, #tpu.memory_space<vmem>>, %arg6: memref<1x64x128xf32, #tpu.memory_space<vmem>>, %arg7: memref<1x64x128xf32, #tpu.memory_space<vmem>>, %arg8: memref<1x64x128xf32, #tpu.memory_space<vmem>>) attributes {dimension_semantics = [#tpu.dimension_semantics<parallel>, #tpu.dimension_semantics<parallel>], iteration_bounds = array<i64: 2, 2>, scalar_prefetch = 0 : i64, scratch_operands = 0 : i64, tpu.core_type = #tpu.core_type<tc>, window_params = [{pipeline_mode = #tpu.pipeline_mode<synchronous>, transform_indices = @transform_0, window_bounds = array<i64: 8, 128>}, {transform_indices = @transform_1, window_bounds = array<i64: 1, 64, 128>}, {transform_indices = @transform_2, window_bounds = array<i64: 1, 64, 128>}, {transform_indices = @transform_3, window_bounds = array<i64: 1, 64, 128>}, {transform_indices = @transform_4, window_bounds = array<i64: 1, 64, 128>}, {transform_indices = @transform_5, window_bounds = array<i64: 1, 64, 128>}, {transform_indices = @transform_6, window_bounds = array<i64: 1, 64, 128>}]} {
    %c64_i32 = arith.constant 64 : i32
    %0 = arith.muli %arg1, %c64_i32 : i32
    %c0 = arith.constant 0 : index
    %c0_0 = arith.constant 0 : index
    %1 = vector.load %arg2[%c0, %c0_0] : memref<8x128xf32, #tpu.memory_space<vmem>>, vector<1x128xf32>
    %c1 = arith.constant 1 : index
    %c0_1 = arith.constant 0 : index
    %2 = vector.load %arg2[%c1, %c0_1] : memref<8x128xf32, #tpu.memory_space<vmem>>, vector<1x128xf32>
    %c2 = arith.constant 2 : index
    %c0_2 = arith.constant 0 : index
    %3 = vector.load %arg2[%c2, %c0_2] : memref<8x128xf32, #tpu.memory_space<vmem>>, vector<1x128xf32>
    %c3 = arith.constant 3 : index
    %c0_3 = arith.constant 0 : index
    %4 = vector.load %arg2[%c3, %c0_3] : memref<8x128xf32, #tpu.memory_space<vmem>>, vector<1x128xf32>
    %c4 = arith.constant 4 : index
    %c0_4 = arith.constant 0 : index
    %5 = vector.load %arg2[%c4, %c0_4] : memref<8x128xf32, #tpu.memory_space<vmem>>, vector<1x128xf32>
    %c5 = arith.constant 5 : index
    %c0_5 = arith.constant 0 : index
    %6 = vector.load %arg2[%c5, %c0_5] : memref<8x128xf32, #tpu.memory_space<vmem>>, vector<1x128xf32>
    %c6 = arith.constant 6 : index
    %c0_6 = arith.constant 0 : index
    %7 = vector.load %arg2[%c6, %c0_6] : memref<8x128xf32, #tpu.memory_space<vmem>>, vector<1x128xf32>
    %c7 = arith.constant 7 : index
    %c0_7 = arith.constant 0 : index
    %8 = vector.load %arg2[%c7, %c0_7] : memref<8x128xf32, #tpu.memory_space<vmem>>, vector<1x128xf32>
    %c0_8 = arith.constant 0 : index
    %c0_9 = arith.constant 0 : index
    %c0_10 = arith.constant 0 : index
    %9 = vector.load %arg3[%c0_8, %c0_9, %c0_10] : memref<1x64x128xf32, #tpu.memory_space<vmem>>, vector<1x64x128xf32>
    %10 = vector.shape_cast %9 : vector<1x64x128xf32> to vector<64x128xf32>
    %11 = vector.broadcast %1 : vector<1x128xf32> to vector<64x128xf32>
    %12 = arith.mulf %11, %10 : vector<64x128xf32>
    %13 = vector.broadcast %2 : vector<1x128xf32> to vector<64x128xf32>
    %14 = arith.addf %12, %13 : vector<64x128xf32>
    %cst = arith.constant 0.000000e+00 : f32
    %cst_11 = arith.constant 1.000000e+00 : f32
    %15 = vector.broadcast %cst : f32 to vector<64x128xf32>
    %16 = arith.maximumf %15, %14 : vector<64x128xf32>
    %17 = vector.broadcast %cst_11 : f32 to vector<64x128xf32>
    %18 = arith.minimumf %17, %16 : vector<64x128xf32>
    %19 = arith.truncf %18 : vector<64x128xf32> to vector<64x128xbf16>
    %c0_12 = arith.constant 0 : index
    %c0_13 = arith.constant 0 : index
    %c0_14 = arith.constant 0 : index
    %20 = vector.load %arg4[%c0_12, %c0_13, %c0_14] : memref<1x64x128xf32, #tpu.memory_space<vmem>>, vector<1x64x128xf32>
    %21 = vector.shape_cast %20 : vector<1x64x128xf32> to vector<64x128xf32>
    %22 = vector.broadcast %3 : vector<1x128xf32> to vector<64x128xf32>
    %23 = arith.mulf %22, %21 : vector<64x128xf32>
    %24 = vector.broadcast %4 : vector<1x128xf32> to vector<64x128xf32>
    %25 = arith.addf %23, %24 : vector<64x128xf32>
    %cst_15 = arith.constant 0.000000e+00 : f32
    %cst_16 = arith.constant 0.899999976 : f32
    %26 = vector.broadcast %cst_15 : f32 to vector<64x128xf32>
    %27 = arith.maximumf %26, %25 : vector<64x128xf32>
    %28 = vector.broadcast %cst_16 : f32 to vector<64x128xf32>
    %29 = arith.minimumf %28, %27 : vector<64x128xf32>
    %cst_17 = arith.constant 4.500000e-01 : f32
    %30 = vector.broadcast %cst_17 : f32 to vector<64x128xf32>
    %31 = arith.subf %29, %30 : vector<64x128xf32>
    %32 = arith.mulf %31, %31 : vector<64x128xf32>
    %33 = arith.mulf %32, %31 : vector<64x128xf32>
    %34 = arith.truncf %31 : vector<64x128xf32> to vector<64x128xbf16>
    %35 = arith.truncf %32 : vector<64x128xf32> to vector<64x128xbf16>
    %36 = arith.truncf %33 : vector<64x128xf32> to vector<64x128xbf16>
    %c0_18 = arith.constant 0 : index
    %c0_19 = arith.constant 0 : index
    %c0_20 = arith.constant 0 : index
    %37 = vector.load %arg5[%c0_18, %c0_19, %c0_20] : memref<1x64x128xf32, #tpu.memory_space<vmem>>, vector<1x64x128xf32>
    %38 = vector.shape_cast %37 : vector<1x64x128xf32> to vector<64x128xf32>
    %39 = vector.broadcast %3 : vector<1x128xf32> to vector<64x128xf32>
    %40 = arith.mulf %39, %38 : vector<64x128xf32>
    %41 = vector.broadcast %4 : vector<1x128xf32> to vector<64x128xf32>
    %42 = arith.addf %40, %41 : vector<64x128xf32>
    %cst_21 = arith.constant 0.000000e+00 : f32
    %cst_22 = arith.constant 0.899999976 : f32
    %43 = vector.broadcast %cst_21 : f32 to vector<64x128xf32>
    %44 = arith.maximumf %43, %42 : vector<64x128xf32>
    %45 = vector.broadcast %cst_22 : f32 to vector<64x128xf32>
    %46 = arith.minimumf %45, %44 : vector<64x128xf32>
    %cst_23 = arith.constant 4.500000e-01 : f32
    %47 = vector.broadcast %cst_23 : f32 to vector<64x128xf32>
    %48 = arith.subf %46, %47 : vector<64x128xf32>
    %49 = arith.mulf %48, %48 : vector<64x128xf32>
    %50 = arith.mulf %49, %48 : vector<64x128xf32>
    %51 = arith.truncf %48 : vector<64x128xf32> to vector<64x128xbf16>
    %52 = arith.truncf %49 : vector<64x128xf32> to vector<64x128xbf16>
    %53 = arith.truncf %50 : vector<64x128xf32> to vector<64x128xbf16>
    %c0_24 = arith.constant 0 : index
    %c0_25 = arith.constant 0 : index
    %c0_26 = arith.constant 0 : index
    %54 = vector.load %arg6[%c0_24, %c0_25, %c0_26] : memref<1x64x128xf32, #tpu.memory_space<vmem>>, vector<1x64x128xf32>
    %55 = vector.shape_cast %54 : vector<1x64x128xf32> to vector<64x128xf32>
    %56 = vector.broadcast %5 : vector<1x128xf32> to vector<64x128xf32>
    %57 = arith.mulf %56, %55 : vector<64x128xf32>
    %58 = vector.broadcast %6 : vector<1x128xf32> to vector<64x128xf32>
    %59 = arith.addf %57, %58 : vector<64x128xf32>
    %cst_27 = arith.constant 0.000000e+00 : f32
    %cst_28 = arith.constant 0.899999976 : f32
    %60 = vector.broadcast %cst_27 : f32 to vector<64x128xf32>
    %61 = arith.maximumf %60, %59 : vector<64x128xf32>
    %62 = vector.broadcast %cst_28 : f32 to vector<64x128xf32>
    %63 = arith.minimumf %62, %61 : vector<64x128xf32>
    %cst_29 = arith.constant 4.500000e-01 : f32
    %64 = vector.broadcast %cst_29 : f32 to vector<64x128xf32>
    %65 = arith.subf %63, %64 : vector<64x128xf32>
    %66 = arith.mulf %65, %65 : vector<64x128xf32>
    %67 = arith.mulf %66, %65 : vector<64x128xf32>
    %68 = arith.truncf %65 : vector<64x128xf32> to vector<64x128xbf16>
    %69 = arith.truncf %66 : vector<64x128xf32> to vector<64x128xbf16>
    %70 = arith.truncf %67 : vector<64x128xf32> to vector<64x128xbf16>
    %c0_30 = arith.constant 0 : index
    %c0_31 = arith.constant 0 : index
    %c0_32 = arith.constant 0 : index
    %71 = vector.load %arg7[%c0_30, %c0_31, %c0_32] : memref<1x64x128xf32, #tpu.memory_space<vmem>>, vector<1x64x128xf32>
    %72 = vector.shape_cast %71 : vector<1x64x128xf32> to vector<64x128xf32>
    %73 = vector.broadcast %5 : vector<1x128xf32> to vector<64x128xf32>
    %74 = arith.mulf %73, %72 : vector<64x128xf32>
    %75 = vector.broadcast %6 : vector<1x128xf32> to vector<64x128xf32>
    %76 = arith.addf %74, %75 : vector<64x128xf32>
    %cst_33 = arith.constant 0.000000e+00 : f32
    %cst_34 = arith.constant 0.899999976 : f32
    %77 = vector.broadcast %cst_33 : f32 to vector<64x128xf32>
    %78 = arith.maximumf %77, %76 : vector<64x128xf32>
    %79 = vector.broadcast %cst_34 : f32 to vector<64x128xf32>
    %80 = arith.minimumf %79, %78 : vector<64x128xf32>
    %cst_35 = arith.constant 4.500000e-01 : f32
    %81 = vector.broadcast %cst_35 : f32 to vector<64x128xf32>
    %82 = arith.subf %80, %81 : vector<64x128xf32>
    %83 = arith.mulf %82, %82 : vector<64x128xf32>
    %84 = arith.mulf %83, %82 : vector<64x128xf32>
    %85 = arith.truncf %82 : vector<64x128xf32> to vector<64x128xbf16>
    %86 = arith.truncf %83 : vector<64x128xf32> to vector<64x128xbf16>
    %87 = arith.truncf %84 : vector<64x128xf32> to vector<64x128xbf16>
    %88 = vector.extract_strided_slice %18 {offsets = [0, 0], sizes = [64, 64], strides = [1, 1]} : vector<64x128xf32> to vector<64x64xf32>
    %cst_36 = arith.constant dense<0.000000e+00> : vector<64xf32>
    %89 = vector.multi_reduction <add>, %88, %cst_36 [1] : vector<64x64xf32> to vector<64xf32>
    %90 = vector.shape_cast %89 : vector<64xf32> to vector<64x1xf32>
    %cst_37 = arith.constant 0.521363616 : f32
    %91 = vector.broadcast %cst_37 : f32 to vector<64x1xf32>
    %92 = arith.mulf %91, %90 : vector<64x1xf32>
    %93 = vector.extract_strided_slice %18 {offsets = [0, 64], sizes = [64, 64], strides = [1, 1]} : vector<64x128xf32> to vector<64x64xf32>
    %cst_38 = arith.constant dense<0.000000e+00> : vector<64xf32>
    %94 = vector.multi_reduction <add>, %93, %cst_38 [1] : vector<64x64xf32> to vector<64xf32>
    %95 = vector.shape_cast %94 : vector<64xf32> to vector<64x1xf32>
    %cst_39 = arith.constant 0.521363616 : f32
    %96 = vector.broadcast %cst_39 : f32 to vector<64x1xf32>
    %97 = arith.mulf %96, %95 : vector<64x1xf32>
    %98 = tpu.iota {dimensions = array<i32: 0>} : vector<64x64xi32>
    %99 = vector.broadcast %0 : i32 to vector<64x64xi32>
    %100 = arith.addi %99, %98 : vector<64x64xi32>
    %cst_40 = arith.constant 0.000000e+00 : f32
    %101 = vector.broadcast %cst_40 : f32 to vector<64x64xf32>
    %cst_41 = arith.constant 0.000000e+00 : f32
    %102 = vector.broadcast %cst_41 : f32 to vector<64x64xf32>
    %c1_i32 = arith.constant 1 : i32
    %103 = arith.muli %arg1, %c1_i32 : i32
    %c1_i32_42 = arith.constant 1 : i32
    %104 = arith.subi %103, %c1_i32_42 : i32
    %c64_i32_43 = arith.constant 64 : i32
    %105 = arith.muli %104, %c64_i32_43 : i32
    %106 = tpu.iota {dimensions = array<i32: 1>} : vector<64x64xi32>
    %107 = vector.broadcast %105 : i32 to vector<64x64xi32>
    %108 = arith.addi %107, %106 : vector<64x64xi32>
    %109 = arith.subi %100, %108 : vector<64x64xi32>
    %c0_i32 = arith.constant 0 : i32
    %110 = vector.broadcast %c0_i32 : i32 to vector<64x64xi32>
    %111 = arith.cmpi sge, %109, %110 : vector<64x64xi32>
    %c16_i32 = arith.constant 16 : i32
    %112 = vector.broadcast %c16_i32 : i32 to vector<64x64xi32>
    %113 = arith.cmpi slt, %109, %112 : vector<64x64xi32>
    %114 = arith.andi %111, %113 : vector<64x64xi1>
    %c0_i32_44 = arith.constant 0 : i32
    %115 = vector.broadcast %c0_i32_44 : i32 to vector<64x64xi32>
    %116 = arith.cmpi sge, %108, %115 : vector<64x64xi32>
    %117 = arith.andi %114, %116 : vector<64x64xi1>
    %118 = arith.sitofp %109 : vector<64x64xi32> to vector<64x64xf32>
    %cst_45 = arith.constant -1.000000e-01 : f32
    %119 = vector.broadcast %cst_45 : f32 to vector<64x64xf32>
    %120 = arith.mulf %119, %118 : vector<64x64xf32>
    %121 = math.exp %120 : vector<64x64xf32>
    %cst_46 = arith.constant 0.000000e+00 : f32
    %122 = vector.broadcast %cst_46 : f32 to vector<64x64xf32>
    %123 = arith.select %117, %121, %122 : vector<64x64xi1>, vector<64x64xf32>
    %124 = arith.mulf %123, %123 : vector<64x64xf32>
    %cst_47 = arith.constant 13.6122608 : f32
    %125 = vector.broadcast %cst_47 : f32 to vector<64x64xf32>
    %126 = arith.mulf %123, %125 : vector<64x64xf32>
    %cst_48 = arith.constant -2.62044573 : f32
    %127 = vector.broadcast %cst_48 : f32 to vector<64x64xf32>
    %128 = arith.mulf %124, %127 : vector<64x64xf32>
    %129 = arith.mulf %124, %123 : vector<64x64xf32>
    %cst_49 = arith.constant 46.0548363 : f32
    %130 = vector.broadcast %cst_49 : f32 to vector<64x64xf32>
    %131 = arith.mulf %129, %130 : vector<64x64xf32>
    %132 = vector.extract_strided_slice %19 {offsets = [0, 0], sizes = [64, 64], strides = [1, 1]} : vector<64x128xbf16> to vector<64x64xbf16>
    %133 = vector.extract_strided_slice %34 {offsets = [0, 0], sizes = [64, 64], strides = [1, 1]} : vector<64x128xbf16> to vector<64x64xbf16>
    %cst_50 = arith.constant dense<0.000000e+00> : vector<64x64xf32>
    %134 = tpu.matmul %132, %133, %cst_50 {dimension_numbers = #tpu.dot_dimension_numbers<[1], [1], [0], [0], [0, 0, 1, 0], [], []>} : vector<64x64xbf16>, vector<64x64xbf16>, vector<64x64xf32> -> vector<64x64xf32>
    %135 = arith.mulf %134, %126 : vector<64x64xf32>
    %136 = vector.broadcast %92 : vector<64x1xf32> to vector<64x64xf32>
    %137 = arith.addf %136, %135 : vector<64x64xf32>
    %138 = vector.extract_strided_slice %35 {offsets = [0, 0], sizes = [64, 64], strides = [1, 1]} : vector<64x128xbf16> to vector<64x64xbf16>
    %cst_51 = arith.constant dense<0.000000e+00> : vector<64x64xf32>
    %139 = tpu.matmul %132, %138, %cst_51 {dimension_numbers = #tpu.dot_dimension_numbers<[1], [1], [0], [0], [0, 0, 1, 0], [], []>} : vector<64x64xbf16>, vector<64x64xbf16>, vector<64x64xf32> -> vector<64x64xf32>
    %140 = arith.mulf %139, %128 : vector<64x64xf32>
    %141 = arith.addf %137, %140 : vector<64x64xf32>
    %142 = vector.extract_strided_slice %36 {offsets = [0, 0], sizes = [64, 64], strides = [1, 1]} : vector<64x128xbf16> to vector<64x64xbf16>
    %cst_52 = arith.constant dense<0.000000e+00> : vector<64x64xf32>
    %143 = tpu.matmul %132, %142, %cst_52 {dimension_numbers = #tpu.dot_dimension_numbers<[1], [1], [0], [0], [0, 0, 1, 0], [], []>} : vector<64x64xbf16>, vector<64x64xbf16>, vector<64x64xf32> -> vector<64x64xf32>
    %144 = arith.mulf %143, %131 : vector<64x64xf32>
    %145 = arith.addf %141, %144 : vector<64x64xf32>
    %cst_53 = arith.constant 0.000000e+00 : f32
    %146 = vector.broadcast %cst_53 : f32 to vector<64x64xf32>
    %147 = arith.select %117, %145, %146 : vector<64x64xi1>, vector<64x64xf32>
    %cst_54 = arith.constant 1.250000e-02 : f32
    %148 = vector.broadcast %cst_54 : f32 to vector<64x64xf32>
    %149 = arith.mulf %147, %148 : vector<64x64xf32>
    %cst_55 = arith.constant 0.000000e+00 : f32
    %cst_56 = arith.constant 1.000000e+00 : f32
    %150 = vector.broadcast %cst_55 : f32 to vector<64x64xf32>
    %151 = arith.maximumf %150, %149 : vector<64x64xf32>
    %152 = vector.broadcast %cst_56 : f32 to vector<64x64xf32>
    %153 = arith.minimumf %152, %151 : vector<64x64xf32>
    %cst_57 = arith.constant dense<0.000000e+00> : vector<64xf32>
    %154 = vector.multi_reduction <add>, %153, %cst_57 [1] : vector<64x64xf32> to vector<64xf32>
    %155 = vector.shape_cast %154 : vector<64xf32> to vector<64x1xf32>
    %cst_58 = arith.constant 0.521363616 : f32
    %156 = vector.broadcast %cst_58 : f32 to vector<64x1xf32>
    %157 = arith.mulf %156, %155 : vector<64x1xf32>
    %158 = arith.mulf %153, %126 : vector<64x64xf32>
    %159 = arith.truncf %158 : vector<64x64xf32> to vector<64x64xbf16>
    %160 = vector.extract_strided_slice %68 {offsets = [0, 0], sizes = [64, 64], strides = [1, 1]} : vector<64x128xbf16> to vector<64x64xbf16>
    %cst_59 = arith.constant dense<0.000000e+00> : vector<64x64xf32>
    %161 = tpu.matmul %159, %160, %cst_59 {dimension_numbers = #tpu.dot_dimension_numbers<[1], [0], [0], [1], [0, 0, 1, 1], [], []>} : vector<64x64xbf16>, vector<64x64xbf16>, vector<64x64xf32> -> vector<64x64xf32>
    %162 = vector.broadcast %157 : vector<64x1xf32> to vector<64x64xf32>
    %163 = arith.addf %162, %161 : vector<64x64xf32>
    %164 = arith.mulf %153, %128 : vector<64x64xf32>
    %165 = arith.truncf %164 : vector<64x64xf32> to vector<64x64xbf16>
    %166 = vector.extract_strided_slice %69 {offsets = [0, 0], sizes = [64, 64], strides = [1, 1]} : vector<64x128xbf16> to vector<64x64xbf16>
    %cst_60 = arith.constant dense<0.000000e+00> : vector<64x64xf32>
    %167 = tpu.matmul %165, %166, %cst_60 {dimension_numbers = #tpu.dot_dimension_numbers<[1], [0], [0], [1], [0, 0, 1, 1], [], []>} : vector<64x64xbf16>, vector<64x64xbf16>, vector<64x64xf32> -> vector<64x64xf32>
    %168 = arith.addf %163, %167 : vector<64x64xf32>
    %169 = arith.mulf %153, %131 : vector<64x64xf32>
    %170 = arith.truncf %169 : vector<64x64xf32> to vector<64x64xbf16>
    %171 = vector.extract_strided_slice %70 {offsets = [0, 0], sizes = [64, 64], strides = [1, 1]} : vector<64x128xbf16> to vector<64x64xbf16>
    %cst_61 = arith.constant dense<0.000000e+00> : vector<64x64xf32>
    %172 = tpu.matmul %170, %171, %cst_61 {dimension_numbers = #tpu.dot_dimension_numbers<[1], [0], [0], [1], [0, 0, 1, 1], [], []>} : vector<64x64xbf16>, vector<64x64xbf16>, vector<64x64xf32> -> vector<64x64xf32>
    %173 = arith.addf %168, %172 : vector<64x64xf32>
    %cst_62 = arith.constant 2.500000e-02 : f32
    %174 = vector.broadcast %cst_62 : f32 to vector<64x64xf32>
    %175 = arith.mulf %173, %174 : vector<64x64xf32>
    %cst_63 = arith.constant -1.000000e+00 : f32
    %cst_64 = arith.constant 1.000000e+00 : f32
    %176 = vector.broadcast %cst_63 : f32 to vector<64x64xf32>
    %177 = arith.maximumf %176, %175 : vector<64x64xf32>
    %178 = vector.broadcast %cst_64 : f32 to vector<64x64xf32>
    %179 = arith.minimumf %178, %177 : vector<64x64xf32>
    %180 = arith.addf %101, %179 : vector<64x64xf32>
    %181 = vector.extract_strided_slice %19 {offsets = [0, 64], sizes = [64, 64], strides = [1, 1]} : vector<64x128xbf16> to vector<64x64xbf16>
    %182 = vector.extract_strided_slice %34 {offsets = [0, 64], sizes = [64, 64], strides = [1, 1]} : vector<64x128xbf16> to vector<64x64xbf16>
    %cst_65 = arith.constant dense<0.000000e+00> : vector<64x64xf32>
    %183 = tpu.matmul %181, %182, %cst_65 {dimension_numbers = #tpu.dot_dimension_numbers<[1], [1], [0], [0], [0, 0, 1, 0], [], []>} : vector<64x64xbf16>, vector<64x64xbf16>, vector<64x64xf32> -> vector<64x64xf32>
    %184 = arith.mulf %183, %126 : vector<64x64xf32>
    %185 = vector.broadcast %97 : vector<64x1xf32> to vector<64x64xf32>
    %186 = arith.addf %185, %184 : vector<64x64xf32>
    %187 = vector.extract_strided_slice %35 {offsets = [0, 64], sizes = [64, 64], strides = [1, 1]} : vector<64x128xbf16> to vector<64x64xbf16>
    %cst_66 = arith.constant dense<0.000000e+00> : vector<64x64xf32>
    %188 = tpu.matmul %181, %187, %cst_66 {dimension_numbers = #tpu.dot_dimension_numbers<[1], [1], [0], [0], [0, 0, 1, 0], [], []>} : vector<64x64xbf16>, vector<64x64xbf16>, vector<64x64xf32> -> vector<64x64xf32>
    %189 = arith.mulf %188, %128 : vector<64x64xf32>
    %190 = arith.addf %186, %189 : vector<64x64xf32>
    %191 = vector.extract_strided_slice %36 {offsets = [0, 64], sizes = [64, 64], strides = [1, 1]} : vector<64x128xbf16> to vector<64x64xbf16>
    %cst_67 = arith.constant dense<0.000000e+00> : vector<64x64xf32>
    %192 = tpu.matmul %181, %191, %cst_67 {dimension_numbers = #tpu.dot_dimension_numbers<[1], [1], [0], [0], [0, 0, 1, 0], [], []>} : vector<64x64xbf16>, vector<64x64xbf16>, vector<64x64xf32> -> vector<64x64xf32>
    %193 = arith.mulf %192, %131 : vector<64x64xf32>
    %194 = arith.addf %190, %193 : vector<64x64xf32>
    %cst_68 = arith.constant 0.000000e+00 : f32
    %195 = vector.broadcast %cst_68 : f32 to vector<64x64xf32>
    %196 = arith.select %117, %194, %195 : vector<64x64xi1>, vector<64x64xf32>
    %cst_69 = arith.constant 1.250000e-02 : f32
    %197 = vector.broadcast %cst_69 : f32 to vector<64x64xf32>
    %198 = arith.mulf %196, %197 : vector<64x64xf32>
    %cst_70 = arith.constant 0.000000e+00 : f32
    %cst_71 = arith.constant 1.000000e+00 : f32
    %199 = vector.broadcast %cst_70 : f32 to vector<64x64xf32>
    %200 = arith.maximumf %199, %198 : vector<64x64xf32>
    %201 = vector.broadcast %cst_71 : f32 to vector<64x64xf32>
    %202 = arith.minimumf %201, %200 : vector<64x64xf32>
    %cst_72 = arith.constant dense<0.000000e+00> : vector<64xf32>
    %203 = vector.multi_reduction <add>, %202, %cst_72 [1] : vector<64x64xf32> to vector<64xf32>
    %204 = vector.shape_cast %203 : vector<64xf32> to vector<64x1xf32>
    %cst_73 = arith.constant 0.521363616 : f32
    %205 = vector.broadcast %cst_73 : f32 to vector<64x1xf32>
    %206 = arith.mulf %205, %204 : vector<64x1xf32>
    %207 = arith.mulf %202, %126 : vector<64x64xf32>
    %208 = arith.truncf %207 : vector<64x64xf32> to vector<64x64xbf16>
    %209 = vector.extract_strided_slice %68 {offsets = [0, 64], sizes = [64, 64], strides = [1, 1]} : vector<64x128xbf16> to vector<64x64xbf16>
    %cst_74 = arith.constant dense<0.000000e+00> : vector<64x64xf32>
    %210 = tpu.matmul %208, %209, %cst_74 {dimension_numbers = #tpu.dot_dimension_numbers<[1], [0], [0], [1], [0, 0, 1, 1], [], []>} : vector<64x64xbf16>, vector<64x64xbf16>, vector<64x64xf32> -> vector<64x64xf32>
    %211 = vector.broadcast %206 : vector<64x1xf32> to vector<64x64xf32>
    %212 = arith.addf %211, %210 : vector<64x64xf32>
    %213 = arith.mulf %202, %128 : vector<64x64xf32>
    %214 = arith.truncf %213 : vector<64x64xf32> to vector<64x64xbf16>
    %215 = vector.extract_strided_slice %69 {offsets = [0, 64], sizes = [64, 64], strides = [1, 1]} : vector<64x128xbf16> to vector<64x64xbf16>
    %cst_75 = arith.constant dense<0.000000e+00> : vector<64x64xf32>
    %216 = tpu.matmul %214, %215, %cst_75 {dimension_numbers = #tpu.dot_dimension_numbers<[1], [0], [0], [1], [0, 0, 1, 1], [], []>} : vector<64x64xbf16>, vector<64x64xbf16>, vector<64x64xf32> -> vector<64x64xf32>
    %217 = arith.addf %212, %216 : vector<64x64xf32>
    %218 = arith.mulf %202, %131 : vector<64x64xf32>
    %219 = arith.truncf %218 : vector<64x64xf32> to vector<64x64xbf16>
    %220 = vector.extract_strided_slice %70 {offsets = [0, 64], sizes = [64, 64], strides = [1, 1]} : vector<64x128xbf16> to vector<64x64xbf16>
    %cst_76 = arith.constant dense<0.000000e+00> : vector<64x64xf32>
    %221 = tpu.matmul %219, %220, %cst_76 {dimension_numbers = #tpu.dot_dimension_numbers<[1], [0], [0], [1], [0, 0, 1, 1], [], []>} : vector<64x64xbf16>, vector<64x64xbf16>, vector<64x64xf32> -> vector<64x64xf32>
    %222 = arith.addf %217, %221 : vector<64x64xf32>
    %cst_77 = arith.constant 2.500000e-02 : f32
    %223 = vector.broadcast %cst_77 : f32 to vector<64x64xf32>
    %224 = arith.mulf %222, %223 : vector<64x64xf32>
    %cst_78 = arith.constant -1.000000e+00 : f32
    %cst_79 = arith.constant 1.000000e+00 : f32
    %225 = vector.broadcast %cst_78 : f32 to vector<64x64xf32>
    %226 = arith.maximumf %225, %224 : vector<64x64xf32>
    %227 = vector.broadcast %cst_79 : f32 to vector<64x64xf32>
    %228 = arith.minimumf %227, %226 : vector<64x64xf32>
    %229 = arith.addf %102, %228 : vector<64x64xf32>
    %c0_i32_80 = arith.constant 0 : i32
    %230 = arith.addi %0, %c0_i32_80 : i32
    %231 = tpu.iota {dimensions = array<i32: 1>} : vector<64x64xi32>
    %232 = vector.broadcast %230 : i32 to vector<64x64xi32>
    %233 = arith.addi %232, %231 : vector<64x64xi32>
    %234 = arith.subi %100, %233 : vector<64x64xi32>
    %c0_i32_81 = arith.constant 0 : i32
    %235 = vector.broadcast %c0_i32_81 : i32 to vector<64x64xi32>
    %236 = arith.cmpi sge, %234, %235 : vector<64x64xi32>
    %c16_i32_82 = arith.constant 16 : i32
    %237 = vector.broadcast %c16_i32_82 : i32 to vector<64x64xi32>
    %238 = arith.cmpi slt, %234, %237 : vector<64x64xi32>
    %239 = arith.andi %236, %238 : vector<64x64xi1>
    %c0_i32_83 = arith.constant 0 : i32
    %240 = vector.broadcast %c0_i32_83 : i32 to vector<64x64xi32>
    %241 = arith.cmpi sge, %233, %240 : vector<64x64xi32>
    %242 = arith.andi %239, %241 : vector<64x64xi1>
    %243 = arith.sitofp %234 : vector<64x64xi32> to vector<64x64xf32>
    %cst_84 = arith.constant -1.000000e-01 : f32
    %244 = vector.broadcast %cst_84 : f32 to vector<64x64xf32>
    %245 = arith.mulf %244, %243 : vector<64x64xf32>
    %246 = math.exp %245 : vector<64x64xf32>
    %cst_85 = arith.constant 0.000000e+00 : f32
    %247 = vector.broadcast %cst_85 : f32 to vector<64x64xf32>
    %248 = arith.select %242, %246, %247 : vector<64x64xi1>, vector<64x64xf32>
    %249 = arith.mulf %248, %248 : vector<64x64xf32>
    %cst_86 = arith.constant 13.6122608 : f32
    %250 = vector.broadcast %cst_86 : f32 to vector<64x64xf32>
    %251 = arith.mulf %248, %250 : vector<64x64xf32>
    %cst_87 = arith.constant -2.62044573 : f32
    %252 = vector.broadcast %cst_87 : f32 to vector<64x64xf32>
    %253 = arith.mulf %249, %252 : vector<64x64xf32>
    %254 = arith.mulf %249, %248 : vector<64x64xf32>
    %cst_88 = arith.constant 46.0548363 : f32
    %255 = vector.broadcast %cst_88 : f32 to vector<64x64xf32>
    %256 = arith.mulf %254, %255 : vector<64x64xf32>
    %257 = vector.extract_strided_slice %19 {offsets = [0, 0], sizes = [64, 64], strides = [1, 1]} : vector<64x128xbf16> to vector<64x64xbf16>
    %258 = vector.extract_strided_slice %51 {offsets = [0, 0], sizes = [64, 64], strides = [1, 1]} : vector<64x128xbf16> to vector<64x64xbf16>
    %cst_89 = arith.constant dense<0.000000e+00> : vector<64x64xf32>
    %259 = tpu.matmul %257, %258, %cst_89 {dimension_numbers = #tpu.dot_dimension_numbers<[1], [1], [0], [0], [0, 0, 1, 0], [], []>} : vector<64x64xbf16>, vector<64x64xbf16>, vector<64x64xf32> -> vector<64x64xf32>
    %260 = arith.mulf %259, %251 : vector<64x64xf32>
    %261 = vector.broadcast %92 : vector<64x1xf32> to vector<64x64xf32>
    %262 = arith.addf %261, %260 : vector<64x64xf32>
    %263 = vector.extract_strided_slice %52 {offsets = [0, 0], sizes = [64, 64], strides = [1, 1]} : vector<64x128xbf16> to vector<64x64xbf16>
    %cst_90 = arith.constant dense<0.000000e+00> : vector<64x64xf32>
    %264 = tpu.matmul %257, %263, %cst_90 {dimension_numbers = #tpu.dot_dimension_numbers<[1], [1], [0], [0], [0, 0, 1, 0], [], []>} : vector<64x64xbf16>, vector<64x64xbf16>, vector<64x64xf32> -> vector<64x64xf32>
    %265 = arith.mulf %264, %253 : vector<64x64xf32>
    %266 = arith.addf %262, %265 : vector<64x64xf32>
    %267 = vector.extract_strided_slice %53 {offsets = [0, 0], sizes = [64, 64], strides = [1, 1]} : vector<64x128xbf16> to vector<64x64xbf16>
    %cst_91 = arith.constant dense<0.000000e+00> : vector<64x64xf32>
    %268 = tpu.matmul %257, %267, %cst_91 {dimension_numbers = #tpu.dot_dimension_numbers<[1], [1], [0], [0], [0, 0, 1, 0], [], []>} : vector<64x64xbf16>, vector<64x64xbf16>, vector<64x64xf32> -> vector<64x64xf32>
    %269 = arith.mulf %268, %256 : vector<64x64xf32>
    %270 = arith.addf %266, %269 : vector<64x64xf32>
    %cst_92 = arith.constant 0.000000e+00 : f32
    %271 = vector.broadcast %cst_92 : f32 to vector<64x64xf32>
    %272 = arith.select %242, %270, %271 : vector<64x64xi1>, vector<64x64xf32>
    %cst_93 = arith.constant 1.250000e-02 : f32
    %273 = vector.broadcast %cst_93 : f32 to vector<64x64xf32>
    %274 = arith.mulf %272, %273 : vector<64x64xf32>
    %cst_94 = arith.constant 0.000000e+00 : f32
    %cst_95 = arith.constant 1.000000e+00 : f32
    %275 = vector.broadcast %cst_94 : f32 to vector<64x64xf32>
    %276 = arith.maximumf %275, %274 : vector<64x64xf32>
    %277 = vector.broadcast %cst_95 : f32 to vector<64x64xf32>
    %278 = arith.minimumf %277, %276 : vector<64x64xf32>
    %cst_96 = arith.constant dense<0.000000e+00> : vector<64xf32>
    %279 = vector.multi_reduction <add>, %278, %cst_96 [1] : vector<64x64xf32> to vector<64xf32>
    %280 = vector.shape_cast %279 : vector<64xf32> to vector<64x1xf32>
    %cst_97 = arith.constant 0.521363616 : f32
    %281 = vector.broadcast %cst_97 : f32 to vector<64x1xf32>
    %282 = arith.mulf %281, %280 : vector<64x1xf32>
    %283 = arith.mulf %278, %251 : vector<64x64xf32>
    %284 = arith.truncf %283 : vector<64x64xf32> to vector<64x64xbf16>
    %285 = vector.extract_strided_slice %85 {offsets = [0, 0], sizes = [64, 64], strides = [1, 1]} : vector<64x128xbf16> to vector<64x64xbf16>
    %cst_98 = arith.constant dense<0.000000e+00> : vector<64x64xf32>
    %286 = tpu.matmul %284, %285, %cst_98 {dimension_numbers = #tpu.dot_dimension_numbers<[1], [0], [0], [1], [0, 0, 1, 1], [], []>} : vector<64x64xbf16>, vector<64x64xbf16>, vector<64x64xf32> -> vector<64x64xf32>
    %287 = vector.broadcast %282 : vector<64x1xf32> to vector<64x64xf32>
    %288 = arith.addf %287, %286 : vector<64x64xf32>
    %289 = arith.mulf %278, %253 : vector<64x64xf32>
    %290 = arith.truncf %289 : vector<64x64xf32> to vector<64x64xbf16>
    %291 = vector.extract_strided_slice %86 {offsets = [0, 0], sizes = [64, 64], strides = [1, 1]} : vector<64x128xbf16> to vector<64x64xbf16>
    %cst_99 = arith.constant dense<0.000000e+00> : vector<64x64xf32>
    %292 = tpu.matmul %290, %291, %cst_99 {dimension_numbers = #tpu.dot_dimension_numbers<[1], [0], [0], [1], [0, 0, 1, 1], [], []>} : vector<64x64xbf16>, vector<64x64xbf16>, vector<64x64xf32> -> vector<64x64xf32>
    %293 = arith.addf %288, %292 : vector<64x64xf32>
    %294 = arith.mulf %278, %256 : vector<64x64xf32>
    %295 = arith.truncf %294 : vector<64x64xf32> to vector<64x64xbf16>
    %296 = vector.extract_strided_slice %87 {offsets = [0, 0], sizes = [64, 64], strides = [1, 1]} : vector<64x128xbf16> to vector<64x64xbf16>
    %cst_100 = arith.constant dense<0.000000e+00> : vector<64x64xf32>
    %297 = tpu.matmul %295, %296, %cst_100 {dimension_numbers = #tpu.dot_dimension_numbers<[1], [0], [0], [1], [0, 0, 1, 1], [], []>} : vector<64x64xbf16>, vector<64x64xbf16>, vector<64x64xf32> -> vector<64x64xf32>
    %298 = arith.addf %293, %297 : vector<64x64xf32>
    %cst_101 = arith.constant 2.500000e-02 : f32
    %299 = vector.broadcast %cst_101 : f32 to vector<64x64xf32>
    %300 = arith.mulf %298, %299 : vector<64x64xf32>
    %cst_102 = arith.constant -1.000000e+00 : f32
    %cst_103 = arith.constant 1.000000e+00 : f32
    %301 = vector.broadcast %cst_102 : f32 to vector<64x64xf32>
    %302 = arith.maximumf %301, %300 : vector<64x64xf32>
    %303 = vector.broadcast %cst_103 : f32 to vector<64x64xf32>
    %304 = arith.minimumf %303, %302 : vector<64x64xf32>
    %305 = arith.addf %180, %304 : vector<64x64xf32>
    %306 = vector.extract_strided_slice %19 {offsets = [0, 64], sizes = [64, 64], strides = [1, 1]} : vector<64x128xbf16> to vector<64x64xbf16>
    %307 = vector.extract_strided_slice %51 {offsets = [0, 64], sizes = [64, 64], strides = [1, 1]} : vector<64x128xbf16> to vector<64x64xbf16>
    %cst_104 = arith.constant dense<0.000000e+00> : vector<64x64xf32>
    %308 = tpu.matmul %306, %307, %cst_104 {dimension_numbers = #tpu.dot_dimension_numbers<[1], [1], [0], [0], [0, 0, 1, 0], [], []>} : vector<64x64xbf16>, vector<64x64xbf16>, vector<64x64xf32> -> vector<64x64xf32>
    %309 = arith.mulf %308, %251 : vector<64x64xf32>
    %310 = vector.broadcast %97 : vector<64x1xf32> to vector<64x64xf32>
    %311 = arith.addf %310, %309 : vector<64x64xf32>
    %312 = vector.extract_strided_slice %52 {offsets = [0, 64], sizes = [64, 64], strides = [1, 1]} : vector<64x128xbf16> to vector<64x64xbf16>
    %cst_105 = arith.constant dense<0.000000e+00> : vector<64x64xf32>
    %313 = tpu.matmul %306, %312, %cst_105 {dimension_numbers = #tpu.dot_dimension_numbers<[1], [1], [0], [0], [0, 0, 1, 0], [], []>} : vector<64x64xbf16>, vector<64x64xbf16>, vector<64x64xf32> -> vector<64x64xf32>
    %314 = arith.mulf %313, %253 : vector<64x64xf32>
    %315 = arith.addf %311, %314 : vector<64x64xf32>
    %316 = vector.extract_strided_slice %53 {offsets = [0, 64], sizes = [64, 64], strides = [1, 1]} : vector<64x128xbf16> to vector<64x64xbf16>
    %cst_106 = arith.constant dense<0.000000e+00> : vector<64x64xf32>
    %317 = tpu.matmul %306, %316, %cst_106 {dimension_numbers = #tpu.dot_dimension_numbers<[1], [1], [0], [0], [0, 0, 1, 0], [], []>} : vector<64x64xbf16>, vector<64x64xbf16>, vector<64x64xf32> -> vector<64x64xf32>
    %318 = arith.mulf %317, %256 : vector<64x64xf32>
    %319 = arith.addf %315, %318 : vector<64x64xf32>
    %cst_107 = arith.constant 0.000000e+00 : f32
    %320 = vector.broadcast %cst_107 : f32 to vector<64x64xf32>
    %321 = arith.select %242, %319, %320 : vector<64x64xi1>, vector<64x64xf32>
    %cst_108 = arith.constant 1.250000e-02 : f32
    %322 = vector.broadcast %cst_108 : f32 to vector<64x64xf32>
    %323 = arith.mulf %321, %322 : vector<64x64xf32>
    %cst_109 = arith.constant 0.000000e+00 : f32
    %cst_110 = arith.constant 1.000000e+00 : f32
    %324 = vector.broadcast %cst_109 : f32 to vector<64x64xf32>
    %325 = arith.maximumf %324, %323 : vector<64x64xf32>
    %326 = vector.broadcast %cst_110 : f32 to vector<64x64xf32>
    %327 = arith.minimumf %326, %325 : vector<64x64xf32>
    %cst_111 = arith.constant dense<0.000000e+00> : vector<64xf32>
    %328 = vector.multi_reduction <add>, %327, %cst_111 [1] : vector<64x64xf32> to vector<64xf32>
    %329 = vector.shape_cast %328 : vector<64xf32> to vector<64x1xf32>
    %cst_112 = arith.constant 0.521363616 : f32
    %330 = vector.broadcast %cst_112 : f32 to vector<64x1xf32>
    %331 = arith.mulf %330, %329 : vector<64x1xf32>
    %332 = arith.mulf %327, %251 : vector<64x64xf32>
    %333 = arith.truncf %332 : vector<64x64xf32> to vector<64x64xbf16>
    %334 = vector.extract_strided_slice %85 {offsets = [0, 64], sizes = [64, 64], strides = [1, 1]} : vector<64x128xbf16> to vector<64x64xbf16>
    %cst_113 = arith.constant dense<0.000000e+00> : vector<64x64xf32>
    %335 = tpu.matmul %333, %334, %cst_113 {dimension_numbers = #tpu.dot_dimension_numbers<[1], [0], [0], [1], [0, 0, 1, 1], [], []>} : vector<64x64xbf16>, vector<64x64xbf16>, vector<64x64xf32> -> vector<64x64xf32>
    %336 = vector.broadcast %331 : vector<64x1xf32> to vector<64x64xf32>
    %337 = arith.addf %336, %335 : vector<64x64xf32>
    %338 = arith.mulf %327, %253 : vector<64x64xf32>
    %339 = arith.truncf %338 : vector<64x64xf32> to vector<64x64xbf16>
    %340 = vector.extract_strided_slice %86 {offsets = [0, 64], sizes = [64, 64], strides = [1, 1]} : vector<64x128xbf16> to vector<64x64xbf16>
    %cst_114 = arith.constant dense<0.000000e+00> : vector<64x64xf32>
    %341 = tpu.matmul %339, %340, %cst_114 {dimension_numbers = #tpu.dot_dimension_numbers<[1], [0], [0], [1], [0, 0, 1, 1], [], []>} : vector<64x64xbf16>, vector<64x64xbf16>, vector<64x64xf32> -> vector<64x64xf32>
    %342 = arith.addf %337, %341 : vector<64x64xf32>
    %343 = arith.mulf %327, %256 : vector<64x64xf32>
    %344 = arith.truncf %343 : vector<64x64xf32> to vector<64x64xbf16>
    %345 = vector.extract_strided_slice %87 {offsets = [0, 64], sizes = [64, 64], strides = [1, 1]} : vector<64x128xbf16> to vector<64x64xbf16>
    %cst_115 = arith.constant dense<0.000000e+00> : vector<64x64xf32>
    %346 = tpu.matmul %344, %345, %cst_115 {dimension_numbers = #tpu.dot_dimension_numbers<[1], [0], [0], [1], [0, 0, 1, 1], [], []>} : vector<64x64xbf16>, vector<64x64xbf16>, vector<64x64xf32> -> vector<64x64xf32>
    %347 = arith.addf %342, %346 : vector<64x64xf32>
    %cst_116 = arith.constant 2.500000e-02 : f32
    %348 = vector.broadcast %cst_116 : f32 to vector<64x64xf32>
    %349 = arith.mulf %347, %348 : vector<64x64xf32>
    %cst_117 = arith.constant -1.000000e+00 : f32
    %cst_118 = arith.constant 1.000000e+00 : f32
    %350 = vector.broadcast %cst_117 : f32 to vector<64x64xf32>
    %351 = arith.maximumf %350, %349 : vector<64x64xf32>
    %352 = vector.broadcast %cst_118 : f32 to vector<64x64xf32>
    %353 = arith.minimumf %352, %351 : vector<64x64xf32>
    %354 = arith.addf %229, %353 : vector<64x64xf32>
    %355 = tpu.concatenate %305, %354 in 1 : vector<64x64xf32>, vector<64x64xf32> -> vector<64x128xf32>
    %356 = vector.broadcast %7 : vector<1x128xf32> to vector<64x128xf32>
    %357 = arith.mulf %356, %355 : vector<64x128xf32>
    %358 = vector.broadcast %8 : vector<1x128xf32> to vector<64x128xf32>
    %359 = arith.addf %357, %358 : vector<64x128xf32>
    %c0_119 = arith.constant 0 : index
    %c0_120 = arith.constant 0 : index
    %c0_121 = arith.constant 0 : index
    %360 = vector.load %arg8[%c0_119, %c0_120, %c0_121] : memref<1x64x128xf32, #tpu.memory_space<vmem>>, vector<1x64x128xf32>
    %361 = vector.shape_cast %360 : vector<1x64x128xf32> to vector<64x128xf32>
    %362 = vector.shape_cast %359 : vector<64x128xf32> to vector<1x64x128xf32>
    tpu.vector_store %arg8[%c0_119, %c0_120, %c0_121], %362 {strides = array<i32>} : memref<1x64x128xf32, #tpu.memory_space<vmem>>, vector<1x64x128xf32>,
    return
  }
  func.func @transform_0(%arg0: i32, %arg1: i32) -> (i32, i32) {
    %c0_i32 = arith.constant 0 : i32
    %c0_i32_0 = arith.constant 0 : i32
    %c0_i32_1 = arith.constant 0 : i32
    return %c0_i32, %c0_i32_0 : i32, i32
  }
  func.func @transform_1(%arg0: i32, %arg1: i32) -> (i32, i32, i32) {
    %c0_i32 = arith.constant 0 : i32
    %c0_i32_0 = arith.constant 0 : i32
    return %arg0, %arg1, %c0_i32 : i32, i32, i32
  }
  func.func @transform_2(%arg0: i32, %arg1: i32) -> (i32, i32, i32) {
    %c1_i32 = arith.constant 1 : i32
    %0 = arith.muli %arg1, %c1_i32 : i32
    %c1_i32_0 = arith.constant 1 : i32
    %1 = arith.subi %0, %c1_i32_0 : i32
    %c0_i32 = arith.constant 0 : i32
    %2 = arith.maxsi %1, %c0_i32 : i32
    %c0_i32_1 = arith.constant 0 : i32
    %c0_i32_2 = arith.constant 0 : i32
    return %arg0, %2, %c0_i32_1 : i32, i32, i32
  }
  func.func @transform_3(%arg0: i32, %arg1: i32) -> (i32, i32, i32) {
    %c0_i32 = arith.constant 0 : i32
    %c0_i32_0 = arith.constant 0 : i32
    return %arg0, %arg1, %c0_i32 : i32, i32, i32
  }
  func.func @transform_4(%arg0: i32, %arg1: i32) -> (i32, i32, i32) {
    %c1_i32 = arith.constant 1 : i32
    %0 = arith.muli %arg1, %c1_i32 : i32
    %c1_i32_0 = arith.constant 1 : i32
    %1 = arith.subi %0, %c1_i32_0 : i32
    %c0_i32 = arith.constant 0 : i32
    %2 = arith.maxsi %1, %c0_i32 : i32
    %c0_i32_1 = arith.constant 0 : i32
    %c0_i32_2 = arith.constant 0 : i32
    return %arg0, %2, %c0_i32_1 : i32, i32, i32
  }
  func.func @transform_5(%arg0: i32, %arg1: i32) -> (i32, i32, i32) {
    %c0_i32 = arith.constant 0 : i32
    %c0_i32_0 = arith.constant 0 : i32
    return %arg0, %arg1, %c0_i32 : i32, i32, i32
  }
  func.func @transform_6(%arg0: i32, %arg1: i32) -> (i32, i32, i32) {
    %c0_i32 = arith.constant 0 : i32
    %c0_i32_0 = arith.constant 0 : i32
    return %arg0, %arg1, %c0_i32 : i32, i32, i32
  }
}

</mosaic_0001>

<bundles_post_ra>
// kernel: dram_attention_forward.3
= control target key start
LH: loop header
LB: loop body
LE: loop exit
PB: predicated region body
PF: predicated region fallthrough
CT: control target
= control target key end

     0   :  { %7 = vsyncpa [#allocation3], 0  ;;  %s994_s0 = inlined_call_operand.hbm [shape: f32[256,128], index: 0, kind: input, shape index: {}]   ;;  %s995_s1 = inlined_call_operand.hbm [shape: f32[128,384], index: 1, kind: input, shape index: {}]   ;;  %s996_s2 = inlined_call_operand.vmem [shape: f32[256,384], index: 2, kind: output, shape index: {}]  }
   0x1   :  { %9 = vsyncpa [#allocation3 + $0x1], 0 }
   0x2   :  { %10 = vsyncpa [#allocation5], 0  ;;  %s772_s9 = smov 0   ;;  %s774_s10 = smov 0  }
   0x3   :  { %s776_s11 = smov 0   ;;  %s778_s12 = smov 0  }
   0x4 LB: > { %s557_s13 = sadd.s32 4294967295, %s750_s12   ;;  %p36_p0 = scmp.ne.s32.totalorder %s742_s10, %s738_s9  ;;  %s750_s12 = sphi %s778_s12, %s1004_s12   ;;  %s746_s11 = sphi %s776_s11, %s1003_s11   ;;  %s742_s10 = sphi %s774_s10, %s1002_s10   ;;  %s738_s9 = sphi %s772_s9, %s1001_s9  }
   0x5   : > { %p794_p1 = scmp.eq.s32.totalorder %s557_s13, 0  ;;  %p559_p2 = scmp.ge.s32.totalorder %s750_s12, 1 }
   0x6   : > { %p94_p3 = scmp.lt.s32.totalorder %s750_s12, 3  ;;  %s105_s18 = sshll.u32 %s995_s1, 4  ;;  %s106_s18 = int_to_ptr.hbm [resolvable:$true] %s105_s18 }
   0x7   : > { %p802_p4 = por %p794_p1, %p36_p0  ;;  %s752_s20 = smov [#allocation4]  }
   0x8   : > { %p809_p5 = pnand %p559_p2, %p94_p3  ;;  %s107_s21 = sshll.u32 %s752_s20, 4  ;;  %s108_s21 = int_to_ptr.vmem [resolvable:$true] %s107_s21 }
   0x9   : > { %s818_s22 = sadd.s32 1, %s750_s12   ;;  %s753_s23 = smov 384  }
   0xa   : > { %p604_p6 = pneg %p809_p5  ;;  %s754_s24 = smov 24  }
   0xb   : > { %s20_s25 = ssub.s32 %s750_s12, %s818_s22  ;;  %s23_s26 = sadd.s32 1, %s746_s11 }
   0xc   : > { %p605_p7 = pnand %p604_p6, %p794_p1  ;;  %p21_p8 = scmp.eq.s32.totalorder %s20_s25, 0 }
   0xd   : > { %p30_p9 = scmp.ne.s32.totalorder %s746_s11, %s742_s10  ;;  %p31_p10 = scmp.eq.s32.totalorder %s750_s12, 0 }
   0xe   : > { %607 = dma.hbm_to_vmem [thread:$0]  (!%p605_p7), %s106_s18, 6144, %s108_s21, [#allocation5], %s753_s23, %s753_s23, %s754_s24  }
   0xf   : > { %p613_p11 = scmp.lt.s32.totalorder %s750_s12, 2  ;;  %p32_p12 = por %p31_p10, %p30_p9 }
  0x10   : > { %s828_s27 = scalar_select %p21_p8, %s746_s11, %s23_s26  }
  0x11   : > { %s121_s28 = sand.u32 1, %s746_s11   ;;  %s572_s30 = sshll.u32 %s750_s12, 7 }
  0x12   : > { %s562_s29 = sshll.u32 %s121_s28, 7  ;;  %s130_s5 = scalar_lea.hbm %s994_s0, %s572_s30 }
  0x13   : > { %s125_s6 = scalar_lea.vmem [#allocation2], %s562_s29  ;;  %s131_s8 = sshll.u32 %s130_s5, 4  ;;  %s132_s8 = int_to_ptr.hbm [resolvable:$true] %s131_s8 }
  0x14   : > { %s133_s7 = sshll.u32 %s125_s6, 4  ;;  %p835_p13 = pnand %p613_p11, %p32_p12  ;;  %s134_s7 = int_to_ptr.vmem [resolvable:$true] %s133_s7 }
  0x15   : > { %s122_s16 = scalar_lea.sflag [#allocation3], %s121_s28  ;;  %s682_s17 = sshra.s32 %s132_s8, 4  ;;  %s683_s17 = int_to_ptr.hbm [resolvable:$true] %s682_s17 }
  0x16   : > { %s684_s18 = scalar_lea.hbm %s683_s17, 128  ;;  %p686_p2 = pneg %p835_p13 }
  0x17   : > { %p685_p0 = scmp.ne.s32.totalorder %s683_s17, %s684_s18  ;;  %s689_s23 = scalar_lea.hbm %s994_s0, 256 }
  0x18   : > { %p690_p7 = scmp.lt.s32.totalorder %s683_s17, %s994_s0  ;;  %p691_p8 = scmp.lt.s32.totalorder %s689_s23, %s684_s18 }
  0x19   : > { %p687_p3 = pnand %p686_p2, %p685_p0 }
  0x1a   : > { %p692_p9 = por %p691_p8, %p690_p7 }
  0x1b   : > { %p688_p6 = pneg %p687_p3 }
  0x1d   : > { %p693_p10 = pnand %p692_p9, %p688_p6 }
  0x1f   : > { %696 = shalt.err (!%p693_p10)
}
  0x20   : > { %s755_s26 = smov 128   ;;  %s756_s28 = smov 8  }
  0x21   : > { %611 = dma.hbm_to_vmem [thread:$0]  (!%p835_p13), %s132_s8, 2048, %s134_s7, %s122_s16, %s755_s26, %s755_s26, %s756_s28  }
  0x22   : > { %145 = sbr.rel (%p809_p5) target bundleno = 299 (0x12b), region = 28  ;;  %s147_s29 = sand.u32 (!%p809_p5), 1, %s742_s10  }
  0x23   : > { %s566_s30 = sshll.u32 (!%p809_p5), %s147_s29, 7  ;;  %s148_s3 = scalar_lea.sflag (!%p809_p5), [#allocation3], %s147_s29 }
  0x24   : > { %s852_s4 = scalar_lea.vmem (!%p809_p5), [#allocation2], %s566_s30 }
  0x27   : > { %729 = dma.done.wait (%p802_p4), %s148_s3, 2048  }
  0x28   : > { %731 = vsyncadd (%p802_p4), %s148_s3, 4294965248 }
  0x29   : > { %733 = dma.done.wait (%p794_p1), [#allocation5], 6144  }
  0x2a   : > { %735 = vsyncadd (%p794_p1), [#allocation5], 4294961152  ;;  %v253_v0 = vld [vmem:[#allocation4 + $0x150] sm:$0xff]  ;;  %v256_v1 = vld [vmem:[#allocation4 + $0x168] sm:$0xff]  ;;  %s568_s14 = sshll.u32 %s557_s13, 4 }
  0x2b   : > { %v254_v2 = vld [vmem:[#allocation4 + $0x158] sm:$0xff]  ;;  %v280_v3 = vpack.c.bf16 %v256_v1, %v253_v0  ;;  %v257_v4 = vld [vmem:[#allocation4 + $0x170] sm:$0xff]  ;;  %v255_v5 = vld [vmem:[#allocation4 + $0x160] sm:$0xff]  ;;  %p181_p1 = scmp.lt.s32.totalorder %s568_s14, 31 }
  0x2c   : > { %v258_v6 = vld [vmem:[#allocation4 + $0x178] sm:$0xff]  ;;  %v862_v7 = vpack.c.bf16 %v257_v4, %v254_v2  ;;  %v247_v9 = vld [vmem:[#allocation4 + $0x120] sm:$0xff]  ;;  %v248_v11 = vld [vmem:[#allocation4 + $0x128] sm:$0xff] }
  0x2d   : > { %v864_v8 = vpack.c.bf16 %v258_v6, %v255_v5  ;;  %v250_v10 = vld [vmem:[#allocation4 + $0x138] sm:$0xff]  ;;  %283 = vmatpush.bf16.msra.mxu0 %v280_v3  ;;  %573 = vmatpush.bf16.msra.mxu3 %v280_v3  ;;  %v251_v13 = vld [vmem:[#allocation4 + $0x140] sm:$0xff]  ;;  %v249_v14 = vld [vmem:[#allocation4 + $0x130] sm:$0xff]  ;;  %s1006_s14 = smov (!%p181_p1, %s568_s14), 31 }
  0x2e   : > { %v277_v12 = vpack.c.bf16 %v250_v10, %v247_v9  ;;  %v252_v15 = vld [vmem:[#allocation4 + $0x148] sm:$0xff]  ;;  %332 = vmatpush.bf16.msra.mxu1 %v862_v7  ;;  %v868_v16 = vpack.c.bf16 %v251_v13, %v248_v11  ;;  %v241_v18 = vld [vmem:[#allocation4 + $0xf0] sm:$0xff]  ;;  %v242_v20 = vld [vmem:[#allocation4 + $0xf8] sm:$0xff]  ;;  %s597_s15 = smul.u32 24, %s1006_s14 }
  0x2f   : > { %381 = vmatpush.bf16.msra.mxu2 %v864_v8  ;;  %v870_v17 = vpack.c.bf16 %v252_v15, %v249_v14  ;;  %v244_v19 = vld [vmem:[#allocation4 + $0x108] sm:$0xff]  ;;  %v245_v21 = vld [vmem:[#allocation4 + $0x110] sm:$0xff]  ;;  %v243_v22 = vld [vmem:[#allocation4 + $0x100] sm:$0xff] }
  0x30   : > { %v246_v23 = vld [vmem:[#allocation4 + $0x118] sm:$0xff]  ;;  %v274_v24 = vpack.c.bf16 %v244_v19, %v241_v18  ;;  %v874_v25 = vpack.c.bf16 %v245_v21, %v242_v20  ;;  %v235_v27 = vld [vmem:[#allocation4 + $0xc0] sm:$0xff]  ;;  %v236_v29 = vld [vmem:[#allocation4 + $0xc8] sm:$0xff]  ;;  %s931_s6 = scalar_lea.vmem %s996_s2, %s597_s15 }
  0x31   : > { %284 = vmatpush.bf16.msra.mxu0 %v277_v12  ;;  %574 = vmatpush.bf16.msra.mxu3 %v277_v12  ;;  %v876_v26 = vpack.c.bf16 %v246_v23, %v243_v22  ;;  %v238_v28 = vld [vmem:[#allocation4 + $0xd8] sm:$0xff]  ;;  %v239_v30 = vld [vmem:[#allocation4 + $0xe0] sm:$0xff]  ;;  %v237_v31 = vld [vmem:[#allocation4 + $0xd0] sm:$0xff] }
  0x32   : > { %333 = vmatpush.bf16.msra.mxu1 %v868_v16  ;;  %v240_v32 = vld [vmem:[#allocation4 + $0xe8] sm:$0xff]  ;;  %v271_v33 = vpack.c.bf16 %v238_v28, %v235_v27  ;;  %v880_v34 = vpack.c.bf16 %v239_v30, %v236_v29  ;;  %v229_v36 = vld [vmem:[#allocation4 + $0x90] sm:$0xff]  ;;  %v230_v38 = vld [vmem:[#allocation4 + $0x98] sm:$0xff] }
  0x33   : > { %382 = vmatpush.bf16.msra.mxu2 %v870_v17  ;;  %v882_v35 = vpack.c.bf16 %v240_v32, %v237_v31  ;;  %v232_v37 = vld [vmem:[#allocation4 + $0xa8] sm:$0xff]  ;;  %v233_v39 = vld [vmem:[#allocation4 + $0xb0] sm:$0xff]  ;;  %v231_v40 = vld [vmem:[#allocation4 + $0xa0] sm:$0xff] }
  0x34   : > { %v234_v41 = vld [vmem:[#allocation4 + $0xb8] sm:$0xff]  ;;  %v268_v42 = vpack.c.bf16 %v232_v37, %v229_v36  ;;  %v886_v43 = vpack.c.bf16 %v233_v39, %v230_v38  ;;  %v223_v45 = vld [vmem:[#allocation4 + $0x60] sm:$0xff]  ;;  %v224_v47 = vld [vmem:[#allocation4 + $0x68] sm:$0xff] }
  0x35   : > { %285 = vmatpush.bf16.msra.mxu0 %v274_v24  ;;  %575 = vmatpush.bf16.msra.mxu3 %v274_v24  ;;  %v888_v44 = vpack.c.bf16 %v234_v41, %v231_v40  ;;  %v226_v46 = vld [vmem:[#allocation4 + $0x78] sm:$0xff]  ;;  %v227_v48 = vld [vmem:[#allocation4 + $0x80] sm:$0xff]  ;;  %v225_v49 = vld [vmem:[#allocation4 + $0x70] sm:$0xff] }
  0x36   : > { %334 = vmatpush.bf16.msra.mxu1 %v874_v25  ;;  %v228_v50 = vld [vmem:[#allocation4 + $0x88] sm:$0xff]  ;;  %v265_v51 = vpack.c.bf16 %v226_v46, %v223_v45  ;;  %v266_v52 = vpack.c.bf16 %v227_v48, %v224_v47  ;;  %v217_v54 = vld [vmem:[#allocation4 + $0x30] sm:$0xff]  ;;  %v218_v56 = vld [vmem:[#allocation4 + $0x38] sm:$0xff] }
  0x37   : > { %383 = vmatpush.bf16.msra.mxu2 %v876_v26  ;;  %v892_v53 = vpack.c.bf16 %v228_v50, %v225_v49  ;;  %v220_v55 = vld [vmem:[#allocation4 + $0x48] sm:$0xff]  ;;  %v221_v57 = vld [vmem:[#allocation4 + $0x50] sm:$0xff]  ;;  %v219_v58 = vld [vmem:[#allocation4 + $0x40] sm:$0xff] }
  0x38   : > { %v222_v59 = vld [vmem:[#allocation4 + $0x58] sm:$0xff]  ;;  %v262_v60 = vpack.c.bf16 %v220_v55, %v217_v54  ;;  %v263_v61 = vpack.c.bf16 %v221_v57, %v218_v56  ;;  %v211_v63 = vld [vmem:[#allocation4] sm:$0xff]  ;;  %v212_v1 = vld [vmem:[#allocation4 + $0x8] sm:$0xff] }
  0x39   : > { %286 = vmatpush.bf16.msra.mxu0 %v271_v33  ;;  %576 = vmatpush.bf16.msra.mxu3 %v271_v33  ;;  %v895_v62 = vpack.c.bf16 %v222_v59, %v219_v58  ;;  %v214_v0 = vld [vmem:[#allocation4 + $0x18] sm:$0xff]  ;;  %v215_v2 = vld [vmem:[#allocation4 + $0x20] sm:$0xff]  ;;  %v213_v3 = vld [vmem:[#allocation4 + $0x10] sm:$0xff] }
  0x3a   : > { %335 = vmatpush.bf16.msra.mxu1 %v880_v34  ;;  %v216_v4 = vld [vmem:[#allocation4 + $0x28] sm:$0xff]  ;;  %v187_v5 = vld [vmem:[%s852_s4] sm:$0xff]  ;;  %v259_v6 = vpack.c.bf16 %v214_v0, %v211_v63  ;;  %v260_v12 = vpack.c.bf16 %v215_v2, %v212_v1  ;;  %v189_v18 = vld [vmem:[%s852_s4 + $0x10] sm:$0xff] }
  0x3b   : > { %384 = vmatpush.bf16.msra.mxu2 %v882_v35  ;;  %v188_v9 = vld [vmem:[%s852_s4 + $0x8] sm:$0xff]  ;;  %v199_v10 = vld [vmem:[%s852_s4 + $0x60] sm:$0xff]  ;;  %v261_v13 = vpack.c.bf16 %v216_v4, %v213_v3  ;;  %v190_v19 = vld [vmem:[%s852_s4 + $0x18] sm:$0xff] }
  0x3c   : > { %v200_v11 = vld [vmem:[%s852_s4 + $0x68] sm:$0xff]  ;;  %v203_v14 = vpack.c.bf16 %v188_v9, %v187_v5  ;;  %v201_v20 = vld [vmem:[%s852_s4 + $0x70] sm:$0xff]  ;;  %v202_v21 = vld [vmem:[%s852_s4 + $0x78] sm:$0xff]  ;;  %v204_v22 = vpack.c.bf16 %v190_v19, %v189_v18 }
  0x3d   : > { %287 = vmatpush.bf16.msra.mxu0 %v268_v42  ;;  %577 = vmatpush.bf16.msra.mxu3 %v268_v42  ;;  %v209_v15 = vpack.c.bf16 %v200_v11, %v199_v10  ;;  %v210_v23 = vpack.c.bf16 %v202_v21, %v201_v20  ;;  %v194_v27 = vld [vmem:[%s852_s4 + $0x38] sm:$0xff]  ;;  %v197_v29 = vld [vmem:[%s852_s4 + $0x50] sm:$0xff] }
  0x3e   : > { %336 = vmatpush.bf16.msra.mxu1 %v886_v43  ;;  %v198_v30 = vld [vmem:[%s852_s4 + $0x58] sm:$0xff] }
  0x3f   : > { %385 = vmatpush.bf16.msra.mxu2 %v888_v44  ;;  %v208_v31 = vpack.c.bf16 %v198_v30, %v197_v29 }
  0x41   : > { %288 = vmatpush.bf16.msra.mxu0 %v265_v51  ;;  %578 = vmatpush.bf16.msra.mxu3 %v265_v51 }
  0x42   : > { %337 = vmatpush.bf16.msra.mxu1 %v266_v52 }
  0x43   : > { %386 = vmatpush.bf16.msra.mxu2 %v892_v53 }
  0x45   : > { %289 = vmatpush.bf16.msra.mxu0 %v262_v60  ;;  %579 = vmatpush.bf16.msra.mxu3 %v262_v60 }
  0x46   : > { %338 = vmatpush.bf16.msra.mxu1 %v263_v61 }
  0x47   : > { %387 = vmatpush.bf16.msra.mxu2 %v895_v62 }
  0x49   : > { %290 = vmatpush.bf16.msra.mxu0 %v259_v6  ;;  %580 = vmatpush.bf16.msra.mxu3 %v259_v6 }
  0x4a   : > { %339 = vmatpush.bf16.msra.mxu1 %v260_v12 }
  0x4b   : > { %388 = vmatpush.bf16.msra.mxu2 %v261_v13 }
  0x4c   : > { %291 = vmatmul.bf16.vlgmr.msra.gmra.mxu0 %v203_v14  ;;  %321 = vmatmul.bf16.vlgmr.msra.gmra.mxu3 %v209_v15 }
  0x4d   : > { %581 = vmatpush.bf16.msrb.mxu3 %v862_v7  ;;  %340 = vmatmul.bf16.vlgmr.msra.gmra.mxu1 %v203_v14  ;;  %v191_v7 = vld [vmem:[%s852_s4 + $0x20] sm:$0xff] }
  0x4e   : > { %389 = vmatmul.bf16.vlgmr.msra.gmra.mxu2 %v203_v14 }
  0x51   : > { %582 = vmatpush.bf16.msrb.mxu3 %v868_v16  ;;  %v192_v16 = vld [vmem:[%s852_s4 + $0x28] sm:$0xff] }
  0x52   : > { %v205_v24 = vpack.c.bf16 %v192_v16, %v191_v7 }
  0x55   : > { %583 = vmatpush.bf16.msrb.mxu3 %v874_v25  ;;  %v193_v25 = vld [vmem:[%s852_s4 + $0x30] sm:$0xff] }
  0x56   : > { %v206_v28 = vpack.c.bf16 %v194_v27, %v193_v25 }
  0x59   : > { %584 = vmatpush.bf16.msrb.mxu3 %v880_v34 }
  0x5c   : > { %296 = vmatmul.bf16.gmra.mxu0 %v204_v22  ;;  %326 = vmatmul.bf16.gmra.mxu3 %v210_v23 }
  0x5d   : > { %585 = vmatpush.bf16.msrb.mxu3 %v886_v43  ;;  %345 = vmatmul.bf16.gmra.mxu1 %v204_v22 }
  0x5e   : > { %394 = vmatmul.bf16.gmra.mxu2 %v204_v22 }
  0x61   : > { %586 = vmatpush.bf16.msrb.mxu3 %v266_v52 }
  0x65   : > { %587 = vmatpush.bf16.msrb.mxu3 %v263_v61 }
  0x69   : > { %588 = vmatpush.bf16.msrb.mxu3 %v260_v12 }
  0x6c   : > { %301 = vmatmul.bf16.gmra.mxu0 %v205_v24  ;;  %370 = vmatmul.bf16.vlgmr.msrb.gmra.mxu3 %v209_v15 }
  0x6d   : > { %589 = vmatpush.bf16.msra.mxu3 %v864_v8  ;;  %350 = vmatmul.bf16.gmra.mxu1 %v205_v24  ;;  %v195_v8 = vld [vmem:[%s852_s4 + $0x40] sm:$0xff] }
  0x6e   : > { %399 = vmatmul.bf16.gmra.mxu2 %v205_v24 }
  0x71   : > { %590 = vmatpush.bf16.msra.mxu3 %v870_v17  ;;  %v196_v17 = vld [vmem:[%s852_s4 + $0x48] sm:$0xff] }
  0x75   : > { %591 = vmatpush.bf16.msra.mxu3 %v876_v26  ;;  %v207_v26 = vpack.c.bf16 %v196_v17, %v195_v8 }
  0x79   : > { %592 = vmatpush.bf16.msra.mxu3 %v882_v35 }
  0x7c   : > { %306 = vmatmul.bf16.gmra.mxu0 %v206_v28  ;;  %375 = vmatmul.bf16.gmra.mxu3 %v210_v23 }
  0x7d   : > { %593 = vmatpush.bf16.msra.mxu3 %v888_v44  ;;  %355 = vmatmul.bf16.gmra.mxu1 %v206_v28 }
  0x7e   : > { %404 = vmatmul.bf16.gmra.mxu2 %v206_v28 }
  0x81   : > { %594 = vmatpush.bf16.msra.mxu3 %v892_v53 }
  0x85   : > { %595 = vmatpush.bf16.msra.mxu3 %v895_v62 }
  0x89   : > { %596 = vmatpush.bf16.msra.mxu3 %v261_v13 }
  0x8c   : > { %311 = vmatmul.bf16.gmra.mxu0 %v207_v26  ;;  %419 = vmatmul.bf16.vlgmr.msra.gmra.mxu3 %v209_v15 }
  0x8d   : > { %360 = vmatmul.bf16.gmra.mxu1 %v207_v26 }
  0x8e   : > { %409 = vmatmul.bf16.gmra.mxu2 %v207_v26 }
  0x9c   : > { %316 = vmatmul.bf16.gmra.mxu0 %v208_v31  ;;  %424 = vmatmul.bf16.gmra.mxu3 %v210_v23 }
  0x9d   : > { %365 = vmatmul.bf16.gmra.mxu1 %v208_v31 }
  0x9e   : > { %414 = vmatmul.bf16.gmra.mxu2 %v208_v31 }
  0xc9   : > { %v292_v32 = vpop.f32.mrf.mxu0 }
  0xca   : > { %430 = vst [vmem:[%s931_s6] sm:$0xff] %v292_v32  ;;  %v341_v33 = vpop.f32.mrf.mxu1 }
  0xcb   : > { %431 = vst [vmem:[%s931_s6 + $0x8] sm:$0xff] %v341_v33 }
  0xcf   : > { %v322_v34 = vpop.f32.mrf.mxu3 }
  0xd0   : > { %466 = vst [vmem:[%s931_s6 + $0x120] sm:$0xff] %v322_v34 }
  0xd1   : > { %v390_v35 = vpop.f32.mrf.mxu2  ;;  %v294_v36 = vpop.f32.mrf.mxu0 }
  0xd2   : > { %432 = vst [vmem:[%s931_s6 + $0x10] sm:$0xff] %v390_v35  ;;  %v343_v37 = vpop.f32.mrf.mxu1 }
  0xd3   : > { %433 = vst [vmem:[%s931_s6 + $0x18] sm:$0xff] %v294_v36 }
  0xd4   : > { %434 = vst [vmem:[%s931_s6 + $0x20] sm:$0xff] %v343_v37 }
  0xd7   : > { %v324_v38 = vpop.f32.mrf.mxu3 }
  0xd8   : > { %469 = vst [vmem:[%s931_s6 + $0x138] sm:$0xff] %v324_v38 }
  0xd9   : > { %v392_v39 = vpop.f32.mrf.mxu2  ;;  %v297_v40 = vpop.f32.mrf.mxu0 }
  0xda   : > { %435 = vst [vmem:[%s931_s6 + $0x28] sm:$0xff] %v392_v39  ;;  %v346_v41 = vpop.f32.mrf.mxu1 }
  0xdb   : > { %436 = vst [vmem:[%s931_s6 + $0x30] sm:$0xff] %v297_v40 }
  0xdc   : > { %437 = vst [vmem:[%s931_s6 + $0x38] sm:$0xff] %v346_v41 }
  0xdf   : > { %v327_v42 = vpop.f32.mrf.mxu3 }
  0xe0   : > { %472 = vst [vmem:[%s931_s6 + $0x150] sm:$0xff] %v327_v42 }
  0xe1   : > { %v395_v43 = vpop.f32.mrf.mxu2  ;;  %v299_v44 = vpop.f32.mrf.mxu0 }
  0xe2   : > { %438 = vst [vmem:[%s931_s6 + $0x40] sm:$0xff] %v395_v43  ;;  %v348_v45 = vpop.f32.mrf.mxu1 }
  0xe3   : > { %439 = vst [vmem:[%s931_s6 + $0x48] sm:$0xff] %v299_v44 }
  0xe4   : > { %440 = vst [vmem:[%s931_s6 + $0x50] sm:$0xff] %v348_v45 }
  0xe7   : > { %v329_v46 = vpop.f32.mrf.mxu3 }
  0xe8   : > { %475 = vst [vmem:[%s931_s6 + $0x168] sm:$0xff] %v329_v46 }
  0xe9   : > { %v397_v47 = vpop.f32.mrf.mxu2  ;;  %v302_v48 = vpop.f32.mrf.mxu0 }
  0xea   : > { %441 = vst [vmem:[%s931_s6 + $0x58] sm:$0xff] %v397_v47  ;;  %v351_v49 = vpop.f32.mrf.mxu1 }
  0xeb   : > { %442 = vst [vmem:[%s931_s6 + $0x60] sm:$0xff] %v302_v48 }
  0xec   : > { %443 = vst [vmem:[%s931_s6 + $0x68] sm:$0xff] %v351_v49 }
  0xef   : > { %v371_v50 = vpop.f32.mrf.mxu3 }
  0xf0   : > { %467 = vst [vmem:[%s931_s6 + $0x128] sm:$0xff] %v371_v50 }
  0xf1   : > { %v400_v51 = vpop.f32.mrf.mxu2  ;;  %v304_v52 = vpop.f32.mrf.mxu0 }
  0xf2   : > { %444 = vst [vmem:[%s931_s6 + $0x70] sm:$0xff] %v400_v51  ;;  %v353_v53 = vpop.f32.mrf.mxu1 }
  0xf3   : > { %445 = vst [vmem:[%s931_s6 + $0x78] sm:$0xff] %v304_v52 }
  0xf4   : > { %446 = vst [vmem:[%s931_s6 + $0x80] sm:$0xff] %v353_v53 }
  0xf7   : > { %v373_v54 = vpop.f32.mrf.mxu3 }
  0xf8   : > { %470 = vst [vmem:[%s931_s6 + $0x140] sm:$0xff] %v373_v54 }
  0xf9   : > { %v402_v55 = vpop.f32.mrf.mxu2  ;;  %v307_v56 = vpop.f32.mrf.mxu0 }
  0xfa   : > { %447 = vst [vmem:[%s931_s6 + $0x88] sm:$0xff] %v402_v55  ;;  %v356_v57 = vpop.f32.mrf.mxu1 }
  0xfb   : > { %448 = vst [vmem:[%s931_s6 + $0x90] sm:$0xff] %v307_v56 }
  0xfc   : > { %449 = vst [vmem:[%s931_s6 + $0x98] sm:$0xff] %v356_v57 }
  0xff   : > { %v376_v58 = vpop.f32.mrf.mxu3 }
 0x100   : > { %473 = vst [vmem:[%s931_s6 + $0x158] sm:$0xff] %v376_v58 }
 0x101   : > { %v405_v59 = vpop.f32.mrf.mxu2  ;;  %v309_v60 = vpop.f32.mrf.mxu0 }
 0x102   : > { %450 = vst [vmem:[%s931_s6 + $0xa0] sm:$0xff] %v405_v59  ;;  %v358_v61 = vpop.f32.mrf.mxu1 }
 0x103   : > { %451 = vst [vmem:[%s931_s6 + $0xa8] sm:$0xff] %v309_v60 }
 0x104   : > { %452 = vst [vmem:[%s931_s6 + $0xb0] sm:$0xff] %v358_v61 }
 0x107   : > { %v378_v62 = vpop.f32.mrf.mxu3 }
 0x108   : > { %476 = vst [vmem:[%s931_s6 + $0x170] sm:$0xff] %v378_v62 }
 0x109   : > { %v407_v63 = vpop.f32.mrf.mxu2  ;;  %v312_v0 = vpop.f32.mrf.mxu0 }
 0x10a   : > { %453 = vst [vmem:[%s931_s6 + $0xb8] sm:$0xff] %v407_v63  ;;  %v361_v1 = vpop.f32.mrf.mxu1 }
 0x10b   : > { %454 = vst [vmem:[%s931_s6 + $0xc0] sm:$0xff] %v312_v0 }
 0x10c   : > { %455 = vst [vmem:[%s931_s6 + $0xc8] sm:$0xff] %v361_v1 }
 0x10f   : > { %v420_v2 = vpop.f32.mrf.mxu3 }
 0x110   : > { %468 = vst [vmem:[%s931_s6 + $0x130] sm:$0xff] %v420_v2 }
 0x111   : > { %v410_v3 = vpop.f32.mrf.mxu2  ;;  %v314_v4 = vpop.f32.mrf.mxu0 }
 0x112   : > { %456 = vst [vmem:[%s931_s6 + $0xd0] sm:$0xff] %v410_v3  ;;  %v363_v5 = vpop.f32.mrf.mxu1 }
 0x113   : > { %457 = vst [vmem:[%s931_s6 + $0xd8] sm:$0xff] %v314_v4 }
 0x114   : > { %458 = vst [vmem:[%s931_s6 + $0xe0] sm:$0xff] %v363_v5 }
 0x117   : > { %v422_v6 = vpop.f32.mrf.mxu3 }
 0x118   : > { %471 = vst [vmem:[%s931_s6 + $0x148] sm:$0xff] %v422_v6 }
 0x119   : > { %v412_v9 = vpop.f32.mrf.mxu2  ;;  %v317_v10 = vpop.f32.mrf.mxu0 }
 0x11a   : > { %459 = vst [vmem:[%s931_s6 + $0xe8] sm:$0xff] %v412_v9  ;;  %v366_v11 = vpop.f32.mrf.mxu1 }
 0x11b   : > { %460 = vst [vmem:[%s931_s6 + $0xf0] sm:$0xff] %v317_v10 }
 0x11c   : > { %461 = vst [vmem:[%s931_s6 + $0xf8] sm:$0xff] %v366_v11 }
 0x11f   : > { %v425_v12 = vpop.f32.mrf.mxu3 }
 0x120   : > { %474 = vst [vmem:[%s931_s6 + $0x160] sm:$0xff] %v425_v12 }
 0x121   : > { %v415_v13 = vpop.f32.mrf.mxu2  ;;  %v319_v14 = vpop.f32.mrf.mxu0 }
 0x122   : > { %462 = vst [vmem:[%s931_s6 + $0x100] sm:$0xff] %v415_v13  ;;  %v368_v15 = vpop.f32.mrf.mxu1 }
 0x123   : > { %463 = vst [vmem:[%s931_s6 + $0x108] sm:$0xff] %v319_v14 }
 0x124   : > { %464 = vst [vmem:[%s931_s6 + $0x110] sm:$0xff] %v368_v15 }
 0x127   : > { %v427_v18 = vpop.f32.mrf.mxu3 }
 0x128   : > { %477 = vst [vmem:[%s931_s6 + $0x178] sm:$0xff] %v427_v18 }
 0x129   : > { %v417_v19 = vpop.f32.mrf.mxu2 }
 0x12a   : > { %465 = vst [vmem:[%s931_s6 + $0x118] sm:$0xff] %v417_v19 }
 0x12b PF: > { %p13_p4 = scmp.ge.s32.totalorder %s818_s22, 4   ;;  %s1001_s9 = smov %s742_s10 }
 0x12c   : > { %s1002_s10 = smov %s746_s11  ;;  %s1003_s11 = smov %s828_s27 }
 0x12d   : > { %s1004_s12 = smov %s818_s22  ;;  %15 = sbr.rel (!%p13_p4) target bundleno = 4 (0x4), region = 72 }
 0x132   :  { %502 = vsyncpa [#allocation3], 1 }
 0x133   :  { %504 = vsyncpa [#allocation3 + $0x1], 1 }
 0x134   :  { %505 = vsyncpa [#allocation5], 1 }

// kernel: dram_attention_forward.5
= control target key start
LH: loop header
LB: loop body
LE: loop exit
PB: predicated region body
PF: predicated region fallthrough
CT: control target
= control target key end

     0   :  { %7 = vsyncpa [#allocation3], 0  ;;  %s668_s0 = inlined_call_operand.vmem [shape: f32[256,128], index: 0, kind: input, shape index: {}]   ;;  %s669_s1 = inlined_call_operand.vmem [shape: f32[128,128], index: 1, kind: input, shape index: {}]   ;;  %s670_s2 = inlined_call_operand.hbm [shape: f32[256,128], index: 2, kind: output, shape index: {}]  }
   0x1   :  { %9 = vsyncpa [#allocation3 + $0x1], 0  ;;  %s495_s9 = smov 0   ;;  %s497_s10 = smov 0  }
   0x2   :  { %s499_s11 = smov 0   ;;  %s501_s12 = smov 0  }
   0x3 LB: > { %s516_s13 = sadd.s32 4294967295, %s476_s12   ;;  %s336_s14 = sadd.s32 4294967294, %s476_s12   ;;  %s476_s12 = sphi %s501_s12, %s676_s12   ;;  %s472_s11 = sphi %s499_s11, %s675_s11   ;;  %s468_s10 = sphi %s497_s10, %s674_s10   ;;  %s464_s9 = sphi %s495_s9, %s673_s9  }
   0x4   : > { %s520_s15 = sadd.s32 1, %s476_s12   ;;  %s69_s16 = sadd.s32 1, %s472_s11 }
   0x5   : > { %s66_s17 = ssub.s32 %s476_s12, %s520_s15  ;;  %p79_p0 = scmp.ne.s32.totalorder %s472_s11, %s468_s10 }
   0x6   : > { %p67_p1 = scmp.eq.s32.totalorder %s66_s17, 0  ;;  %p80_p2 = scmp.eq.s32.totalorder %s516_s13, 1 }
   0x7   : > { %p85_p3 = scmp.ne.s32.totalorder %s468_s10, %s464_s9  ;;  %p86_p4 = scmp.eq.s32.totalorder %s336_s14, 1 }
   0x8   : > { %s531_s18 = scalar_select %p67_p1, %s472_s11, %s69_s16  }
   0x9   : > { %p533_p5 = por %p80_p2, %p79_p0  ;;  %p537_p6 = por %p86_p4, %p85_p3 }
   0xa   : > { %p339_p7 = scmp.ge.s32.totalorder %s476_s12, 1  ;;  %p116_p8 = scmp.lt.s32.totalorder %s476_s12, 3 }
   0xc   : > { %p117_p9 = pnand %p339_p7, %p116_p8 }
   0xd   : > { %s341_s14 = sshll.u32 (!%p117_p9), %s516_s13, 4  ;;  %s135_s17 = sand.u32 (!%p117_p9), 1, %s468_s10  }
   0xe   : > { %120 = sbr.rel (%p117_p9) target bundleno = 215 (0xd7), region = 28  ;;  %p139_p10 = scmp.lt.s32.totalorder (!%p117_p9), %s341_s14, 31 }
   0xf   : > { %s340_s21 = sshll.u32 (!%p117_p9), %s135_s17, 7  ;;  %s348_s23 = sshll.u32 (!%p117_p9), %s516_s13, 7 }
  0x10   : > { %s616_s22 = scalar_lea.vmem (!%p117_p9), [#allocation2], %s340_s21  ;;  %s270_s26 = scalar_lea.hbm (!%p117_p9), %s670_s2, %s348_s23 }
  0x11   : > { %s271_s27 = sshll.u32 (!%p117_p9), %s616_s22, 4  ;;  %s273_s28 = sshll.u32 (!%p117_p9), %s270_s26, 4  ;;  %s272_s27 = int_to_ptr.vmem [resolvable:$true] %s271_s27  ;;  %s274_s28 = int_to_ptr.hbm [resolvable:$true] %s273_s28 }
  0x12   : > { %s259_s13 = scalar_lea.sflag (!%p117_p9), [#allocation3], %s135_s17  ;;  %s428_s29 = sshra.s32 (!%p117_p9), %s274_s28, 4  ;;  %s429_s29 = int_to_ptr.hbm [resolvable:$true] %s428_s29 }
  0x13   : > { %v183_v0 = vld [vmem:[%s669_s1 + $0x70] sm:$0xff]  ;;  %v184_v1 = vld [vmem:[%s669_s1 + $0x78] sm:$0xff]  ;;  %v181_v2 = vld [vmem:[%s669_s1 + $0x60] sm:$0xff]  ;;  %s678_s14 = smov (!%p139_p10, %s341_s14), 31  ;;  %s430_s30 = scalar_lea.hbm %s429_s29, 128 }
  0x14   : > { %v192_v3 = vpack.c.bf16 %v184_v1, %v183_v0  ;;  %v182_v4 = vld [vmem:[%s669_s1 + $0x68] sm:$0xff]  ;;  %v179_v6 = vld [vmem:[%s669_s1 + $0x50] sm:$0xff]  ;;  %v180_v7 = vld [vmem:[%s669_s1 + $0x58] sm:$0xff]  ;;  %s342_s3 = sshll.u32 %s678_s14, 3  ;;  %p431_p11 = scmp.ne.s32.totalorder %s429_s29, %s430_s30 }
  0x15   : > { %v191_v5 = vpack.c.bf16 %v182_v4, %v181_v2  ;;  %v190_v8 = vpack.c.bf16 %v180_v7, %v179_v6  ;;  %v177_v9 = vld [vmem:[%s669_s1 + $0x40] sm:$0xff]  ;;  %v178_v10 = vld [vmem:[%s669_s1 + $0x48] sm:$0xff]  ;;  %v175_v12 = vld [vmem:[%s669_s1 + $0x30] sm:$0xff]  ;;  %s589_s6 = scalar_lea.vmem %s668_s0, %s342_s3  ;;  %s434_s5 = scalar_lea.hbm %s670_s2, 256 }
  0x16   : > { %193 = vmatpush.bf16.msra.mxu0 %v192_v3  ;;  %349 = vmatpush.bf16.msra.mxu1 %v192_v3  ;;  %v189_v11 = vpack.c.bf16 %v178_v10, %v177_v9  ;;  %v176_v13 = vld [vmem:[%s669_s1 + $0x38] sm:$0xff]  ;;  %v173_v15 = vld [vmem:[%s669_s1 + $0x20] sm:$0xff]  ;;  %v174_v16 = vld [vmem:[%s669_s1 + $0x28] sm:$0xff]  ;;  %p432_p12 = pnand %p431_p11, %p533_p5  ;;  %p435_p0 = scmp.lt.s32.totalorder %s429_s29, %s670_s2 }
  0x17   : > { %350 = vmatpush.bf16.msra.mxu2 %v192_v3  ;;  %351 = vmatpush.bf16.msra.mxu3 %v192_v3  ;;  %v188_v14 = vpack.c.bf16 %v176_v13, %v175_v12  ;;  %v187_v17 = vpack.c.bf16 %v174_v16, %v173_v15  ;;  %v171_v18 = vld [vmem:[%s669_s1 + $0x10] sm:$0xff]  ;;  %v172_v19 = vld [vmem:[%s669_s1 + $0x18] sm:$0xff]  ;;  %v169_v21 = vld [vmem:[%s669_s1] sm:$0xff]  ;;  %p436_p1 = scmp.lt.s32.totalorder %s434_s5, %s430_s30 }
  0x18   : > { %v186_v20 = vpack.c.bf16 %v172_v19, %v171_v18  ;;  %v170_v22 = vld [vmem:[%s669_s1 + $0x8] sm:$0xff]  ;;  %v145_v23 = vld [vmem:[%s589_s6] sm:$0xff]  ;;  %v147_v36 = vld [vmem:[%s589_s6 + $0x10] sm:$0xff]  ;;  %p433_p13 = pneg %p432_p12 }
  0x19   : > { %v146_v24 = vld [vmem:[%s589_s6 + $0x8] sm:$0xff]  ;;  %v185_v25 = vpack.c.bf16 %v170_v22, %v169_v21  ;;  %v149_v26 = vld [vmem:[%s589_s6 + $0x20] sm:$0xff]  ;;  %v148_v37 = vld [vmem:[%s589_s6 + $0x18] sm:$0xff]  ;;  %p437_p2 = por %p436_p1, %p435_p0 }
  0x1a   : > { %194 = vmatpush.bf16.msra.mxu0 %v191_v5  ;;  %352 = vmatpush.bf16.msra.mxu1 %v191_v5  ;;  %v150_v27 = vld [vmem:[%s589_s6 + $0x28] sm:$0xff]  ;;  %v153_v28 = vld [vmem:[%s589_s6 + $0x40] sm:$0xff]  ;;  %v161_v32 = vpack.c.bf16 %v146_v24, %v145_v23  ;;  %v151_v38 = vld [vmem:[%s589_s6 + $0x30] sm:$0xff]  ;;  %v162_v44 = vpack.c.bf16 %v148_v37, %v147_v36 }
  0x1b   : > { %353 = vmatpush.bf16.msra.mxu2 %v191_v5  ;;  %354 = vmatpush.bf16.msra.mxu3 %v191_v5  ;;  %v154_v29 = vld [vmem:[%s589_s6 + $0x48] sm:$0xff]  ;;  %v157_v30 = vld [vmem:[%s589_s6 + $0x60] sm:$0xff]  ;;  %v163_v33 = vpack.c.bf16 %v150_v27, %v149_v26  ;;  %v152_v39 = vld [vmem:[%s589_s6 + $0x38] sm:$0xff]  ;;  %p438_p3 = pnand %p437_p2, %p433_p13 }
  0x1c   : > { %v158_v31 = vld [vmem:[%s589_s6 + $0x68] sm:$0xff]  ;;  %v165_v34 = vpack.c.bf16 %v154_v29, %v153_v28  ;;  %v155_v40 = vld [vmem:[%s589_s6 + $0x50] sm:$0xff]  ;;  %v156_v41 = vld [vmem:[%s589_s6 + $0x58] sm:$0xff]  ;;  %v164_v45 = vpack.c.bf16 %v152_v39, %v151_v38 }
  0x1d   : > { %v167_v35 = vpack.c.bf16 %v158_v31, %v157_v30  ;;  %v159_v42 = vld [vmem:[%s589_s6 + $0x70] sm:$0xff]  ;;  %v160_v43 = vld [vmem:[%s589_s6 + $0x78] sm:$0xff]  ;;  %v166_v46 = vpack.c.bf16 %v156_v41, %v155_v40 }
  0x1e   : > { %195 = vmatpush.bf16.msra.mxu0 %v190_v8  ;;  %355 = vmatpush.bf16.msra.mxu1 %v190_v8  ;;  %v168_v47 = vpack.c.bf16 %v160_v43, %v159_v42 }
  0x1f   : > { %356 = vmatpush.bf16.msra.mxu2 %v190_v8  ;;  %357 = vmatpush.bf16.msra.mxu3 %v190_v8 }
  0x22   : > { %196 = vmatpush.bf16.msra.mxu0 %v189_v11  ;;  %358 = vmatpush.bf16.msra.mxu1 %v189_v11 }
  0x23   : > { %359 = vmatpush.bf16.msra.mxu2 %v189_v11  ;;  %360 = vmatpush.bf16.msra.mxu3 %v189_v11 }
  0x26   : > { %197 = vmatpush.bf16.msra.mxu0 %v188_v14  ;;  %361 = vmatpush.bf16.msra.mxu1 %v188_v14 }
  0x27   : > { %362 = vmatpush.bf16.msra.mxu2 %v188_v14  ;;  %363 = vmatpush.bf16.msra.mxu3 %v188_v14 }
  0x2a   : > { %198 = vmatpush.bf16.msra.mxu0 %v187_v17  ;;  %364 = vmatpush.bf16.msra.mxu1 %v187_v17 }
  0x2b   : > { %365 = vmatpush.bf16.msra.mxu2 %v187_v17  ;;  %366 = vmatpush.bf16.msra.mxu3 %v187_v17 }
  0x2e   : > { %199 = vmatpush.bf16.msra.mxu0 %v186_v20  ;;  %367 = vmatpush.bf16.msra.mxu1 %v186_v20 }
  0x2f   : > { %368 = vmatpush.bf16.msra.mxu2 %v186_v20  ;;  %369 = vmatpush.bf16.msra.mxu3 %v186_v20 }
  0x32   : > { %200 = vmatpush.bf16.msra.mxu0 %v185_v25  ;;  %370 = vmatpush.bf16.msra.mxu1 %v185_v25 }
  0x33   : > { %371 = vmatpush.bf16.msra.mxu2 %v185_v25  ;;  %372 = vmatpush.bf16.msra.mxu3 %v185_v25 }
  0x35   : > { %201 = vmatmul.bf16.vlgmr.msra.gmra.mxu0 %v161_v32  ;;  %211 = vmatmul.bf16.vlgmr.msra.gmra.mxu1 %v163_v33 }
  0x36   : > { %221 = vmatmul.bf16.vlgmr.msra.gmra.mxu2 %v165_v34  ;;  %231 = vmatmul.bf16.vlgmr.msra.gmra.mxu3 %v167_v35 }
  0x45   : > { %206 = vmatmul.bf16.gmra.mxu0 %v162_v44  ;;  %216 = vmatmul.bf16.gmra.mxu1 %v164_v45 }
  0x46   : > { %226 = vmatmul.bf16.gmra.mxu2 %v166_v46  ;;  %236 = vmatmul.bf16.gmra.mxu3 %v168_v47 }
  0xb2   : > { %v202_v48 = vpop.f32.mrf.mxu0  ;;  %v212_v49 = vpop.f32.mrf.mxu1 }
  0xb3   : > { %242 = vst [vmem:[%s616_s22] sm:$0xff] %v202_v48 }
  0xb4   : > { %246 = vst [vmem:[%s616_s22 + $0x20] sm:$0xff] %v212_v49 }
  0xb9   : > { %v222_v50 = vpop.f32.mrf.mxu2  ;;  %v232_v51 = vpop.f32.mrf.mxu3 }
  0xba   : > { %250 = vst [vmem:[%s616_s22 + $0x40] sm:$0xff] %v222_v50  ;;  %v204_v52 = vpop.f32.mrf.mxu0  ;;  %v214_v53 = vpop.f32.mrf.mxu1 }
  0xbb   : > { %254 = vst [vmem:[%s616_s22 + $0x60] sm:$0xff] %v232_v51 }
  0xbc   : > { %243 = vst [vmem:[%s616_s22 + $0x8] sm:$0xff] %v204_v52 }
  0xbd   : > { %247 = vst [vmem:[%s616_s22 + $0x28] sm:$0xff] %v214_v53 }
  0xc1   : > { %v224_v54 = vpop.f32.mrf.mxu2  ;;  %v234_v55 = vpop.f32.mrf.mxu3 }
  0xc2   : > { %251 = vst [vmem:[%s616_s22 + $0x48] sm:$0xff] %v224_v54  ;;  %v207_v56 = vpop.f32.mrf.mxu0  ;;  %v217_v57 = vpop.f32.mrf.mxu1 }
  0xc3   : > { %255 = vst [vmem:[%s616_s22 + $0x68] sm:$0xff] %v234_v55 }
  0xc4   : > { %244 = vst [vmem:[%s616_s22 + $0x10] sm:$0xff] %v207_v56 }
  0xc5   : > { %248 = vst [vmem:[%s616_s22 + $0x30] sm:$0xff] %v217_v57 }
  0xc9   : > { %v227_v58 = vpop.f32.mrf.mxu2  ;;  %v237_v59 = vpop.f32.mrf.mxu3 }
  0xca   : > { %252 = vst [vmem:[%s616_s22 + $0x50] sm:$0xff] %v227_v58  ;;  %v209_v60 = vpop.f32.mrf.mxu0  ;;  %v219_v61 = vpop.f32.mrf.mxu1 }
  0xcb   : > { %256 = vst [vmem:[%s616_s22 + $0x70] sm:$0xff] %v237_v59 }
  0xcc   : > { %245 = vst [vmem:[%s616_s22 + $0x18] sm:$0xff] %v209_v60 }
  0xcd   : > { %249 = vst [vmem:[%s616_s22 + $0x38] sm:$0xff] %v219_v61 }
  0xd1   : > { %v229_v62 = vpop.f32.mrf.mxu2  ;;  %v239_v63 = vpop.f32.mrf.mxu3 }
  0xd2   : > { %253 = vst [vmem:[%s616_s22 + $0x58] sm:$0xff] %v229_v62 }
  0xd3   : > { %257 = vst [vmem:[%s616_s22 + $0x78] sm:$0xff] %v239_v63 }
  0xd4   : > { %441 = shalt.err (!%p438_p3)
}
  0xd5   : > { %s478_s8 = smov 128   ;;  %s479_s14 = smov 8  }
  0xd6   : > { %373 = dma.vmem_to_hbm [thread:$0]  (%p533_p5), %s272_s27, 2048, %s274_s28, %s259_s13, %s478_s8, %s478_s8, %s479_s14  }
  0xd7 PF: > { %p379_p4 = scmp.ge.s32.totalorder %s476_s12, 2  ;;  %s288_s16 = sand.u32 1, %s464_s9  }
  0xd8   : > { %s289_s17 = scalar_lea.sflag [#allocation3], %s288_s16 }
  0xd9   : > { %p376_p7 = pnand %p379_p4, %p537_p6 }
  0xdb   : > { %p377_p8 = pneg %p376_p7 }
  0xdd   : > { %459 = dma.done.wait (%p377_p8), %s289_s17, 2048  }
  0xde   : > { %461 = vsyncadd (%p377_p8), %s289_s17, 4294965248  ;;  %p12_p9 = scmp.ge.s32.totalorder %s520_s15, 4   ;;  %s673_s9 = smov %s468_s10 }
  0xdf   : > { %s674_s10 = smov %s472_s11  ;;  %s675_s11 = smov %s531_s18 }
  0xe0   : > { %s676_s12 = smov %s520_s15  ;;  %14 = sbr.rel (!%p12_p9) target bundleno = 3 (0x3), region = 63 }
  0xe5   :  { %295 = vsyncpa [#allocation3], 1 }
  0xe6   :  { %297 = vsyncpa [#allocation3 + $0x1], 1 }

// kernel: dram_attention_forward.4
= control target key start
LH: loop header
LB: loop body
LE: loop exit
PB: predicated region body
PF: predicated region fallthrough
CT: control target
= control target key end

     0   :  { %s4076_s21 = smov 0   ;;  %s4078_s22 = smov 0   ;;  %s6261_s0 = inlined_call_operand.vmem [shape: f32[8,128], index: 0, kind: input, shape index: {}]   ;;  %s6262_s1 = inlined_call_operand.vmem [shape: f32[2,128,128], index: 1, kind: input, shape index: {}]   ;;  %s6263_s2 = inlined_call_operand.vmem [shape: f32[2,128,128], index: 2, kind: input, shape index: {}, may-alias: {2,3}]   ;;  %s6264_s3 = inlined_call_operand.vmem [shape: f32[2,128,128], index: 3, kind: input, shape index: {}, may-alias: {2,3}]   ;;  %s6265_s4 = inlined_call_operand.vmem [shape: f32[2,128,128], index: 4, kind: input, shape index: {}, may-alias: {4,5}]   ;;  %s6266_s5 = inlined_call_operand.vmem [shape: f32[2,128,128], index: 5, kind: input, shape index: {}, may-alias: {4,5}]   ;;  %s6267_s6 = inlined_call_operand.vmem [shape: f32[2,128,128], index: 6, kind: output, shape index: {}]  }
   0x1   :  { %s4080_s23 = smov 0   ;;  %s4082_s24 = smov 0  }
   0x2   :  { %s4084_s25 = smov 0  }
   0x3 LB: > { %s25_s26 = sadd.s32 1, %s4030_s23  ;;  %s28_s27 = sadd.s32 1, %s4034_s24  ;;  %s4038_s25 = sphi %s4084_s25, %s16_s25   ;;  %s4034_s24 = sphi %s4082_s24, %s6634_s24   ;;  %s4030_s23 = sphi %s4080_s23, %s6633_s23   ;;  %s4026_s22 = sphi %s4078_s22, %s6632_s22   ;;  %s4022_s21 = sphi %s4076_s21, %s6631_s21  }
   0x4   : > { %p26_p0 = scmp.ge.s32.totalorder %s25_s26, 2  ;;  %p3729_p1 = scmp.ge.s32.totalorder %s4038_s25, 1 }
   0x5   : > { %p325_p2 = scmp.lt.s32.totalorder %s4038_s25, 5 }
   0x6   : > { %s6636_s26 = smov (%p26_p0, %s25_s26), 0  ;;  %s6638_s27 = smov (!%p26_p0, %s28_s27), %s4034_s24 }
   0x7   : > { %p326_p3 = pnand %p3729_p1, %p325_p2  ;;  %p30_p4 = scmp.ge.s32.totalorder %s6638_s27, 2 }
   0x9   : > { %s6640_s27 = smov (%p30_p4, %s6638_s27), 0  ;;  %329 = sbr.rel (%p326_p3) target bundleno = 1278 (0x4fe), region = 44 }
   0xe   : > { %s3730_s28 = sshll.u32 %s4022_s21, 3  ;;  %p406_p5 = scmp.lt.s32.totalorder %s4026_s22, 1  ;;  %v3956_v0 = vld [vmem:[%s6261_s0] ss:$0 sm:$0xff]  ;;  %v3957_v1 = vld [vmem:[%s6261_s0 + $0x1] ss:$0 sm:$0xff] }
   0xf   : > { %p408_p6 = scmp.lt.s32.totalorder %s3730_s28, 15  ;;  %s4116_s8 = sadd.s32 4294967295, %s4022_s21  ;;  %vm893_vm0 = vcmask 523264   ;;  %v3958_v37 = vld [vmem:[%s6261_s0 + $0x2] ss:$0 sm:$0xff] }
  0x10   : > { %s6642_s22 = smov (!%p406_p5, %s4026_s22), 1  ;;  %p416_p7 = scmp.gt.s32.totalorder %s4116_s8, 0  ;;  %v3959_v39 = vld [vmem:[%s6261_s0 + $0x3] ss:$0 sm:$0xff] }
  0x11   : > { %s6644_s28 = smov (!%p408_p6, %s3730_s28), 15  ;;  %s3731_s7 = sshll.u32 %s6642_s22, 4 }
  0x12   : > { %s411_s9 = sadd.s32 %s3731_s7, %s6644_s28  ;;  %s4040_s11 = smov 64  }
  0x13   : > { %s4121_s10 = sshll.u32 %s411_s9, 3  ;;  %s3750_s20 = sshll.u32 %s4022_s21, 6 }
  0x14   : > { %s413_s13 = scalar_lea.vmem %s6262_s1, %s4121_s10  ;;  %s4809_s28 = scalar_lea.vmem %s6264_s3, %s4121_s10 }
  0x15   : > { %v491_v2 = vld [vmem:[%s413_s13 + $0x20] sm:$0xff]  ;;  %v489_v3 = vld [vmem:[%s413_s13 + $0x10] sm:$0xff]  ;;  %v492_v8 = vld [vmem:[%s413_s13 + $0x28] sm:$0xff]  ;;  %s417_s16 = scalar_select %p416_p7, %s4116_s8, 0 }
  0x16   : > { %v487_v4 = vld [vmem:[%s413_s13] sm:$0xff]  ;;  %v500_v5 = vmul.f32 %v3956_v0, %v491_v2  ;;  %v498_v6 = vmul.f32 %v3956_v0, %v489_v3  ;;  %v490_v9 = vld [vmem:[%s413_s13 + $0x18] sm:$0xff]  ;;  %v488_v10 = vld [vmem:[%s413_s13 + $0x8] sm:$0xff]  ;;  %v501_v11 = vmul.f32 %v3956_v0, %v492_v8 }
  0x17   : > { %v496_v7 = vmul.f32 %v3956_v0, %v487_v4  ;;  %v499_v12 = vmul.f32 %v3956_v0, %v490_v9  ;;  %v497_v13 = vmul.f32 %v3956_v0, %v488_v10  ;;  %v494_v14 = vld [vmem:[%s413_s13 + $0x38] sm:$0xff]  ;;  %v493_v15 = vld [vmem:[%s413_s13 + $0x30] sm:$0xff]  ;;  %s3734_s17 = sshll.u32 %s417_s16, 3  ;;  %s5043_s13 = scalar_lea.vmem %s6266_s5, %s4121_s10 }
  0x18   : > { %v509_v16 = vadd.f32 %v3957_v1, %v500_v5  ;;  %v507_v17 = vadd.f32 %v3957_v1, %v498_v6  ;;  %v503_v19 = vmul.f32 %v3956_v0, %v494_v14  ;;  %v510_v20 = vadd.f32 %v3957_v1, %v501_v11  ;;  %p421_p8 = scmp.lt.s32.totalorder %s3734_s17, 15 }
  0x19   : > { %v505_v18 = vadd.f32 %v3957_v1, %v496_v7  ;;  %v508_v21 = vadd.f32 %v3957_v1, %v499_v12  ;;  %v506_v22 = vadd.f32 %v3957_v1, %v497_v13  ;;  %v502_v23 = vmul.f32 %v3956_v0, %v493_v15 }
  0x1a   : > { %v517_v24 = vmax.f32 %v509_v16, 0.0  ;;  %v515_v25 = vmax.f32 %v507_v17, 0.0  ;;  %v518_v27 = vmax.f32 %v510_v20, 0.0  ;;  %s6646_s17 = smov (!%p421_p8, %s3734_s17), 15  ;;  %v512_v28 = vadd.f32 %v3957_v1, %v503_v19 }
  0x1b   : > { %v513_v26 = vmax.f32 %v505_v18, 0.0  ;;  %v516_v32 = vmax.f32 %v508_v21, 0.0  ;;  %v514_v33 = vmax.f32 %v506_v22, 0.0  ;;  %s4139_s18 = sadd.s32 %s3731_s7, %s6646_s17  ;;  %v511_v34 = vadd.f32 %v3957_v1, %v502_v23 }
  0x1c   : > { %v4131_v29 = vmin.f32 %v517_v24, 1.0  ;;  %v4133_v30 = vmin.f32 %v515_v25, 1.0  ;;  %s3736_s19 = sshll.u32 %s4139_s18, 3  ;;  %v520_v40 = vmax.f32 %v512_v28, 0.0  ;;  %v4161_v41 = vmin.f32 %v518_v27, 1.0 }
  0x1d   : > { %v4135_v31 = vmin.f32 %v513_v26, 1.0  ;;  %s4156_s30 = scalar_lea.vmem %s6263_s2, %s3736_s19  ;;  %v4163_v42 = vmin.f32 %v516_v32, 1.0  ;;  %v4168_v46 = vmin.f32 %v514_v33, 1.0  ;;  %v519_v47 = vmax.f32 %v511_v34, 0.0  ;;  %s4232_s14 = scalar_lea.vmem %s6265_s4, %s3736_s19 }
  0x1e   : > { %v906_v35 = vsel %vm893_vm0, %v4131_v29, 0.0  ;;  %v900_v36 = vsel %vm893_vm0, %v4133_v30, 0.0  ;;  %v543_v43 = vld [vmem:[%s4156_s30 + $0x30] sm:$0xff]  ;;  %v544_v44 = vld [vmem:[%s4156_s30 + $0x38] sm:$0xff]  ;;  %v541_v45 = vld [vmem:[%s4156_s30 + $0x20] sm:$0xff]  ;;  %v4170_v50 = vmin.f32 %v520_v40, 1.0 }
  0x1f   : > { %907 = vadd.xlane.f32.xlu2 %v906_v35  ;;  %901 = vadd.xlane.f32.xlu1 %v900_v36  ;;  %v894_v38 = vsel %vm893_vm0, %v4135_v31, 0.0  ;;  %v552_v48 = vmul.f32 %v3958_v37, %v543_v43  ;;  %v553_v49 = vmul.f32 %v3958_v37, %v544_v44  ;;  %v542_v51 = vld [vmem:[%s4156_s30 + $0x28] sm:$0xff]  ;;  %v550_v52 = vmul.f32 %v3958_v37, %v541_v45  ;;  %v539_v57 = vld [vmem:[%s4156_s30 + $0x10] sm:$0xff]  ;;  %v540_v58 = vld [vmem:[%s4156_s30 + $0x18] sm:$0xff]  ;;  %s3784_s19 = sshll.u32 %s4116_s8, 6 }
  0x20   : > { %895 = vadd.xlane.f32.xlu0 %v894_v38  ;;  %v909_v53 = vsel %vm893_vm0, %v4161_v41, 0.0  ;;  %v903_v54 = vsel %vm893_vm0, %v4163_v42, 0.0  ;;  %v897_v59 = vsel %vm893_vm0, %v4168_v46, 0.0  ;;  %v4181_v60 = vmin.f32 %v519_v47, 1.0  ;;  %v537_v61 = vld [vmem:[%s4156_s30] sm:$0xff]  ;;  %v538_v5 = vld [vmem:[%s4156_s30 + $0x8] sm:$0xff] }
  0x21   : > { %v561_v55 = vadd.f32 %v3959_v39, %v552_v48  ;;  %v562_v56 = vadd.f32 %v3959_v39, %v553_v49  ;;  %v551_v0 = vmul.f32 %v3958_v37, %v542_v51  ;;  %v915_v1 = vsel %vm893_vm0, %v4170_v50, 0.0 }
  0x22   : > { %v559_v2 = vadd.f32 %v3959_v39, %v550_v52  ;;  %v548_v3 = vmul.f32 %v3958_v37, %v539_v57  ;;  %v549_v4 = vmul.f32 %v3958_v37, %v540_v58  ;;  %v546_v9 = vmul.f32 %v3958_v37, %v537_v61 }
  0x23   : > { %v569_v62 = vmax.f32 %v561_v55, 0.0  ;;  %v570_v63 = vmax.f32 %v562_v56, 0.0  ;;  %v560_v8 = vadd.f32 %v3959_v39, %v551_v0  ;;  %v912_v10 = vsel %vm893_vm0, %v4181_v60, 0.0 }
  0x24   : > { %v567_v11 = vmax.f32 %v559_v2, 0.0  ;;  %v557_v12 = vadd.f32 %v3959_v39, %v548_v3  ;;  %v558_v13 = vadd.f32 %v3959_v39, %v549_v4  ;;  %v547_v17 = vmul.f32 %v3958_v37, %v538_v5 }
  0x25   : > { %v577_v6 = vmin.f32 %v569_v62, 0.9  ;;  %v578_v7 = vmin.f32 %v570_v63, 0.9  ;;  %v568_v16 = vmax.f32 %v560_v8, 0.0  ;;  %v555_v21 = vadd.f32 %v3959_v39, %v546_v9 }
  0x26   : > { %v575_v18 = vmin.f32 %v567_v11, 0.9  ;;  %v565_v19 = vmax.f32 %v557_v12, 0.0  ;;  %v566_v20 = vmax.f32 %v558_v13, 0.0  ;;  %v4189_v32 = vadd.f32 %v3959_v39, %v547_v17 }
  0x27   : > { %910 = vadd.xlane.f32.xlu2 %v909_v53  ;;  %904 = vadd.xlane.f32.xlu1 %v903_v54  ;;  %v3757_v14 = vadd.f32 -0.45, %v577_v6  ;;  %v3758_v15 = vadd.f32 -0.45, %v578_v7  ;;  %v576_v26 = vmin.f32 %v568_v16, 0.9 }
  0x28   : > { %898 = vadd.xlane.f32.xlu0 %v897_v59  ;;  %v3755_v27 = vadd.f32 -0.45, %v575_v18  ;;  %v573_v28 = vmin.f32 %v565_v19, 0.9  ;;  %v574_v5 = vmin.f32 %v566_v20, 0.9 }
  0x29   : > { %v609_v22 = vpack.c.bf16 %v3757_v14, %v3757_v14  ;;  %v610_v23 = vpack.c.bf16 %v3758_v15, %v3758_v15  ;;  %v593_v24 = vmul.f32 %v3757_v14, %v3757_v14  ;;  %v594_v25 = vmul.f32 %v3758_v15, %v3758_v15 }
  0x2a   : > { %v3756_v40 = vadd.f32 -0.45, %v576_v26  ;;  %v607_v43 = vpack.c.bf16 %v3755_v27, %v3755_v27  ;;  %v591_v48 = vmul.f32 %v3755_v27, %v3755_v27  ;;  %v3753_v8 = vadd.f32 -0.45, %v573_v28 }
  0x2b   : > { %v1169_v33 = vunpack.c.l.b16 %v609_v22  ;;  %v1170_v34 = vunpack.c.l.b16 %v610_v23  ;;  %v617_v35 = vpack.c.bf16 %v593_v24, %v593_v24  ;;  %v618_v36 = vpack.c.bf16 %v594_v25, %v594_v25 }
  0x2c   : > { %v601_v38 = vmul.f32 %v3757_v14, %v593_v24  ;;  %v602_v37 = vmul.f32 %v3758_v15, %v594_v25  ;;  %v608_v52 = vpack.c.bf16 %v3756_v40, %v3756_v40  ;;  %v1167_v39 = vunpack.c.l.b16 %v607_v43 }
  0x2d   : > { %v4191_v44 = vpack.c.b16 %v1170_v34, %v1169_v33  ;;  %v1258_v45 = vunpack.c.l.b16 %v617_v35  ;;  %v1259_v47 = vunpack.c.l.b16 %v618_v36  ;;  %v592_v55 = vmul.f32 %v3756_v40, %v3756_v40 }
  0x2e   : > { %v625_v49 = vpack.c.bf16 %v601_v38, %v601_v38  ;;  %v626_v51 = vpack.c.bf16 %v602_v37, %v602_v37  ;;  %v615_v56 = vpack.c.bf16 %v591_v48, %v591_v48  ;;  %v1168_v59 = vunpack.c.l.b16 %v608_v52 }
  0x2f   : > { %916 = vadd.xlane.f32.xlu1 %v915_v1  ;;  %v1197_v53 = vsel %vm893_vm0, %v4191_v44, 0  ;;  %v1263_v54 = vpack.c.b16 %v1259_v47, %v1258_v45  ;;  %v599_v61 = vmul.f32 %v3755_v27, %v591_v48  ;;  %v616_v63 = vpack.c.bf16 %v592_v55, %v592_v55 }
  0x30   : > { %913 = vadd.xlane.f32.xlu0 %v912_v10  ;;  %1203 = vmatpush.bf16.xpose.msra.mxu0 %v1197_v53  ;;  %v1335_v57 = vunpack.c.l.b16 %v625_v49  ;;  %v1336_v58 = vunpack.c.l.b16 %v626_v51  ;;  %v1256_v0 = vunpack.c.l.b16 %v615_v56  ;;  %v600_v1 = vmul.f32 %v3756_v40, %v592_v55 }
  0x31   : > { %v1274_v62 = vsel %vm893_vm0, %v1263_v54, 0  ;;  %v4196_v3 = vpack.c.b16 %v1168_v59, %v1167_v39  ;;  %v623_v4 = vpack.c.bf16 %v599_v61, %v599_v61  ;;  %v1257_v6 = vunpack.c.l.b16 %v616_v63 }
  0x32   : > { %1280 = vmatpush.bf16.xpose.msra.mxu1 %v1274_v62  ;;  %v1340_v2 = vpack.c.b16 %v1336_v58, %v1335_v57  ;;  %v624_v7 = vpack.c.bf16 %v600_v1, %v600_v1  ;;  %v563_v9 = vmax.f32 %v555_v21, 0.0  ;;  %v3754_v13 = vadd.f32 -0.45, %v574_v5 }
  0x33   : > { %v1194_v11 = vsel %vm893_vm0, %v4196_v3, 0  ;;  %v1333_v12 = vunpack.c.l.b16 %v623_v4  ;;  %v1262_v14 = vpack.c.b16 %v1257_v6, %v1256_v0  ;;  %v605_v16 = vpack.c.bf16 %v3753_v8, %v3753_v8 }
  0x34   : > { %v1351_v10 = vsel %vm893_vm0, %v1340_v2, 0  ;;  %v1334_v15 = vunpack.c.l.b16 %v624_v7  ;;  %v589_v17 = vmul.f32 %v3753_v8, %v3753_v8  ;;  %v606_v18 = vpack.c.bf16 %v3754_v13, %v3754_v13 }
  0x35   : > { %1357 = vmatpush.bf16.xpose.msra.mxu2 %v1351_v10  ;;  %v590_v19 = vmul.f32 %v3754_v13, %v3754_v13  ;;  %v564_v20 = vmax.f32 %v4189_v32, 0.0  ;;  %v571_v22 = vmin.f32 %v563_v9, 0.9  ;;  %v1271_v23 = vsel %vm893_vm0, %v1262_v14, 0 }
  0x36   : > { %v1339_v21 = vpack.c.b16 %v1334_v15, %v1333_v12  ;;  %v1165_v24 = vunpack.c.l.b16 %v605_v16  ;;  %v613_v25 = vpack.c.bf16 %v589_v17, %v589_v17  ;;  %v1166_v26 = vunpack.c.l.b16 %v606_v18 }
  0x37   : > { %v614_v27 = vpack.c.bf16 %v590_v19, %v590_v19  ;;  %v597_v28 = vmul.f32 %v3753_v8, %v589_v17  ;;  %v598_v33 = vmul.f32 %v3754_v13, %v590_v19  ;;  %v572_v36 = vmin.f32 %v564_v20, 0.9  ;;  %v721_v20 = vld [vmem:[%s4232_s14 + $0x30] sm:$0xff] }
  0x38   : > { %1204 = vmatpush.bf16.xpose.msra.mxu0 %v1194_v11  ;;  %v1348_v34 = vsel %vm893_vm0, %v1339_v21, 0  ;;  %v1254_v35 = vunpack.c.l.b16 %v613_v25  ;;  %v3751_v38 = vadd.f32 -0.45, %v571_v22  ;;  %v1172_v37 = vpack.c.b16 %v1166_v26, %v1165_v24  ;;  %v722_v22 = vld [vmem:[%s4232_s14 + $0x38] sm:$0xff]  ;;  %v4257_v24 = vld [vmem:[%s6261_s0 + $0x5] ss:$0 sm:$0xff] }
  0x39   : > { %v1255_v40 = vunpack.c.l.b16 %v614_v27  ;;  %v621_v32 = vpack.c.bf16 %v597_v28, %v597_v28  ;;  %v622_v43 = vpack.c.bf16 %v598_v33, %v598_v33  ;;  %v3752_v45 = vadd.f32 -0.45, %v572_v36 }
  0x3a   : > { %1281 = vmatpush.bf16.xpose.msra.mxu1 %v1271_v23  ;;  %v603_v47 = vpack.c.bf16 %v3751_v38, %v3751_v38  ;;  %v587_v48 = vmul.f32 %v3751_v38, %v3751_v38  ;;  %v1191_v49 = vsel %vm893_vm0, %v1172_v37, 0  ;;  %v529_v9 = vpack.c.bf16 %v4135_v31, %v4135_v31 }
  0x3b   : > { %v1261_v51 = vpack.c.b16 %v1255_v40, %v1254_v35  ;;  %v1331_v52 = vunpack.c.l.b16 %v621_v32  ;;  %v1332_v39 = vunpack.c.l.b16 %v622_v43  ;;  %v604_v53 = vpack.c.bf16 %v3752_v45, %v3752_v45 }
  0x3c   : > { %v1163_v55 = vunpack.c.l.b16 %v603_v47  ;;  %v588_v56 = vmul.f32 %v3752_v45, %v3752_v45  ;;  %v611_v57 = vpack.c.bf16 %v587_v48, %v587_v48  ;;  %v595_v61 = vmul.f32 %v3751_v38, %v587_v48 }
  0x3d   : > { %1358 = vmatpush.bf16.xpose.msra.mxu2 %v1348_v34  ;;  %v1268_v58 = vsel %vm893_vm0, %v1261_v51, 0  ;;  %v1338_v59 = vpack.c.b16 %v1332_v39, %v1331_v52  ;;  %v1164_v62 = vunpack.c.l.b16 %v604_v53  ;;  %v530_v10 = vpack.c.bf16 %v4168_v46, %v4168_v46 }
  0x3e   : > { %v612_v63 = vpack.c.bf16 %v588_v56, %v588_v56  ;;  %v1252_v0 = vunpack.c.l.b16 %v611_v57  ;;  %v596_v1 = vmul.f32 %v3752_v45, %v588_v56  ;;  %v619_v4 = vpack.c.bf16 %v595_v61, %v595_v61 }
  0x3f   : > { %1840 = vrot.lane.b32.xlu2 %v1263_v54, %s4040_s11  ;;  %v1171_v5 = vpack.c.b16 %v1164_v62, %v1163_v55  ;;  %v1345_v7 = vsel %vm893_vm0, %v1338_v59, 0  ;;  %v1143_v15 = vunpack.c.l.b16 %v529_v9  ;;  %v1144_v16 = vunpack.c.l.b16 %v530_v10 }
  0x40   : > { %1205 = vmatpush.bf16.xpose.msra.mxu0 %v1191_v49  ;;  %v1253_v6 = vunpack.c.l.b16 %v612_v63  ;;  %v620_v54 = vpack.c.bf16 %v596_v1, %v596_v1  ;;  %v1329_v8 = vunpack.c.l.b16 %v619_v4  ;;  %v536_v33 = vpack.c.bf16 %v4170_v50, %v4170_v50  ;;  %v720_v1 = vld [vmem:[%s4232_s14 + $0x28] sm:$0xff] }
  0x41   : > { %v4220_v19 = vpack.c.b16 %v1144_v16, %v1143_v15  ;;  %v535_v34 = vpack.c.bf16 %v4181_v60, %v4181_v60  ;;  %v533_v38 = vpack.c.bf16 %v4131_v29, %v4131_v29 }
  0x42   : > { %1282 = vmatpush.bf16.xpose.msra.mxu1 %v1268_v58  ;;  %v1260_v11 = vpack.c.b16 %v1253_v6, %v1252_v0  ;;  %v1330_v12 = vunpack.c.l.b16 %v620_v54  ;;  %v1150_v45 = vunpack.c.l.b16 %v536_v33  ;;  %v719_v0 = vld [vmem:[%s4232_s14 + $0x20] sm:$0xff] }
  0x43   : > { %6364 = vst [vmem:[#allocation2_spill] sm:$0xff] %v4220_v19  ;;  %v1149_v47 = vunpack.c.l.b16 %v535_v34  ;;  %v1012_v34 = vstv %s3784_s19 }
  0x44   : > { %1905 = vrot.lane.b32.xlu0 %v1340_v2, %s4040_s11  ;;  %v1188_v2 = vsel %vm893_vm0, %v1171_v5, 0  ;;  %v1337_v13 = vpack.c.b16 %v1330_v12, %v1329_v8  ;;  %v1265_v17 = vsel %vm893_vm0, %v1260_v11, 0  ;;  %v717_v12 = vld [vmem:[%s4232_s14 + $0x10] sm:$0xff] }
  0x45   : > { %1359 = vmatpush.bf16.xpose.msra.mxu2 %v1345_v7  ;;  %v4285_v55 = vpack.c.b16 %v1150_v45, %v1149_v47 }
  0x46   : > { %v1342_v18 = vsel %vm893_vm0, %v1337_v13, 0 }
  0x47   : > { %1838 = vrot.lane.b32.xlu2 %v1262_v14, %s4040_s11  ;;  %v4244_v14 = vld [vmem:[%s6261_s0 + $0x4] ss:$0 sm:$0xff]  ;;  %6366 = vst [vmem:[#allocation4_spill] sm:$0xff] %v4285_v55 }
  0x48   : > { %1763 = vrot.lane.b32.xlu1 %v4191_v44, %s4040_s11  ;;  %1206 = vmatpush.bf16.xpose.msra.mxu0 %v1188_v2  ;;  %v531_v44 = vpack.c.bf16 %v4133_v30, %v4133_v30  ;;  %v730_v23 = vmul.f32 %v4244_v14, %v721_v20  ;;  %v729_v6 = vmul.f32 %v4244_v14, %v720_v1  ;;  %v718_v2 = vld [vmem:[%s4232_s14 + $0x18] sm:$0xff] }
  0x4a   : > { %1283 = vmatpush.bf16.xpose.msra.mxu1 %v1265_v17  ;;  %v1145_v25 = vunpack.c.l.b16 %v531_v44  ;;  %v739_v27 = vadd.f32 %v4257_v24, %v730_v23  ;;  %v738_v7 = vadd.f32 %v4257_v24, %v729_v6  ;;  %v727_v44 = vmul.f32 %v4244_v14, %v718_v2 }
  0x4c   : > { %1903 = vrot.lane.b32.xlu0 %v1339_v21, %s4040_s11  ;;  %v731_v21 = vmul.f32 %v4244_v14, %v722_v22  ;;  %v747_v35 = vmax.f32 %v739_v27, 0.0  ;;  %v746_v9 = vmax.f32 %v738_v7, 0.0 }
  0x4d   : > { %1360 = vmatpush.bf16.xpose.msra.mxu2 %v1342_v18  ;;  %v726_v18 = vmul.f32 %v4244_v14, %v717_v12 }
  0x4e   : > { %v740_v28 = vadd.f32 %v4257_v24, %v731_v21  ;;  %v755_v32 = vmin.f32 %v747_v35, 0.9  ;;  %v736_v21 = vadd.f32 %v4257_v24, %v727_v44  ;;  %v4384_v35 = vstv %s3750_s20  ;;  %v716_v44 = vld [vmem:[%s4232_s14 + $0x8] sm:$0xff] }
  0x4f   : > { %1761 = vrot.lane.b32.xlu2 %v4196_v3, %s4040_s11  ;;  %3785 = vmatmul.msk.bf16.vlgmr.msra.gmra.mxu0 %vm893_vm0, %v4220_v19  ;;  %v532_v3 = vpack.c.bf16 %v4163_v42, %v4163_v42  ;;  %v735_v22 = vadd.f32 %v4257_v24, %v726_v18  ;;  %6369 = vst [vmem:[#allocation7_spill] sm:$0xff] %v4384_v35  ;;  %v715_v18 = vld [vmem:[%s4232_s14] sm:$0xff] }
  0x50   : > { %1836 = vrot.lane.b32.xlu1 %v1261_v51, %s4040_s11  ;;  %v748_v36 = vmax.f32 %v740_v28, 0.0  ;;  %v4275_v48 = vadd.f32 -0.45, %v755_v32  ;;  %v1147_v51 = vunpack.c.l.b16 %v533_v38  ;;  %v744_v38 = vmax.f32 %v736_v21, 0.0 }
  0x51   : > { %3789 = vmatmul.msk.bf16.vlgmr.msra.gmra.mxu1 %vm893_vm0, %v4220_v19  ;;  %v1146_v26 = vunpack.c.l.b16 %v532_v3  ;;  %v743_v33 = vmax.f32 %v735_v22, 0.0  ;;  %v724_v22 = vmul.f32 %v4244_v14, %v715_v18  ;;  %v725_v21 = vmul.f32 %v4244_v14, %v716_v44 }
  0x52   : > { %v756_v43 = vmin.f32 %v748_v36, 0.9  ;;  %v787_v39 = vpack.c.bf16 %v4275_v48, %v4275_v48  ;;  %v752_v47 = vmin.f32 %v744_v38, 0.9 }
  0x53   : > { %v4270_v40 = vpack.c.b16 %v1146_v26, %v1145_v25 }
  0x54   : > { %1901 = vrot.lane.b32.xlu0 %v1338_v59, %s4040_s11  ;;  %3793 = vmatmul.msk.bf16.vlgmr.msra.gmra.mxu2 %vm893_vm0, %v4220_v19  ;;  %v4277_v49 = vadd.f32 -0.45, %v756_v43  ;;  %v1488_v56 = vunpack.c.l.b16 %v787_v39  ;;  %v4400_v39 = vadd.f32 -0.45, %v752_v47 }
  0x55   : > { %6365 = vst [vmem:[#allocation3_spill] sm:$0xff] %v4270_v40 }
  0x56   : > { %v788_v53 = vpack.c.bf16 %v4277_v49, %v4277_v49 }
  0x57   : > { %1759 = vrot.lane.b32.xlu2 %v1172_v37, %s4040_s11  ;;  %v534_v37 = vpack.c.bf16 %v4161_v41, %v4161_v41 }
  0x58   : > { %1834 = vrot.lane.b32.xlu1 %v1260_v11, %s4040_s11  ;;  %v1489_v57 = vunpack.c.l.b16 %v788_v53  ;;  %v990_v11 = vlaneseq }
  0x59   : > { %v1148_v52 = vunpack.c.l.b16 %v534_v37  ;;  %v751_v37 = vmin.f32 %v743_v33, 0.9 }
  0x5a   : > { %v1493_v59 = vpack.c.b16 %v1489_v57, %v1488_v56  ;;  %v4377_v23 = vand.u32 127, %v990_v11  ;;  %v4382_v28 = vshrl.u32 %v990_v11, 7  ;;  %v784_v57 = vpack.c.bf16 %v4400_v39, %v4400_v39 }
  0x5b   : > { %v4291_v58 = vpack.c.b16 %v1148_v52, %v1147_v51  ;;  %v4396_v51 = vadd.f32 -0.45, %v751_v37  ;;  %v734_v37 = vadd.f32 %v4257_v24, %v725_v21 }
  0x5c   : > { %1899 = vrot.lane.b32.xlu0 %v1337_v13, %s4040_s11  ;;  %1514 = vmatpush.bf16.msra.mxu3 %v1493_v59  ;;  %6368 = vst [vmem:[#allocation6_spill] sm:$0xff] %v4377_v23  ;;  %v4387_v32 = vadd.s32 %v1012_v34, %v4377_v23  ;;  %v4394_v45 = vadd.s32 %v4384_v35, %v4382_v28  ;;  %v993_v6 = vadd.s32 16, %v4382_v28 }
  0x5d   : > { %6367 = vst [vmem:[#allocation5_spill] sm:$0xff] %v4291_v58  ;;  %v783_v53 = vpack.c.bf16 %v4396_v51, %v4396_v51 }
  0x5e   : > { %6370 = vst [vmem:[#allocation8_spill] sm:$0xff] %v4394_v45  ;;  %v1014_v56 = vsub.s32 %v4394_v45, %v4387_v32  ;;  %vm1046_vm3 = vcmp.ge.s32.totalorder %v4387_v32, 0 }
  0x5f   : > { %1757 = vrot.lane.b32.xlu2 %v1171_v5, %s4040_s11  ;;  %3786 = vmatmul.msk.bf16.gmra.mxu0 %vm893_vm0, %v4270_v40  ;;  %v728_v5 = vmul.f32 %v4244_v14, %v719_v0 }
  0x60   : > { %1749 = vrot.lane.b32.xlu1 %v4220_v19, %s4040_s11  ;;  %v1055_v0 = vcvt.s32.f32 %v1014_v56  ;;  %vm1022_vm1 = vcmp.ge.s32.totalorder %v1014_v56, 0  ;;  %vm1030_vm2 = vcmp.lt.s32.totalorder %v1014_v56, 16 }
  0x61   : > { %3790 = vmatmul.msk.bf16.gmra.mxu1 %vm893_vm0, %v4270_v40  ;;  %vm1038_vm4 = vmand %vm1022_vm1, %vm1030_vm2 }
  0x62   : > { %v1063_v7 = vmul.f32 -0.1, %v1055_v0  ;;  %vm4493_vm5 = vmand %vm1038_vm4, %vm1046_vm3 }
  0x64   : > { %1751 = vrot.lane.b32.xlu0 %v4270_v40, %s4040_s11  ;;  %3794 = vmatmul.msk.bf16.gmra.mxu2 %vm893_vm0, %v4270_v40  ;;  %v1071_v12 = vmul.f32 1.442695, %v1063_v7 }
  0x66   : > { %3964 = vpow2.f32 %v1071_v12 }
  0x67   : > { %1753 = vrot.lane.b32.xlu2 %v4291_v58, %s4040_s11 }
  0x68   : > { %1755 = vrot.lane.b32.xlu1 %v4285_v55, %s4040_s11 }
  0x6c   : > { %934 = vrot.lane.b32.xlu0 %v4135_v31, %s4040_s11  ;;  %v4323_v31 = vmul.f32 %v4277_v49, %v4277_v49 }
  0x6f   : > { %936 = vrot.lane.b32.xlu2 %v4168_v46, %s4040_s11  ;;  %3787 = vmatmul.msk.bf16.gmra.mxu0 %vm893_vm0, %v4291_v58  ;;  %v796_v46 = vpack.c.bf16 %v4323_v31, %v4323_v31 }
  0x70   : > { %938 = vrot.lane.b32.xlu1 %v4133_v30, %s4040_s11  ;;  %v4319_v30 = vmul.f32 %v4275_v48, %v4275_v48 }
  0x71   : > { %3791 = vmatmul.msk.bf16.gmra.mxu1 %vm893_vm0, %v4291_v58 }
  0x74   : > { %940 = vrot.lane.b32.xlu0 %v4163_v42, %s4040_s11  ;;  %3795 = vmatmul.msk.bf16.gmra.mxu2 %vm893_vm0, %v4291_v58  ;;  %v795_v42 = vpack.c.bf16 %v4319_v30, %v4319_v30 }
  0x77   : > { %942 = vrot.lane.b32.xlu2 %v4131_v29, %s4040_s11  ;;  %v1573_v29 = vunpack.c.l.b16 %v795_v42  ;;  %v992_v42 = vadd.s32 8, %v4382_v28 }
  0x78   : > { %944 = vrot.lane.b32.xlu1 %v4161_v41, %s4040_s11  ;;  %v1574_v41 = vunpack.c.l.b16 %v796_v46 }
  0x7a   : > { %v4334_v61 = vpack.c.b16 %v1574_v41, %v1573_v29  ;;  %v1485_v29 = vunpack.c.l.b16 %v784_v57 }
  0x7f   : > { %3788 = vmatmul.msk.bf16.gmra.mxu0 %vm893_vm0, %v4285_v55 }
  0x80   : > { %2046 = vrot.lane.b32.xlu1 %v1493_v59, %s4040_s11  ;;  %v1484_v59 = vunpack.c.l.b16 %v783_v53 }
  0x81   : > { %3792 = vmatmul.msk.bf16.gmra.mxu1 %vm893_vm0, %v4285_v55 }
  0x82   : > { %v1491_v1 = vpack.c.b16 %v1485_v29, %v1484_v59 }
  0x84   : > { %3796 = vmatmul.msk.bf16.gmra.mxu2 %vm893_vm0, %v4285_v55 }
  0x88   : > { %2119 = vrot.lane.b32.xlu1 %v4334_v61, %s4040_s11 }
  0x90   : > { %946 = vrot.lane.b32.xlu1 %v4181_v60, %s4040_s11  ;;  %v737_v60 = vadd.f32 %v4257_v24, %v728_v5  ;;  %v4414_v5 = vadd.s32 %v4384_v35, %v992_v42 }
  0x92   : > { %v4342_v62 = vpop.xlane.xlu2 %907  ;;  %v4354_v54 = vpop.xlane.xlu1 %901  ;;  %v745_v8 = vmax.f32 %v737_v60, 0.0  ;;  %6372 = vst [vmem:[#allocation10_spill] sm:$0xff] %v4414_v5 }
  0x93   : > { %v4344_v63 = vpop.xlane.xlu0 %895 }
  0x94   : > { %v753_v10 = vmin.f32 %v745_v8, 0.9  ;;  %v4422_v8 = vsub.s32 %v4414_v5, %v4387_v32 }
  0x96   : > { %v4364_v16 = vadd.f32 -0.45, %v753_v10  ;;  %v994_v10 = vadd.s32 24, %v4382_v28  ;;  %v1056_v2 = vcvt.s32.f32 %v4422_v8  ;;  %vm1023_vm6 = vcmp.ge.s32.totalorder %v4422_v8, 0 }
  0x97   : > { %vm1031_vm7 = vcmp.lt.s32.totalorder %v4422_v8, 16 }
  0x98   : > { %948 = vrot.lane.b32.xlu1 %v4170_v50, %s4040_s11  ;;  %v754_v50 = vmin.f32 %v746_v9, 0.9  ;;  %v785_v3 = vpack.c.bf16 %v4364_v16, %v4364_v16  ;;  %v4425_v9 = vadd.s32 %v4384_v35, %v993_v6  ;;  %v1064_v14 = vmul.f32 -0.1, %v1056_v2  ;;  %vm1039_vm8 = vmand %vm1023_vm6, %vm1031_vm7 }
  0x99   : > { %v4484_v6 = vmul.f32 %v4400_v39, %v4400_v39  ;;  %vm4541_vm9 = vmand %vm1039_vm8, %vm1046_vm3 }
  0x9a   : > { %v4350_v4 = vpop.xlane.xlu2 %910  ;;  %v4366_v17 = vadd.f32 -0.45, %v754_v50  ;;  %v4380_v25 = vpop.xlane.xlu1 %904  ;;  %v1486_v26 = vunpack.c.l.b16 %v785_v3  ;;  %6373 = vst [vmem:[#allocation11_spill] sm:$0xff] %v4425_v9  ;;  %v779_v3 = vmul.f32 %v4275_v48, %v4319_v30  ;;  %v733_v30 = vadd.f32 %v4257_v24, %v724_v22 }
  0x9b   : > { %v4362_v15 = vpop.xlane.xlu0 %898  ;;  %v1073_v7 = vmul.f32 1.442695, %v1064_v14  ;;  %v776_v44 = vmul.f32 %v4400_v39, %v4484_v6  ;;  %v995_v39 = vadd.s32 32, %v4382_v28 }
  0x9c   : > { %v786_v20 = vpack.c.bf16 %v4366_v17, %v4366_v17  ;;  %v803_v33 = vpack.c.bf16 %v779_v3, %v779_v3  ;;  %v4454_v48 = vmul.f32 %v4366_v17, %v4366_v17  ;;  %v741_v57 = vmax.f32 %v733_v30, 0.0  ;;  %v3965_v3 = vpop.eup %3964 }
  0x9d   : > { %3966 = vpow2.f32 %v1073_v7 }
  0x9e   : > { %v1487_v27 = vunpack.c.l.b16 %v786_v20  ;;  %v780_v20 = vmul.f32 %v4277_v49, %v4323_v31  ;;  %v1658_v31 = vunpack.c.l.b16 %v803_v33  ;;  %v778_v53 = vmul.f32 %v4366_v17, %v4454_v48 }
  0x9f   : > { %v749_v12 = vmin.f32 %v741_v57, 0.9 }
  0xa0   : > { %v1492_v36 = vpack.c.b16 %v1487_v27, %v1486_v26  ;;  %v4443_v26 = vsub.s32 %v4425_v9, %v4387_v32  ;;  %v4446_v27 = vadd.s32 %v4384_v35, %v994_v10  ;;  %v804_v34 = vpack.c.bf16 %v780_v20, %v780_v20 }
  0xa1   : > { %v802_v17 = vpack.c.bf16 %v778_v53, %v778_v53  ;;  %v742_v10 = vmax.f32 %v734_v37, 0.0  ;;  %v6376_v20 = vmov 0  ;;  %v1087_v37 = vsel %vm4493_vm5, %v3965_v3, 0.0 }
  0xa2   : > { %v4360_v13 = vpop.permute.xlu2 %1840  ;;  %2044 = vrot.lane.b32.xlu1 %v1492_v36, %s4040_s11  ;;  %1515 = vmatpush.bf16.msra.mxu3 %v1492_v36  ;;  %v4409_v46 = vpop.xlane.xlu1 %916  ;;  %6374 = vst [vmem:[#allocation12_spill] sm:$0xff] %v4446_v27  ;;  %v4450_v36 = vmul.f32 %v4364_v16, %v4364_v16  ;;  %v1659_v38 = vunpack.c.l.b16 %v804_v34  ;;  %v1057_v59 = vcvt.s32.f32 %v4443_v26  ;;  %v4470_v29 = vsub.s32 %v4446_v27, %v4387_v32 }
  0xa3   : > { %v4398_v52 = vpop.xlane.xlu0 %913  ;;  %6371 = vst [vmem:[#allocation9_spill] sm:$0xff] %v4409_v46  ;;  %v1657_v18 = vunpack.c.l.b16 %v802_v17  ;;  %v6377_v20 = vsel %vm4493_vm5, 4294967295, %v6376_v20  ;;  %v750_v21 = vmin.f32 %v742_v10, 0.9  ;;  %v4519_v3 = vadd.s32 %v4384_v35, %v995_v39 }
  0xa4   : > { %v777_v47 = vmul.f32 %v4364_v16, %v4450_v36  ;;  %v4466_v42 = vpack.c.b16 %v1659_v38, %v1658_v31  ;;  %6378 = vst [vmem:[#allocation14_spill] sm:$0xff] %v6377_v20  ;;  %v1065_v22 = vmul.f32 -0.1, %v1057_v59  ;;  %v1058_v14 = vcvt.s32.f32 %v4470_v29 }
  0xa5   : > { %v800_v31 = vpack.c.bf16 %v776_v44, %v776_v44  ;;  %v3768_v38 = vadd.f32 -0.45, %v750_v21  ;;  %6382 = vst [vmem:[#allocation18_spill] sm:$0xff] %v4519_v3  ;;  %v4534_v39 = vsub.s32 %v4519_v3, %v4387_v32  ;;  %vm1024_vm10 = vcmp.ge.s32.totalorder %v4443_v26, 0 }
  0xa6   : > { %1516 = vmatpush.bf16.msra.mxu3 %v1491_v1  ;;  %6375 = vst [vmem:[#allocation13_spill] sm:$0xff] %v4466_v42  ;;  %v801_v16 = vpack.c.bf16 %v777_v47, %v777_v47  ;;  %1684 = vmatpush.bf16.msrb.mxu0 %v4466_v42  ;;  %v1075_v10 = vmul.f32 1.442695, %v1065_v22  ;;  %vm1032_vm11 = vcmp.lt.s32.totalorder %v4443_v26, 16  ;;  %v4551_v3 = vmul.f32 0.5213636, %v4344_v63 }
  0xa7   : > { %v1655_v53 = vunpack.c.l.b16 %v800_v31  ;;  %v782_v59 = vpack.c.bf16 %v3768_v38, %v3768_v38  ;;  %vm1040_vm12 = vmand %vm1024_vm10, %vm1032_vm11  ;;  %vm1025_vm13 = vcmp.ge.s32.totalorder %v4470_v29, 0  ;;  %vm1033_vm14 = vcmp.lt.s32.totalorder %v4470_v29, 16 }
  0xa8   : > { %v1656_v2 = vunpack.c.l.b16 %v801_v16  ;;  %3968 = vpow2.f32 %v1075_v10  ;;  %6386 = vst [vmem:[#allocation20_spill] sm:$0xff] %v4551_v3  ;;  %vm4585_vm15 = vmand %vm1040_vm12, %vm1046_vm3  ;;  %v6397_v29 = vmov 0  ;;  %vm1026_vm4 = vcmp.ge.s32.totalorder %v4534_v39, 0 }
  0xa9   : > { %v1483_v7 = vunpack.c.l.b16 %v782_v59  ;;  %vm1041_vm1 = vmand %vm1025_vm13, %vm1033_vm14  ;;  %vm1034_vm6 = vcmp.lt.s32.totalorder %v4534_v39, 16 }
  0xaa   : > { %v4389_v43 = vpop.permute.xlu2 %1838  ;;  %2042 = vrot.lane.b32.xlu1 %v1491_v1, %s4040_s11  ;;  %v4480_v1 = vmul.f32 %v4396_v51, %v4396_v51  ;;  %v4499_v34 = vpack.c.b16 %v1657_v18, %v1656_v2  ;;  %v4514_v18 = vmul.f32 %v3768_v38, %v3768_v38  ;;  %vm4618_vm2 = vmand %vm1041_vm1, %vm1046_vm3 }
  0xab   : > { %v6398_v29 = vsel %vm4618_vm2, 4294967295, %v6397_v29  ;;  %vm4642_vm7 = vmand %vm1026_vm4, %vm1034_vm6 }
  0xac   : > { %v775_v56 = vmul.f32 %v4396_v51, %v4480_v1  ;;  %6379 = vst [vmem:[#allocation15_spill] sm:$0xff] %v4499_v34  ;;  %v3767_v51 = vadd.f32 -0.45, %v749_v12  ;;  %1685 = vmatpush.bf16.msrb.mxu0 %v4499_v34  ;;  %v1066_v12 = vmul.f32 -0.1, %v1058_v14  ;;  %v774_v22 = vmul.f32 %v3768_v38, %v4514_v18  ;;  %vm4674_vm8 = vmand %vm4642_vm7, %vm1046_vm3 }
  0xad   : > { %v4527_v14 = vmul.f32 13.612261, %v1087_v37  ;;  %v6383_v38 = vmov 0  ;;  %v791_v26 = vpack.c.bf16 %v4480_v1, %v4480_v1  ;;  %v794_v1 = vpack.c.bf16 %v4454_v48, %v4454_v48  ;;  %6399 = vst [vmem:[#allocation29_spill] sm:$0xff] %v6398_v29 }
  0xae   : > { %v799_v30 = vpack.c.bf16 %v775_v56, %v775_v56  ;;  %v781_v57 = vpack.c.bf16 %v3767_v51, %v3767_v51  ;;  %v4512_v2 = vmul.f32 %v3767_v51, %v3767_v51  ;;  %v6384_v38 = vsel %vm4541_vm9, 4294967295, %v6383_v38 }
  0xaf   : > { %6385 = vst [vmem:[#allocation19_spill] sm:$0xff] %v6384_v38  ;;  %v1572_v55 = vunpack.c.l.b16 %v794_v1  ;;  %v1569_v19 = vunpack.c.l.b16 %v791_v26 }
  0xb0   : > { %v1654_v47 = vunpack.c.l.b16 %v799_v30  ;;  %v1482_v44 = vunpack.c.l.b16 %v781_v57  ;;  %v773_v21 = vmul.f32 %v3767_v51, %v4512_v2  ;;  %v1095_v30 = vmul.f32 %v1087_v37, %v1087_v37 }
  0xb1   : > { %v798_v57 = vpack.c.bf16 %v774_v22, %v774_v22  ;;  %v996_v51 = vadd.s32 40, %v4382_v28 }
  0xb2   : > { %v4411_v41 = vpop.permute.xlu2 %1761  ;;  %v4516_v56 = vpack.c.b16 %v1655_v53, %v1654_v47  ;;  %v4530_v31 = vpack.c.b16 %v1483_v7, %v1482_v44  ;;  %v3967_v47 = vpop.eup %3966  ;;  %v797_v8 = vpack.c.bf16 %v773_v21, %v773_v21  ;;  %v1077_v44 = vmul.f32 1.442695, %v1066_v12 }
  0xb3   : > { %v1059_v7 = vcvt.s32.f32 %v4534_v39  ;;  %v1653_v22 = vunpack.c.l.b16 %v798_v57  ;;  %v4554_v9 = vmul.f32 -2.6204457, %v1095_v30  ;;  %v1088_v12 = vsel %vm4541_vm9, %v3967_v47, 0.0 }
  0xb4   : > { %6381 = vst [vmem:[#allocation17_spill] sm:$0xff] %v4516_v56  ;;  %1686 = vmatpush.bf16.msrb.mxu0 %v4516_v56  ;;  %1517 = vmatpush.bf16.msra.mxu3 %v4530_v31  ;;  %v1652_v21 = vunpack.c.l.b16 %v797_v8  ;;  %v4563_v8 = vadd.s32 %v4384_v35, %v996_v51  ;;  %v1119_v63 = vmul.f32 %v1095_v30, %v1087_v37  ;;  %3970 = vpow2.f32 %v1077_v44  ;;  %v3969_v51 = vpop.eup %3968 }
  0xb5   : > { %v1067_v47 = vmul.f32 -0.1, %v1059_v7  ;;  %v1096_v30 = vmul.f32 %v1088_v12, %v1088_v12  ;;  %v6391_v7 = vmov 0  ;;  %v792_v44 = vpack.c.bf16 %v4484_v6, %v4484_v6 }
  0xb6   : > { %v4418_v60 = vpop.permute.xlu0 %1905  ;;  %v4560_v23 = vpack.c.b16 %v1653_v22, %v1652_v21  ;;  %6388 = vst [vmem:[#allocation22_spill] sm:$0xff] %v4563_v8  ;;  %v6392_v7 = vsel %vm4585_vm15, 4294967295, %v6391_v7  ;;  %v793_v21 = vpack.c.bf16 %v4450_v36, %v4450_v36  ;;  %v4599_v22 = vmul.f32 13.612261, %v1088_v12 }
  0xb7   : > { %6393 = vst [vmem:[#allocation25_spill] sm:$0xff] %v6392_v7  ;;  %v1079_v6 = vmul.f32 1.442695, %v1067_v47  ;;  %v4610_v40 = vmul.f32 -2.6204457, %v1096_v30 }
  0xb8   : > { %1599 = vmatpush.bf16.msrb.mxu3 %v4334_v61  ;;  %6387 = vst [vmem:[#allocation21_spill] sm:$0xff] %v4560_v23  ;;  %v4566_v61 = vmul.f32 0.5213636, %v4362_v15  ;;  %1687 = vmatpush.bf16.msrb.mxu0 %v4560_v23  ;;  %v997_v15 = vadd.s32 48, %v4382_v28 }
  0xb9   : > { %6395 = vst [vmem:[#allocation27_spill] sm:$0xff] %v4610_v40  ;;  %3972 = vpow2.f32 %v1079_v6  ;;  %v998_v6 = vadd.s32 56, %v4382_v28  ;;  %v790_v28 = vpack.c.bf16 %v4514_v18, %v4514_v18 }
  0xba   : > { %v4428_v50 = vpop.permute.xlu2 %1759  ;;  %v4430_v11 = vpop.permute.xlu1 %1763  ;;  %6389 = vst [vmem:[#allocation23_spill] sm:$0xff] %v4566_v61  ;;  %v4608_v58 = vadd.s32 %v4384_v35, %v997_v15 }
  0xbb   : > { %v3971_v23 = vpop.eup %3970  ;;  %v1568_v46 = vunpack.c.l.b16 %v790_v28 }
  0xbc   : > { %6394 = vst [vmem:[#allocation26_spill] sm:$0xff] %v4608_v58 }
  0xbe   : > { %v4456_v49 = vpop.permute.xlu0 %1903 }
  0xc2   : > { %v4472_v0 = vpop.permute.xlu2 %1757  ;;  %v4474_v24 = vpop.permute.xlu1 %1836 }
  0xc6   : > { %v4497_v33 = vpop.permute.xlu0 %1901 }
  0xca   : > { %v4508_v16 = vpop.permute.xlu2 %1753  ;;  %v4510_v17 = vpop.permute.xlu1 %1834 }
  0xcb   : > { %6380 = vst [vmem:[#allocation16_spill] sm:$0xff] %v4508_v16 }
  0xcc   : > { %v1208_v59 = vpop.f32.mrf.mxu0 }
  0xcd   : > { %v1228_v27 = vmul.f32 %v1208_v59, %v4527_v14 }
  0xce   : > { %v4536_v53 = vpop.permute.xlu0 %1899  ;;  %v1285_v10 = vpop.f32.mrf.mxu1 }
  0xcf   : > { %v1236_v37 = vadd.f32 %v1228_v27, %v4551_v3  ;;  %v4593_v27 = vsub.s32 %v4563_v8, %v4387_v32  ;;  %v1120_v3 = vmul.f32 %v1096_v30, %v1088_v12  ;;  %v1571_v8 = vunpack.c.l.b16 %v793_v21 }
  0xd0   : > { %v1570_v12 = vunpack.c.l.b16 %v792_v44  ;;  %v4633_v30 = vsub.s32 %v4608_v58, %v4387_v32 }
  0xd1   : > { %v1060_v47 = vcvt.s32.f32 %v4593_v27  ;;  %v4624_v15 = vpack.c.b16 %v1572_v55, %v1571_v8  ;;  %v1090_v8 = vsel %vm4618_vm2, %v3971_v23, 0.0  ;;  %vm1027_vm10 = vcmp.ge.s32.totalorder %v4593_v27, 0 }
  0xd2   : > { %v937_v5 = vpop.permute.xlu2 %936  ;;  %v4558_v45 = vpop.permute.xlu1 %1749  ;;  %vm1035_vm11 = vcmp.lt.s32.totalorder %v4593_v27, 16  ;;  %v1784_v27 = vsel %vm893_vm0, %v4411_v41, 0  ;;  %vm1028_vm14 = vcmp.ge.s32.totalorder %v4633_v30, 0  ;;  %vm1036_vm1 = vcmp.lt.s32.totalorder %v4633_v30, 16 }
  0xd3   : > { %v961_v57 = vsel %vm893_vm0, %v937_v5, 0.0  ;;  %v1305_v5 = vmul.f32 %v1285_v10, %v4554_v9  ;;  %1600 = vmatpush.bf16.msrb.mxu3 %v4624_v15  ;;  %v1068_v1 = vmul.f32 -0.1, %v1060_v47  ;;  %vm4726_vm12 = vmand %vm1027_vm10, %vm1035_vm11 }
  0xd4   : > { %962 = vadd.xlane.f32.xlu2 %v961_v57  ;;  %v1210_v10 = vpop.f32.mrf.mxu0  ;;  %v4601_v57 = vmul.f32 46.054836, %v1119_v63  ;;  %v1089_v63 = vsel %vm4585_vm15, %v3969_v51, 0.0  ;;  %vm4751_vm13 = vmand %vm4726_vm12, %vm1046_vm3 }
  0xd5   : > { %v1313_v36 = vadd.f32 %v1305_v5, %v1236_v37  ;;  %v1229_v51 = vmul.f32 %v1210_v10, %v4599_v22  ;;  %v4629_v5 = vmul.f32 46.054836, %v1120_v3  ;;  %v4636_v44 = vmul.f32 13.612261, %v1089_v63  ;;  %vm4794_vm4 = vmand %vm1028_vm14, %vm1036_vm1 }
  0xd6   : > { %v4581_v59 = vpop.permute.xlu0 %1751  ;;  %v1287_v48 = vpop.f32.mrf.mxu1  ;;  %v1097_v55 = vmul.f32 %v1089_v63, %v1089_v63  ;;  %v4646_v3 = vpack.c.b16 %v1570_v12, %v1569_v19  ;;  %v789_v10 = vpack.c.bf16 %v4512_v2, %v4512_v2  ;;  %v1061_v19 = vcvt.s32.f32 %v4633_v30  ;;  %vm4821_vm6 = vmand %vm4794_vm4, %vm1046_vm3 }
  0xd7   : > { %6390 = vst [vmem:[#allocation24_spill] sm:$0xff] %v4581_v59  ;;  %v1362_v56 = vpop.f32.mrf.mxu2  ;;  %v1852_v2 = vsel %vm893_vm0, %v4360_v13, 0  ;;  %v1081_v42 = vmul.f32 1.442695, %v1068_v1 }
  0xd8   : > { %v1382_v37 = vmul.f32 %v1362_v56, %v4601_v57  ;;  %6400 = vst [vmem:[#allocation30_spill] sm:$0xff] %v4629_v5  ;;  %1601 = vmatpush.bf16.msrb.mxu3 %v4646_v3  ;;  %1858 = vmatpush.bf16.xpose.msrb.mxu2 %v1852_v2  ;;  %v1069_v2 = vmul.f32 -0.1, %v1061_v19 }
  0xd9   : > { %6401 = vst [vmem:[#allocation31_spill] sm:$0xff] %v4636_v44  ;;  %3974 = vpow2.f32 %v1081_v42 }
  0xda   : > { %v4614_v34 = vpop.permute.xlu1 %1755  ;;  %v1390_v26 = vadd.f32 %v1382_v37, %v1313_v36  ;;  %v1237_v36 = vadd.f32 %v1229_v51, %v4566_v61  ;;  %v1306_v37 = vmul.f32 %v1287_v48, %v4610_v40  ;;  %v3973_v48 = vpop.eup %3972  ;;  %v4666_v51 = vmul.f32 -2.6204457, %v1097_v55 }
  0xdb   : > { %6396 = vst [vmem:[#allocation28_spill] sm:$0xff] %v4614_v34  ;;  %v4657_v34 = vmul.f32 0.5213636, %v4354_v54  ;;  %v4668_v54 = vmul.f32 13.612261, %v1090_v8  ;;  %v1567_v61 = vunpack.c.l.b16 %v789_v10  ;;  %v4685_v56 = vsel %vm4674_vm8, %v3973_v48, 0.0 }
  0xdc   : > { %v1398_v23 = vsel %vm4493_vm5, %v1390_v26, 0.0  ;;  %v1213_v39 = vpop.f32.mrf.mxu0  ;;  %6405 = vst [vmem:[#allocation33_spill] sm:$0xff] %v4666_v51  ;;  %v1314_v20 = vadd.f32 %v1306_v37, %v1237_v36 }
  0xdd   : > { %6404 = vst [vmem:[#allocation32_spill] sm:$0xff] %v4657_v34  ;;  %v1406_v12 = vmul.f32 0.0125, %v1398_v23  ;;  %v1230_v47 = vmul.f32 %v1213_v39, %v4636_v44  ;;  %v1121_v23 = vmul.f32 %v1097_v55, %v1089_v63  ;;  %v4679_v39 = vadd.s32 %v4384_v35, %v998_v6 }
  0xde   : > { %v935_v21 = vpop.permute.xlu0 %934  ;;  %v1290_v26 = vpop.f32.mrf.mxu1  ;;  %6406 = vst [vmem:[#allocation34_spill] sm:$0xff] %v4668_v54  ;;  %v1787_v63 = vsel %vm893_vm0, %v4430_v11, 0  ;;  %v4694_v48 = vpack.c.b16 %v1568_v46, %v1567_v61  ;;  %v1099_v46 = vmul.f32 %v4685_v56, %v4685_v56 }
  0xdf   : > { %v958_v58 = vsel %vm893_vm0, %v935_v21, 0.0  ;;  %v1364_v13 = vpop.f32.mrf.mxu2  ;;  %v1098_v21 = vmul.f32 %v1090_v8, %v1090_v8  ;;  %6410 = vst [vmem:[#allocation36_spill] sm:$0xff] %v4679_v39  ;;  %v1414_v55 = vmax.f32 %v1406_v12, 0.0  ;;  %v1238_v10 = vadd.f32 %v1230_v47, %v4657_v34  ;;  %1793 = vmatpush.bf16.xpose.msrb.mxu1 %v1787_v63 }
  0xe0   : > { %959 = vadd.xlane.f32.xlu0 %v958_v58  ;;  %v6407_v58 = vmov 0  ;;  %v1383_v16 = vmul.f32 %v1364_v13, %v4629_v5  ;;  %v1307_v6 = vmul.f32 %v1290_v26, %v4666_v51  ;;  %v4691_v1 = vmul.f32 46.054836, %v1121_v23  ;;  %1602 = vmatpush.bf16.msrb.mxu3 %v4694_v48 }
  0xe1   : > { %v6408_v58 = vsel %vm4674_vm8, 4294967295, %v6407_v58  ;;  %v1122_v37 = vmul.f32 %v1098_v21, %v1090_v8  ;;  %v4701_v11 = vsub.s32 %v4679_v39, %v4387_v32  ;;  %v4712_v61 = vmin.f32 %v1414_v55, 1.0 }
  0xe2   : > { %6409 = vst [vmem:[#allocation35_spill] sm:$0xff] %v6408_v58  ;;  %v939_v18 = vpop.permute.xlu1 %938  ;;  %v1391_v36 = vadd.f32 %v1383_v16, %v1314_v20  ;;  %v4704_v20 = vmul.f32 0.5213636, %v4342_v62  ;;  %v4707_v16 = vmul.f32 0.5213636, %v4380_v25  ;;  %v1315_v28 = vadd.f32 %v1307_v6, %v1238_v10 }
  0xe3   : > { %v964_v59 = vsel %vm893_vm0, %v939_v18, 0.0  ;;  %6411 = vst [vmem:[#allocation37_spill] sm:$0xff] %v4691_v1  ;;  %v1083_v12 = vmul.f32 1.442695, %v1069_v2  ;;  %v1849_v47 = vsel %vm893_vm0, %v4389_v43, 0  ;;  %v1917_v62 = vsel %vm893_vm0, %v4418_v60, 0 }
  0xe4   : > { %965 = vadd.xlane.f32.xlu1 %v964_v59  ;;  %v1399_v59 = vsel %vm4541_vm9, %v1391_v36, 0.0  ;;  %v1215_v19 = vpop.f32.mrf.mxu0  ;;  %6412 = vst [vmem:[#allocation38_spill] sm:$0xff] %v4704_v20  ;;  %v4718_v25 = vmul.f32 -2.6204457, %v1098_v21  ;;  %v4720_v23 = vmul.f32 46.054836, %v1122_v37  ;;  %1859 = vmatpush.bf16.xpose.msrb.mxu2 %v1849_v47  ;;  %v1062_v2 = vcvt.s32.f32 %v4701_v11  ;;  %v3975_v36 = vpop.eup %3974 }
  0xe5   : > { %6413 = vst [vmem:[#allocation39_spill] sm:$0xff] %v4707_v16  ;;  %v1407_v8 = vmul.f32 0.0125, %v1399_v59  ;;  %v1231_v43 = vmul.f32 %v1215_v19, %v4668_v54  ;;  %v4737_v10 = vmul.f32 13.612261, %v4685_v56  ;;  %v1462_v59 = vmul.f32 %v4712_v61, %v4527_v14 }
  0xe6   : > { %v1292_v42 = vpop.f32.mrf.mxu1  ;;  %6414 = vst [vmem:[#allocation40_spill] sm:$0xff] %v4718_v25  ;;  %v4739_v6 = vmul.f32 -2.6204457, %v1099_v46  ;;  %v6420_v19 = vmov 0  ;;  %3976 = vpow2.f32 %v1083_v12  ;;  %vm1029_vm7 = vcmp.ge.s32.totalorder %v4701_v11, 0 }
  0xe7   : > { %v1415_v26 = vmax.f32 %v1407_v8, 0.0  ;;  %v1367_v13 = vpop.f32.mrf.mxu2  ;;  %6415 = vst [vmem:[#allocation41_spill] sm:$0xff] %v4720_v23  ;;  %v6421_v19 = vsel %vm4751_vm13, 4294967295, %v6420_v19  ;;  %1794 = vmatpush.bf16.xpose.msrb.mxu1 %v1784_v27  ;;  %v1239_v47 = vadd.f32 %v1231_v43, %v4707_v16  ;;  %vm1037_vm10 = vcmp.lt.s32.totalorder %v4701_v11, 16 }
  0xe8   : > { %v1384_v60 = vmul.f32 %v1367_v13, %v4691_v1  ;;  %6418 = vst [vmem:[#allocation42_spill] sm:$0xff] %v4737_v10  ;;  %vm4871_vm11 = vmand %vm1029_vm7, %vm1037_vm10 }
  0xe9   : > { %v4734_v55 = vmin.f32 %v1415_v26, 1.0  ;;  %6419 = vst [vmem:[#allocation43_spill] sm:$0xff] %v4739_v6  ;;  %v1308_v26 = vmul.f32 %v1292_v42, %v4718_v25  ;;  %v1846_v42 = vsel %vm893_vm0, %v4474_v24, 0  ;;  %vm4897_vm12 = vmand %vm4871_vm11, %vm1046_vm3 }
  0xea   : > { %v945_v18 = vpop.permute.xlu1 %944  ;;  %v1392_v37 = vadd.f32 %v1384_v60, %v1315_v28  ;;  %6422 = vst [vmem:[#allocation44_spill] sm:$0xff] %v6421_v19 }
  0xeb   : > { %v973_v21 = vsel %vm893_vm0, %v945_v18, 0.0  ;;  %v1463_v41 = vmul.f32 %v4734_v55, %v4599_v22  ;;  %v1633_v8 = vmul.f32 %v4734_v55, %v4629_v5  ;;  %v4764_v28 = vmul.f32 %v4734_v55, %v4610_v40 }
  0xec   : > { %2115 = vrot.lane.b32.xlu2 %v4646_v3, %s4040_s11  ;;  %974 = vadd.xlane.f32.xlu1 %v973_v21  ;;  %v1632_v3 = vmul.f32 %v4712_v61, %v4601_v57  ;;  %v1400_v12 = vsel %vm4585_vm15, %v1392_v37, 0.0  ;;  %v1218_v13 = vpop.f32.mrf.mxu0  ;;  %v4772_v18 = vmul.f32 %v4712_v61, %v4554_v9  ;;  %v1092_v21 = vsel %vm4751_vm13, %v3975_v36, 0.0  ;;  %v3977_v36 = vpop.eup %3976 }
  0xed   : > { %v1470_v63 = vpack.c.bf16 %v1463_v41, %v1462_v59  ;;  %v1408_v27 = vmul.f32 0.0125, %v1400_v12  ;;  %v1232_v43 = vmul.f32 %v1218_v13, %v4737_v10  ;;  %v1070_v41 = vmul.f32 -0.1, %v1062_v2  ;;  %1860 = vmatpush.bf16.xpose.msrb.mxu2 %v1846_v42 }
  0xee   : > { %v1640_v60 = vpack.c.bf16 %v1633_v8, %v1632_v3  ;;  %v1295_v16 = vpop.f32.mrf.mxu1  ;;  %v1316_v3 = vadd.f32 %v1308_v26, %v1239_v47  ;;  %v1123_v12 = vmul.f32 %v1099_v46, %v4685_v56  ;;  %v1100_v24 = vmul.f32 %v1092_v21, %v1092_v21 }
  0xef   : > { %v1369_v34 = vpop.f32.mrf.mxu2  ;;  %3797 = vmatmul.msk.bf16.vlgmr.msra.gmra.mxu3 %vm893_vm0, %v1470_v63  ;;  %v1416_v56 = vmax.f32 %v1408_v27, 0.0  ;;  %v1240_v46 = vadd.f32 %v1232_v43, %v4704_v20  ;;  %v1085_v47 = vmul.f32 1.442695, %v1070_v41  ;;  %v4813_v30 = vmul.f32 13.612261, %v1092_v21 }
  0xf0   : > { %3805 = vmatmul.msk.bf16.vlgmr.msrb.gmra.mxu0 %vm893_vm0, %v1640_v60  ;;  %v1385_v8 = vmul.f32 %v1369_v34, %v4720_v23  ;;  %1923 = vmatpush.bf16.xpose.msra.mxu3 %v1917_v62  ;;  %v1781_v34 = vsel %vm893_vm0, %v4428_v50, 0  ;;  %v1309_v62 = vmul.f32 %v1295_v16, %v4739_v6  ;;  %v4815_v13 = vmul.f32 46.054836, %v1123_v12  ;;  %v634_v12 = vld [vmem:[%s4809_s28 + $0x38] sm:$0xff] }
  0xf1   : > { %1795 = vmatpush.bf16.xpose.msrb.mxu1 %v1781_v34  ;;  %6426 = vst [vmem:[#allocation46_spill] sm:$0xff] %v4813_v30  ;;  %v1124_v16 = vmul.f32 %v1100_v24, %v1092_v21  ;;  %v4826_v63 = vmul.f32 0.5213636, %v4398_v52  ;;  %v1914_v60 = vsel %vm893_vm0, %v4456_v49, 0  ;;  %v1843_v43 = vsel %vm893_vm0, %v4510_v17, 0  ;;  %v633_v17 = vld [vmem:[%s4809_s28 + $0x30] sm:$0xff] }
  0xf2   : > { %v2047_v59 = vpop.permute.xlu1 %2046  ;;  %6427 = vst [vmem:[#allocation47_spill] sm:$0xff] %v4815_v13  ;;  %v4834_v42 = vsel %vm893_vm0, %v4497_v33, 0  ;;  %v1317_v41 = vadd.f32 %v1309_v62, %v1240_v46  ;;  %3978 = vpow2.f32 %v1085_v47  ;;  %v4845_v2 = vmul.f32 -2.6204457, %v1100_v24  ;;  %v4859_v62 = vld [vmem:[%s6261_s0 + $0x2] ss:$0 sm:$0xff] }
  0xf3   : > { %2068 = vmatpush.bf16.msra.mxu0 %v2047_v59  ;;  %6431 = vst [vmem:[#allocation49_spill] sm:$0xff] %v4826_v63  ;;  %v4836_v59 = vmin.f32 %v1416_v56, 1.0  ;;  %v4848_v56 = vmul.f32 46.054836, %v1124_v16  ;;  %v641_v24 = vmul.f32 %v4859_v62, %v633_v17 }
  0xf4   : > { %2117 = vrot.lane.b32.xlu0 %v4624_v15, %s4040_s11  ;;  %2040 = vrot.lane.b32.xlu2 %v4530_v31, %s4040_s11  ;;  %v1393_v15 = vadd.f32 %v1385_v8, %v1316_v3  ;;  %v4803_v31 = vmul.f32 0.5213636, %v4350_v4  ;;  %v1220_v26 = vpop.f32.mrf.mxu0  ;;  %v6428_v4 = vmov 0  ;;  %v1093_v8 = vsel %vm4821_vm6, %v3977_v36, 0.0  ;;  %6432 = vst [vmem:[#allocation50_spill] sm:$0xff] %v4845_v2 }
  0xf5   : > { %v6429_v4 = vsel %vm4821_vm6, 4294967295, %v6428_v4  ;;  %v1233_v33 = vmul.f32 %v1220_v26, %v4813_v30  ;;  %6433 = vst [vmem:[#allocation51_spill] sm:$0xff] %v4848_v56  ;;  %1861 = vmatpush.bf16.xpose.msrb.mxu2 %v1843_v43  ;;  %v1778_v36 = vsel %vm893_vm0, %v4472_v0, 0  ;;  %v1101_v26 = vmul.f32 %v1093_v8, %v1093_v8 }
  0xf6   : > { %6425 = vst [vmem:[#allocation45_spill] sm:$0xff] %v4803_v31  ;;  %v1401_v50 = vsel %vm4618_vm2, %v1393_v15, 0.0  ;;  %v1297_v21 = vpop.f32.mrf.mxu1  ;;  %v642_v15 = vmul.f32 %v4859_v62, %v634_v12  ;;  %v1464_v16 = vmul.f32 %v4836_v59, %v4636_v44  ;;  %v4891_v17 = vmul.f32 %v4836_v59, %v4666_v51  ;;  %v6453_v51 = vld [vmem:[#allocation15_spill] sm:$0xff] }
  0xf7   : > { %6430 = vst [vmem:[#allocation48_spill] sm:$0xff] %v6429_v4  ;;  %v1409_v27 = vmul.f32 0.0125, %v1401_v50  ;;  %v1372_v3 = vpop.f32.mrf.mxu2  ;;  %v4863_v50 = vmul.f32 13.612261, %v1093_v8  ;;  %v1241_v11 = vadd.f32 %v1233_v33, %v4803_v31  ;;  %v1125_v31 = vmul.f32 %v1101_v26, %v1093_v8 }
  0xf8   : > { %v1386_v34 = vmul.f32 %v1372_v3, %v4815_v13  ;;  %1924 = vmatpush.bf16.xpose.msra.mxu3 %v1914_v60  ;;  %v1634_v60 = vmul.f32 %v4836_v59, %v4691_v1  ;;  %v3979_v12 = vpop.eup %3978 }
  0xf9   : > { %v1417_v52 = vmax.f32 %v1409_v27, 0.0  ;;  %6434 = vst [vmem:[#allocation52_spill] sm:$0xff] %v4863_v50  ;;  %1796 = vmatpush.bf16.xpose.msrb.mxu1 %v1778_v36 }
  0xfa   : > { %v2120_v49 = vpop.permute.xlu1 %2119  ;;  %v1394_v47 = vadd.f32 %v1386_v34, %v1317_v41  ;;  %v1310_v41 = vmul.f32 %v1297_v21, %v4845_v2  ;;  %v4904_v21 = vld [vmem:[%s6261_s0 + $0x3] ss:$0 sm:$0xff] }
  0xfb   : > { %v4850_v46 = vmin.f32 %v1417_v52, 1.0  ;;  %v649_v33 = vadd.f32 %v4904_v21, %v641_v24 }
  0xfc   : > { %2113 = vrot.lane.b32.xlu2 %v4694_v48, %s4040_s11  ;;  %v1402_v52 = vsel %vm4674_vm8, %v1394_v47, 0.0  ;;  %v1223_v3 = vpop.f32.mrf.mxu0  ;;  %v650_v47 = vadd.f32 %v4904_v21, %v642_v15  ;;  %v1318_v20 = vadd.f32 %v1310_v41, %v1241_v11  ;;  %v1094_v15 = vsel %vm4897_vm12, %v3979_v12, 0.0  ;;  %3821 = vmatmul.msk.bf16.vlgmr.msrb.gmra.mxu2 %vm893_vm0, %v4558_v45 }
  0xfd   : > { %v1465_v48 = vmul.f32 %v4850_v46, %v4668_v54  ;;  %v1635_v27 = vmul.f32 %v4850_v46, %v4720_v23  ;;  %v4883_v43 = vmul.f32 %v4850_v46, %v4718_v25  ;;  %v1410_v37 = vmul.f32 0.0125, %v1402_v52 }
  0xfe   : > { %v1300_v32 = vpop.f32.mrf.mxu1  ;;  %v1102_v12 = vmul.f32 %v1094_v15, %v1094_v15 }
  0xff   : > { %v1471_v34 = vpack.c.bf16 %v1465_v48, %v1464_v16  ;;  %v1641_v36 = vpack.c.bf16 %v1635_v27, %v1634_v60  ;;  %v1234_v16 = vmul.f32 %v1223_v3, %v4863_v50  ;;  %v4909_v48 = vmul.f32 -2.6204457, %v1101_v26  ;;  %v1374_v60 = vpop.f32.mrf.mxu2 }
 0x100   : > { %v1387_v24 = vmul.f32 %v1374_v60, %v4848_v56  ;;  %1925 = vmatpush.bf16.xpose.msra.mxu3 %v4834_v42  ;;  %3817 = vmatmul.msk.bf16.vlgmr.msrb.gmra.mxu1 %vm893_vm0, %v4558_v45  ;;  %v657_v3 = vmax.f32 %v649_v33, 0.0  ;;  %v1418_v8 = vmax.f32 %v1410_v37, 0.0  ;;  %v4928_v60 = vmul.f32 13.612261, %v1094_v15 }
 0x101   : > { %2141 = vmatpush.bf16.msra.mxu1 %v2120_v49  ;;  %v6437_v49 = vmov 0  ;;  %6440 = vst [vmem:[#allocation54_spill] sm:$0xff] %v4909_v48  ;;  %3798 = vmatmul.msk.bf16.gmra.mxu3 %vm893_vm0, %v1471_v34  ;;  %v658_v34 = vmax.f32 %v650_v47, 0.0  ;;  %v1242_v26 = vadd.f32 %v1234_v16, %v4826_v63  ;;  %v1311_v11 = vmul.f32 %v1300_v32, %v4909_v48  ;;  %v6443_v63 = vld [vmem:[#allocation9_spill] sm:$0xff] }
 0x102   : > { %v6438_v49 = vsel %vm4897_vm12, 4294967295, %v6437_v49  ;;  %3806 = vmatmul.msk.bf16.gmra.mxu0 %vm893_vm0, %v1641_v36  ;;  %v947_v27 = vpop.permute.xlu1 %946  ;;  %v1395_v41 = vadd.f32 %v1387_v24, %v1318_v20  ;;  %6441 = vst [vmem:[#allocation55_spill] sm:$0xff] %v4928_v60  ;;  %v1908_v42 = vsel %vm893_vm0, %v4536_v53, 0  ;;  %v1126_v47 = vmul.f32 %v1102_v12, %v1094_v15 }
 0x103   : > { %6439 = vst [vmem:[#allocation53_spill] sm:$0xff] %v6438_v49  ;;  %v976_v52 = vsel %vm893_vm0, %v947_v27, 0.0  ;;  %v4930_v27 = vmul.f32 46.054836, %v1125_v31  ;;  %v4934_v37 = vmin.f32 %v1418_v8, 1.0  ;;  %v1319_v16 = vadd.f32 %v1311_v11, %v1242_v26 }
 0x104   : > { %977 = vadd.xlane.f32.xlu1 %v976_v52  ;;  %v1403_v36 = vsel %vm4751_vm13, %v1395_v41, 0.0  ;;  %v1225_v33 = vpop.f32.mrf.mxu0  ;;  %v665_v0 = vmin.f32 %v657_v3, 0.9  ;;  %v666_v32 = vmin.f32 %v658_v34, 0.9 }
 0x105   : > { %6442 = vst [vmem:[#allocation56_spill] sm:$0xff] %v4930_v27  ;;  %v1411_v52 = vmul.f32 0.0125, %v1403_v36  ;;  %v4937_v39 = vmul.f32 0.5213636, %v6443_v63  ;;  %v1235_v41 = vmul.f32 %v1225_v33, %v4928_v60  ;;  %v1466_v34 = vmul.f32 %v4934_v37, %v4737_v10 }
 0x106   : > { %v4940_v31 = vmul.f32 -2.6204457, %v1102_v12  ;;  %v1302_v15 = vpop.f32.mrf.mxu1  ;;  %v4945_v8 = vmul.f32 46.054836, %v1126_v47  ;;  %v4949_v26 = vadd.f32 -0.45, %v665_v0  ;;  %v1636_v12 = vmul.f32 %v4934_v37, %v4815_v13 }
 0x107   : > { %v1419_v20 = vmax.f32 %v1411_v52, 0.0  ;;  %v1377_v24 = vpop.f32.mrf.mxu2  ;;  %6444 = vst [vmem:[#allocation9_spill] sm:$0xff] %v4937_v39  ;;  %v4951_v63 = vadd.f32 -0.45, %v666_v32  ;;  %v4969_v33 = vmul.f32 %v4934_v37, %v4739_v6  ;;  %v631_v32 = vld [vmem:[%s4809_s28 + $0x20] sm:$0xff] }
 0x108   : > { %6445 = vst [vmem:[#allocation57_spill] sm:$0xff] %v4940_v31  ;;  %v1388_v35 = vmul.f32 %v1377_v24, %v4930_v27  ;;  %1926 = vmatpush.bf16.xpose.msra.mxu3 %v1908_v42  ;;  %v1243_v42 = vadd.f32 %v1235_v41, %v4937_v39  ;;  %v1312_v0 = vmul.f32 %v1302_v15, %v4940_v31  ;;  %v632_v41 = vld [vmem:[%s4809_s28 + $0x28] sm:$0xff] }
 0x109   : > { %v4943_v53 = vmin.f32 %v1419_v20, 1.0  ;;  %6446 = vst [vmem:[#allocation58_spill] sm:$0xff] %v4945_v8  ;;  %v4980_v39 = vmul.f32 %v4949_v26, %v4949_v26  ;;  %v941_v20 = vpop.permute.xlu0 %940 }
 0x10a   : > { %v1396_v3 = vadd.f32 %v1388_v35, %v1319_v16  ;;  %v1320_v15 = vadd.f32 %v1312_v0, %v1243_v42 }
 0x10b   : > { %v1467_v11 = vmul.f32 %v4943_v53, %v4813_v30  ;;  %v1637_v36 = vmul.f32 %v4943_v53, %v4848_v56  ;;  %v4961_v35 = vmul.f32 %v4943_v53, %v4845_v2 }
 0x10c   : > { %v1404_v52 = vsel %vm4821_vm6, %v1396_v3, 0.0 }
 0x10d   : > { %v1472_v47 = vpack.c.bf16 %v1467_v11, %v1466_v34  ;;  %v1642_v16 = vpack.c.bf16 %v1637_v36, %v1636_v12  ;;  %v1412_v24 = vmul.f32 0.0125, %v1404_v52  ;;  %v4984_v34 = vmul.f32 %v4951_v63, %v4951_v63  ;;  %v6447_v11 = vld [vmem:[#allocation24_spill] sm:$0xff] }
 0x10e   : > { %3822 = vmatmul.msk.bf16.gmra.mxu2 %vm893_vm0, %v6447_v11  ;;  %v639_v12 = vmul.f32 %v4859_v62, %v631_v32  ;;  %v705_v52 = vpack.c.bf16 %v4980_v39, %v4980_v39 }
 0x10f   : > { %v1379_v19 = vpop.f32.mrf.mxu2  ;;  %v1420_v42 = vmax.f32 %v1412_v24, 0.0  ;;  %v630_v24 = vld [vmem:[%s4809_s28 + $0x18] sm:$0xff]  ;;  %v690_v54 = vmul.f32 %v4951_v63, %v4984_v34 }
 0x110   : > { %v1389_v3 = vmul.f32 %v1379_v19, %v4945_v8  ;;  %3818 = vmatmul.msk.bf16.gmra.mxu1 %vm893_vm0, %v6447_v11  ;;  %v640_v19 = vmul.f32 %v4859_v62, %v632_v41  ;;  %v647_v4 = vadd.f32 %v4904_v21, %v639_v12  ;;  %v629_v41 = vld [vmem:[%s4809_s28 + $0x10] sm:$0xff] }
 0x111   : > { %3799 = vmatmul.msk.bf16.gmra.mxu3 %vm893_vm0, %v1472_v47  ;;  %v706_v47 = vpack.c.bf16 %v4984_v34, %v4984_v34  ;;  %v5000_v32 = vmin.f32 %v1420_v42, 1.0  ;;  %v638_v42 = vmul.f32 %v4859_v62, %v630_v24  ;;  %v628_v24 = vld [vmem:[%s4809_s28 + $0x8] sm:$0xff] }
 0x112   : > { %3807 = vmatmul.msk.bf16.gmra.mxu0 %vm893_vm0, %v1642_v16  ;;  %v1397_v36 = vadd.f32 %v1389_v3, %v1320_v15  ;;  %v648_v56 = vadd.f32 %v4904_v21, %v640_v19  ;;  %v967_v3 = vsel %vm893_vm0, %v941_v20, 0.0  ;;  %v655_v2 = vmax.f32 %v647_v4, 0.0 }
 0x113   : > { %v2493_v49 = vunpack.c.l.b16 %v706_v47  ;;  %v637_v19 = vmul.f32 %v4859_v62, %v629_v41  ;;  %v943_v47 = vpop.permute.xlu2 %942  ;;  %v627_v41 = vld [vmem:[%s4809_s28] sm:$0xff]  ;;  %v646_v30 = vadd.f32 %v4904_v21, %v638_v42  ;;  %s6194_s28 = scalar_lea.vmem %s6267_s6, %s4121_s10 }
 0x114   : > { %v1405_v0 = vsel %vm4897_vm12, %v1397_v36, 0.0  ;;  %v2492_v36 = vunpack.c.l.b16 %v705_v52  ;;  %v656_v12 = vmax.f32 %v648_v56, 0.0  ;;  %v1638_v52 = vmul.f32 %v5000_v32, %v4930_v27 }
 0x115   : > { %v1413_v16 = vmul.f32 0.0125, %v1405_v0  ;;  %v6448_v0 = vld [vmem:[#allocation13_spill] sm:$0xff]  ;;  %v645_v13 = vadd.f32 %v4904_v21, %v637_v19  ;;  %v636_v19 = vmul.f32 %v4859_v62, %v628_v24 }
 0x116   : > { %v5019_v56 = vpack.c.b16 %v2493_v49, %v2492_v36  ;;  %v698_v49 = vpack.c.bf16 %v4951_v63, %v4951_v63  ;;  %v663_v36 = vmin.f32 %v655_v2, 0.9  ;;  %v970_v2 = vsel %vm893_vm0, %v943_v47, 0.0 }
 0x117   : > { %v1421_v15 = vmax.f32 %v1413_v16, 0.0  ;;  %v1468_v16 = vmul.f32 %v5000_v32, %v4863_v50  ;;  %v664_v50 = vmin.f32 %v656_v12, 0.9  ;;  %v635_v12 = vmul.f32 %v4859_v62, %v627_v41  ;;  %v811_v41 = vld [vmem:[%s5043_s13 + $0x30] sm:$0xff]  ;;  %v812_v62 = vld [vmem:[%s5043_s13 + $0x38] sm:$0xff] }
 0x118   : > { %6449 = vst [vmem:[#allocation24_spill] sm:$0xff] %v5019_v56  ;;  %v654_v47 = vmax.f32 %v646_v30, 0.0 }
 0x119   : > { %v5005_v58 = vmin.f32 %v1421_v15, 1.0  ;;  %v697_v15 = vpack.c.bf16 %v4949_v26, %v4949_v26  ;;  %v643_v24 = vadd.f32 %v4904_v21, %v635_v12 }
 0x11b   : > { %v1469_v20 = vmul.f32 %v5005_v58, %v4928_v60  ;;  %v1639_v4 = vmul.f32 %v5005_v58, %v4945_v8  ;;  %v5031_v27 = vmul.f32 %v5005_v58, %v4940_v31  ;;  %v651_v12 = vmax.f32 %v643_v24, 0.0  ;;  %v810_v24 = vld [vmem:[%s5043_s13 + $0x28] sm:$0xff] }
 0x11d   : > { %2192 = vrot.lane.b32.xlu1 %v6448_v0, %s4040_s11  ;;  %v5027_v0 = vmul.f32 %v5000_v32, %v4909_v48  ;;  %v1473_v60 = vpack.c.bf16 %v1469_v20, %v1468_v16  ;;  %v1643_v8 = vpack.c.bf16 %v1639_v4, %v1638_v52  ;;  %v6450_v16 = vld [vmem:[#allocation16_spill] sm:$0xff]  ;;  %v2415_v20 = vunpack.c.l.b16 %v697_v15  ;;  %v5064_v15 = vld [vmem:[%s6261_s0 + $0x4] ss:$0 sm:$0xff] }
 0x11e   : > { %968 = vadd.xlane.f32.xlu0 %v967_v3  ;;  %v949_v3 = vpop.permute.xlu1 %948  ;;  %3823 = vmatmul.msk.bf16.gmra.mxu2 %vm893_vm0, %v6450_v16  ;;  %v3763_v52 = vadd.f32 -0.45, %v663_v36  ;;  %v653_v4 = vmax.f32 %v645_v13, 0.0  ;;  %v819_v36 = vmul.f32 %v5064_v15, %v811_v41  ;;  %v659_v29 = vmin.f32 %v651_v12, 0.9 }
 0x11f   : > { %v979_v42 = vsel %vm893_vm0, %v949_v3, 0.0  ;;  %v644_v3 = vadd.f32 %v4904_v21, %v636_v19  ;;  %v5073_v21 = vld [vmem:[%s6261_s0 + $0x5] ss:$0 sm:$0xff] }
 0x120   : > { %3819 = vmatmul.msk.bf16.gmra.mxu1 %vm893_vm0, %v6450_v16  ;;  %v827_v19 = vadd.f32 %v5073_v21, %v819_v36 }
 0x121   : > { %3800 = vmatmul.msk.bf16.gmra.mxu3 %vm893_vm0, %v1473_v60  ;;  %v2416_v60 = vunpack.c.l.b16 %v698_v49  ;;  %v820_v49 = vmul.f32 %v5064_v15, %v812_v62  ;;  %v652_v48 = vmax.f32 %v644_v3, 0.0 }
 0x122   : > { %3808 = vmatmul.msk.bf16.gmra.mxu0 %vm893_vm0, %v1643_v8  ;;  %v3764_v8 = vadd.f32 -0.45, %v664_v50  ;;  %v661_v50 = vmin.f32 %v653_v4, 0.9  ;;  %v5079_v4 = vmul.f32 %v3763_v52, %v3763_v52  ;;  %v835_v23 = vmax.f32 %v827_v19, 0.0 }
 0x123   : > { %v5068_v13 = vpack.c.b16 %v2416_v60, %v2415_v20  ;;  %v828_v31 = vadd.f32 %v5073_v21, %v820_v49  ;;  %v660_v6 = vmin.f32 %v652_v48, 0.9  ;;  %v5095_v48 = vadd.f32 -0.45, %v659_v29 }
 0x124   : > { %v696_v30 = vpack.c.bf16 %v3764_v8, %v3764_v8  ;;  %v3761_v60 = vadd.f32 -0.45, %v661_v50  ;;  %v5083_v3 = vmul.f32 %v3764_v8, %v3764_v8  ;;  %v687_v50 = vmul.f32 %v3763_v52, %v5079_v4 }
 0x125   : > { %971 = vadd.xlane.f32.xlu2 %v970_v2  ;;  %3054 = vrot.lane.b32.xlu1 %v5019_v56, %s4040_s11  ;;  %v695_v2 = vpack.c.bf16 %v3763_v52, %v3763_v52  ;;  %v836_v10 = vmax.f32 %v828_v31, 0.0  ;;  %v5097_v31 = vadd.f32 -0.45, %v660_v6  ;;  %v843_v19 = vmin.f32 %v835_v23, 0.9 }
 0x126   : > { %980 = vadd.xlane.f32.xlu0 %v979_v42  ;;  %v662_v42 = vmin.f32 %v654_v47, 0.9  ;;  %v2414_v20 = vunpack.c.l.b16 %v696_v30  ;;  %v809_v47 = vld [vmem:[%s5043_s13 + $0x20] sm:$0xff]  ;;  %v693_v7 = vpack.c.bf16 %v3761_v60, %v3761_v60  ;;  %v688_v12 = vmul.f32 %v3764_v8, %v5083_v3  ;;  %v807_v8 = vld [vmem:[%s5043_s13 + $0x10] sm:$0xff] }
 0x127   : > { %v2413_v41 = vunpack.c.l.b16 %v695_v2  ;;  %v817_v36 = vmul.f32 %v5064_v15, %v809_v47  ;;  %v818_v2 = vmul.f32 %v5064_v15, %v810_v24  ;;  %v6452_v47 = vld [vmem:[#allocation28_spill] sm:$0xff]  ;;  %v711_v6 = vpack.c.bf16 %v687_v50, %v687_v50 }
 0x128   : > { %v3762_v62 = vadd.f32 -0.45, %v662_v42  ;;  %v6451_v42 = vpack.c.bf16 %v4764_v28, %v4772_v18  ;;  %v2411_v29 = vunpack.c.l.b16 %v693_v7  ;;  %v712_v18 = vpack.c.bf16 %v688_v12, %v688_v12 }
 0x129   : > { %v5087_v49 = vpack.c.b16 %v2414_v20, %v2413_v41  ;;  %v844_v41 = vmin.f32 %v836_v10, 0.9  ;;  %v825_v52 = vadd.f32 %v5073_v21, %v817_v36  ;;  %v826_v20 = vadd.f32 %v5073_v21, %v818_v2 }
 0x12a   : > { %v694_v30 = vpack.c.bf16 %v3762_v62, %v3762_v62  ;;  %v691_v23 = vpack.c.bf16 %v5095_v48, %v5095_v48  ;;  %v692_v10 = vpack.c.bf16 %v5097_v31, %v5097_v31  ;;  %v5112_v24 = vmul.f32 %v3761_v60, %v3761_v60 }
 0x12b   : > { %v5114_v36 = vmul.f32 %v3762_v62, %v3762_v62  ;;  %v5116_v2 = vadd.f32 -0.45, %v843_v19  ;;  %v689_v7 = vmul.f32 %v4949_v26, %v4980_v39  ;;  %v833_v50 = vmax.f32 %v825_v52, 0.0 }
 0x12c   : > { %v2412_v28 = vunpack.c.l.b16 %v694_v30  ;;  %v5121_v30 = vadd.f32 -0.45, %v844_v41  ;;  %v834_v12 = vmax.f32 %v826_v20, 0.0  ;;  %v2567_v1 = vunpack.c.l.b16 %v711_v6  ;;  %v6454_v20 = vld [vmem:[#allocation17_spill] sm:$0xff] }
 0x12d   : > { %2989 = vrot.lane.b32.xlu1 %v5068_v13, %s4040_s11  ;;  %v815_v38 = vmul.f32 %v5064_v15, %v807_v8  ;;  %v2568_v19 = vunpack.c.l.b16 %v712_v18  ;;  %v2409_v5 = vunpack.c.l.b16 %v691_v23  ;;  %v2410_v44 = vunpack.c.l.b16 %v692_v10  ;;  %v805_v23 = vld [vmem:[%s5043_s13] sm:$0xff]  ;;  %v806_v10 = vld [vmem:[%s5043_s13 + $0x8] sm:$0xff] }
 0x12e   : > { %3824 = vmatmul.msk.bf16.gmra.mxu2 %vm893_vm0, %v6452_v47  ;;  %v5123_v25 = vpack.c.b16 %v2412_v28, %v2411_v29  ;;  %v685_v26 = vmul.f32 %v3761_v60, %v5112_v24  ;;  %v686_v41 = vmul.f32 %v3762_v62, %v5114_v36  ;;  %v5135_v52 = vmul.f32 %v5116_v2, %v5116_v2 }
 0x12f   : > { %v5139_v63 = vmul.f32 %v5121_v30, %v5121_v30  ;;  %v842_v34 = vmin.f32 %v834_v12, 0.9  ;;  %v823_v60 = vadd.f32 %v5073_v21, %v815_v38  ;;  %v5147_v29 = vpack.c.b16 %v2568_v19, %v2567_v1 }
 0x130   : > { %3820 = vmatmul.msk.bf16.gmra.mxu1 %vm893_vm0, %v6452_v47  ;;  %v5149_v28 = vpack.c.b16 %v2410_v44, %v2409_v5  ;;  %v713_v6 = vpack.c.bf16 %v689_v7, %v689_v7  ;;  %v714_v18 = vpack.c.bf16 %v690_v54, %v690_v54  ;;  %v709_v8 = vpack.c.bf16 %v685_v26, %v685_v26 }
 0x131   : > { %3801 = vmatmul.msk.bf16.vlgmr.msrb.gmra.mxu3 %vm893_vm0, %v6451_v42  ;;  %v808_v42 = vld [vmem:[%s5043_s13 + $0x18] sm:$0xff]  ;;  %v5157_v12 = vmul.f32 %v5095_v48, %v5095_v48  ;;  %v884_v38 = vpack.c.bf16 %v5139_v63, %v5139_v63  ;;  %v5163_v5 = vmul.f32 %v5097_v31, %v5097_v31  ;;  %v5167_v54 = vadd.f32 -0.45, %v842_v34 }
 0x132   : > { %v816_v39 = vmul.f32 %v5064_v15, %v808_v42  ;;  %v710_v42 = vpack.c.bf16 %v686_v41, %v686_v41  ;;  %v831_v1 = vmax.f32 %v823_v60, 0.0  ;;  %v813_v19 = vmul.f32 %v5064_v15, %v805_v23  ;;  %v6456_v41 = vld [vmem:[#allocation21_spill] sm:$0xff] }
 0x133   : > { %v6455_v26 = vpack.c.bf16 %v4883_v43, %v4891_v17  ;;  %v2570_v40 = vunpack.c.l.b16 %v714_v18  ;;  %v683_v60 = vmul.f32 %v5095_v48, %v5157_v12  ;;  %v5187_v17 = vmul.f32 %v5167_v54, %v5167_v54 }
 0x134   : > { %v824_v62 = vadd.f32 %v5073_v21, %v816_v39  ;;  %v814_v39 = vmul.f32 %v5064_v15, %v806_v10  ;;  %v2566_v56 = vunpack.c.l.b16 %v710_v42  ;;  %v684_v15 = vmul.f32 %v5097_v31, %v5163_v5 }
 0x135   : > { %2987 = vrot.lane.b32.xlu1 %v5087_v49, %s4040_s11  ;;  %v821_v18 = vadd.f32 %v5073_v21, %v813_v19  ;;  %v703_v10 = vpack.c.bf16 %v5079_v4, %v5079_v4 }
 0x136   : > { %v832_v7 = vmax.f32 %v824_v62, 0.0  ;;  %v2808_v62 = vunpack.c.l.b16 %v884_v38  ;;  %v822_v31 = vadd.f32 %v5073_v21, %v814_v39  ;;  %v882_v21 = vpack.c.bf16 %v5187_v17, %v5187_v17 }
 0x137   : > { %v829_v4 = vmax.f32 %v821_v18, 0.0  ;;  %v702_v18 = vpack.c.bf16 %v5114_v36, %v5114_v36  ;;  %v6457_v36 = vpack.c.bf16 %v4961_v35, %v4969_v33 }
 0x138   : > { %v840_v48 = vmin.f32 %v832_v7, 0.9  ;;  %v830_v19 = vmax.f32 %v822_v31, 0.0 }
 0x13a   : > { %2190 = vrot.lane.b32.xlu0 %v6453_v51, %s4040_s11  ;;  %v841_v51 = vmin.f32 %v833_v50, 0.9  ;;  %v883_v50 = vpack.c.bf16 %v5135_v52, %v5135_v52  ;;  %v5211_v7 = vadd.f32 -0.45, %v840_v48  ;;  %v701_v48 = vpack.c.bf16 %v5112_v24, %v5112_v24 }
 0x13c   : > { %v5165_v44 = vadd.f32 -0.45, %v841_v51  ;;  %v2565_v51 = vunpack.c.l.b16 %v709_v8  ;;  %v2807_v34 = vunpack.c.l.b16 %v883_v50  ;;  %v704_v8 = vpack.c.bf16 %v5083_v3, %v5083_v3 }
 0x13d   : > { %2188 = vrot.lane.b32.xlu2 %v6454_v20, %s4040_s11  ;;  %2985 = vrot.lane.b32.xlu1 %v5123_v25, %s4040_s11  ;;  %v2569_v20 = vunpack.c.l.b16 %v713_v6  ;;  %v839_v6 = vmin.f32 %v831_v1, 0.9  ;;  %v707_v50 = vpack.c.bf16 %v683_v60, %v683_v60  ;;  %v5225_v60 = vmul.f32 %v5211_v7, %v5211_v7 }
 0x13e   : > { %v5183_v43 = vmul.f32 %v5165_v44, %v5165_v44  ;;  %v5201_v42 = vpack.c.b16 %v2566_v56, %v2565_v51  ;;  %v5203_v38 = vpack.c.b16 %v2808_v62, %v2807_v34  ;;  %v2490_v56 = vunpack.c.l.b16 %v703_v10 }
 0x13f   : > { %v5195_v23 = vpack.c.b16 %v2570_v40, %v2569_v20  ;;  %v5209_v40 = vadd.f32 -0.45, %v839_v6  ;;  %v2491_v3 = vunpack.c.l.b16 %v704_v8  ;;  %v2563_v39 = vunpack.c.l.b16 %v707_v50 }
 0x140   : > { %v881_v1 = vpack.c.bf16 %v5183_v43, %v5183_v43  ;;  %v2806_v51 = vunpack.c.l.b16 %v882_v21  ;;  %v837_v62 = vmin.f32 %v829_v4, 0.9  ;;  %v875_v8 = vpack.c.bf16 %v5116_v2, %v5116_v2 }
 0x141   : > { %3802 = vmatmul.msk.bf16.gmra.mxu3 %vm893_vm0, %v6455_v26  ;;  %v708_v26 = vpack.c.bf16 %v684_v15, %v684_v15  ;;  %v5221_v34 = vmul.f32 %v5209_v40, %v5209_v40  ;;  %v838_v15 = vmin.f32 %v830_v19, 0.9  ;;  %v5227_v6 = vpack.c.b16 %v2491_v3, %v2490_v56 }
 0x142   : > { %2186 = vrot.lane.b32.xlu0 %v6456_v41, %s4040_s11  ;;  %v2805_v20 = vunpack.c.l.b16 %v881_v1  ;;  %v876_v50 = vpack.c.bf16 %v5121_v30, %v5121_v30  ;;  %v880_v1 = vpack.c.bf16 %v5225_v60, %v5225_v60  ;;  %v5245_v24 = vadd.f32 -0.45, %v837_v62 }
 0x143   : > { %v2564_v41 = vunpack.c.l.b16 %v708_v26  ;;  %v879_v26 = vpack.c.bf16 %v5221_v34, %v5221_v34  ;;  %v5247_v21 = vadd.f32 -0.45, %v838_v15  ;;  %v2488_v4 = vunpack.c.l.b16 %v701_v48 }
 0x144   : > { %v5235_v10 = vpack.c.b16 %v2806_v51, %v2805_v20  ;;  %v2489_v19 = vunpack.c.l.b16 %v702_v18  ;;  %v2722_v56 = vunpack.c.l.b16 %v875_v8  ;;  %v2723_v3 = vunpack.c.l.b16 %v876_v50 }
 0x145   : > { %3117 = vrot.lane.b32.xlu2 %v5147_v29, %s4040_s11  ;;  %2983 = vrot.lane.b32.xlu1 %v5149_v28, %s4040_s11  ;;  %v5233_v31 = vpack.c.b16 %v2564_v41, %v2563_v39  ;;  %v2803_v39 = vunpack.c.l.b16 %v879_v26  ;;  %v2804_v41 = vunpack.c.l.b16 %v880_v1  ;;  %v5261_v35 = vmul.f32 %v5245_v24, %v5245_v24 }
 0x146   : > { %v5265_v33 = vmul.f32 %v5247_v21, %v5247_v21  ;;  %v5267_v20 = vpack.c.b16 %v2489_v19, %v2488_v4  ;;  %v699_v51 = vpack.c.bf16 %v5157_v12, %v5157_v12  ;;  %v700_v62 = vpack.c.bf16 %v5163_v5, %v5163_v5 }
 0x147   : > { %v873_v15 = vpack.c.bf16 %v5165_v44, %v5165_v44  ;;  %v874_v48 = vpack.c.bf16 %v5167_v54, %v5167_v54  ;;  %v5277_v18 = vpack.c.b16 %v2723_v3, %v2722_v56  ;;  %v5279_v8 = vpack.c.b16 %v2804_v41, %v2803_v39 }
 0x148   : > { %v877_v50 = vpack.c.bf16 %v5261_v35, %v5261_v35  ;;  %v878_v26 = vpack.c.bf16 %v5265_v33, %v5265_v33  ;;  %v2486_v12 = vunpack.c.l.b16 %v699_v51  ;;  %v2487_v5 = vunpack.c.l.b16 %v700_v62 }
 0x149   : > { %v867_v1 = vmul.f32 %v5116_v2, %v5135_v52  ;;  %v2720_v4 = vunpack.c.l.b16 %v873_v15  ;;  %v2721_v19 = vunpack.c.l.b16 %v874_v48  ;;  %v872_v52 = vpack.c.bf16 %v5211_v7, %v5211_v7 }
 0x14a   : > { %3119 = vrot.lane.b32.xlu0 %v5195_v23, %s4040_s11  ;;  %v2801_v56 = vunpack.c.l.b16 %v877_v50  ;;  %v2802_v3 = vunpack.c.l.b16 %v878_v26  ;;  %v5295_v39 = vpack.c.b16 %v2487_v5, %v2486_v12  ;;  %v865_v50 = vmul.f32 %v5165_v44, %v5183_v43 }
 0x14b   : > { %v891_v41 = vpack.c.bf16 %v867_v1, %v867_v1  ;;  %v5297_v62 = vpack.c.b16 %v2721_v19, %v2720_v4  ;;  %v866_v26 = vmul.f32 %v5167_v54, %v5187_v17  ;;  %v869_v44 = vpack.c.bf16 %v5245_v24, %v5245_v24 }
 0x14c   : > { %v5299_v2 = vpack.c.b16 %v2802_v3, %v2801_v56  ;;  %v889_v5 = vpack.c.bf16 %v865_v50, %v865_v50  ;;  %v870_v54 = vpack.c.bf16 %v5247_v21, %v5247_v21  ;;  %v863_v43 = vmul.f32 %v5209_v40, %v5221_v34 }
 0x14d   : > { %3115 = vrot.lane.b32.xlu2 %v5201_v42, %s4040_s11  ;;  %3333 = vrot.lane.b32.xlu1 %v5203_v38, %s4040_s11  ;;  %v2892_v15 = vunpack.c.l.b16 %v891_v41  ;;  %v890_v1 = vpack.c.bf16 %v866_v26, %v866_v26  ;;  %v864_v19 = vmul.f32 %v5211_v7, %v5225_v60  ;;  %v2716_v56 = vunpack.c.l.b16 %v869_v44  ;;  %v5373_v44 = vpop.xlane.xlu2 %962 }
 0x14e   : > { %v2890_v17 = vunpack.c.l.b16 %v889_v5  ;;  %v2717_v3 = vunpack.c.l.b16 %v870_v54  ;;  %v887_v41 = vpack.c.bf16 %v863_v43, %v863_v43  ;;  %v861_v60 = vmul.f32 %v5245_v24, %v5261_v35 }
 0x14f   : > { %v2891_v4 = vunpack.c.l.b16 %v890_v1  ;;  %v2428_v24 = vsel %vm893_vm0, %v5087_v49, 0  ;;  %v2425_v49 = vsel %vm893_vm0, %v5123_v25, 0  ;;  %v2422_v43 = vsel %vm893_vm0, %v5149_v28, 0 }
 0x150   : > { %v2888_v34 = vunpack.c.l.b16 %v887_v41  ;;  %v885_v26 = vpack.c.bf16 %v861_v60, %v861_v60  ;;  %v1433_v41 = vsel %vm893_vm0, %v4734_v55, 0.0  ;;  %v1430_v55 = vsel %vm893_vm0, %v4712_v61, 0.0 }
 0x151   : > { %3803 = vmatmul.msk.bf16.gmra.mxu3 %vm893_vm0, %v6457_v36  ;;  %v868_v36 = vmul.f32 %v5121_v30, %v5139_v63  ;;  %v871_v30 = vpack.c.bf16 %v5209_v40, %v5209_v40  ;;  %v6458_v63 = vpack.c.bf16 %v5031_v27, %v5027_v0  ;;  %v2719_v0 = vunpack.c.l.b16 %v872_v52  ;;  %v2045_v52 = vpop.permute.xlu1 %2044 }
 0x152   : > { %3052 = vrot.lane.b32.xlu0 %v5227_v6, %s4040_s11  ;;  %2069 = vmatpush.bf16.msra.mxu0 %v2045_v52  ;;  %v5337_v40 = vpack.c.b16 %v2717_v3, %v2716_v56  ;;  %v1442_v52 = vsel %vm893_vm0, %v4934_v37, 0.0  ;;  %v1451_v60 = vsel %vm893_vm0, %v5005_v58, 0.0  ;;  %v6466_v37 = vld [vmem:[#allocation2_spill] sm:$0xff]  ;;  %v1448_v58 = vsel %vm893_vm0, %v5000_v32, 0.0 }
 0x153   : > { %v892_v51 = vpack.c.bf16 %v868_v36, %v868_v36  ;;  %v2718_v27 = vunpack.c.l.b16 %v871_v30  ;;  %v888_v30 = vpack.c.bf16 %v864_v19, %v864_v19  ;;  %v5392_v56 = vpop.xlane.xlu0 %959 }
 0x155   : > { %3113 = vrot.lane.b32.xlu2 %v5233_v31, %s4040_s11  ;;  %3331 = vrot.lane.b32.xlu1 %v5235_v10, %s4040_s11  ;;  %v2893_v48 = vunpack.c.l.b16 %v892_v51  ;;  %v5321_v36 = vpack.c.b16 %v2719_v0, %v2718_v27  ;;  %v5335_v51 = vpack.c.b16 %v2891_v4, %v2890_v17  ;;  %v2889_v7 = vunpack.c.l.b16 %v888_v30  ;;  %v2116_v25 = vpop.permute.xlu2 %2115 }
 0x156   : > { %v1436_v4 = vsel %vm893_vm0, %v4836_v59, 0.0 }
 0x157   : > { %v5319_v12 = vpack.c.b16 %v2893_v48, %v2892_v15  ;;  %v2431_v15 = vsel %vm893_vm0, %v5068_v13, 0  ;;  %v5353_v50 = vpack.c.b16 %v2889_v7, %v2888_v34 }
 0x158   : > { %2437 = vmatpush.bf16.xpose.msrb.mxu3 %v2431_v15 }
 0x159   : > { %v2043_v0 = vpop.permute.xlu1 %2042 }
 0x15a   : > { %3050 = vrot.lane.b32.xlu0 %v5267_v20, %s4040_s11  ;;  %2070 = vmatpush.bf16.msra.mxu0 %v2043_v0 }
 0x15d   : > { %3260 = vrot.lane.b32.xlu2 %v5277_v18, %s4040_s11  ;;  %3329 = vrot.lane.b32.xlu1 %v5279_v8, %s4040_s11  ;;  %v2041_v59 = vpop.permute.xlu2 %2040 }
 0x15e   : > { %2071 = vmatpush.bf16.msra.mxu0 %v2041_v59 }
 0x160   : > { %2438 = vmatpush.bf16.xpose.msrb.mxu3 %v2428_v24 }
 0x161   : > { %3804 = vmatmul.msk.bf16.gmra.mxu3 %vm893_vm0, %v6458_v63  ;;  %v862_v63 = vmul.f32 %v5247_v21, %v5265_v33  ;;  %v2886_v21 = vunpack.c.l.b16 %v885_v26  ;;  %v5363_v5 = vpop.xlane.xlu1 %965 }
 0x162   : > { %3048 = vrot.lane.b32.xlu0 %v5295_v39, %s4040_s11 }
 0x163   : > { %v886_v27 = vpack.c.bf16 %v862_v63, %v862_v63 }
 0x165   : > { %3258 = vrot.lane.b32.xlu2 %v5297_v62, %s4040_s11  ;;  %3327 = vrot.lane.b32.xlu1 %v5299_v2, %s4040_s11  ;;  %v2887_v13 = vunpack.c.l.b16 %v886_v27  ;;  %v1439_v27 = vsel %vm893_vm0, %v4850_v46, 0.0  ;;  %v6469_v46 = vld [vmem:[#allocation3_spill] sm:$0xff] }
 0x167   : > { %v5361_v33 = vpack.c.b16 %v2887_v13, %v2886_v21 }
 0x168   : > { %2439 = vmatpush.bf16.xpose.msrb.mxu3 %v2425_v49 }
 0x169   : > { %v5375_v54 = vpop.xlane.xlu1 %974 }
 0x16a   : > { %3406 = vrot.lane.b32.xlu0 %v5319_v12, %s4040_s11 }
 0x16d   : > { %3256 = vrot.lane.b32.xlu2 %v5321_v36, %s4040_s11 }
 0x170   : > { %2440 = vmatpush.bf16.xpose.msrb.mxu3 %v2422_v43 }
 0x171   : > { %3825 = vmatmul.msk.bf16.vlgmr.msra.gmra.mxu3 %vm893_vm0, %v4558_v45 }
 0x172   : > { %3404 = vrot.lane.b32.xlu0 %v5335_v51, %s4040_s11  ;;  %v5349_v48 = vpop.f32.mrf.mxu3 }
 0x173   : > { %6459 = vst [vmem:[#allocation13_spill] sm:$0xff] %v5349_v48 }
 0x175   : > { %3254 = vrot.lane.b32.xlu2 %v5337_v40, %s4040_s11 }
 0x177   : > { %v5384_v19 = vpop.xlane.xlu1 %977 }
 0x178   : > { %2833 = vmatpush.bf16.msra.mxu3 %v5203_v38  ;;  %v1445_v38 = vsel %vm893_vm0, %v4943_v53, 0.0  ;;  %v2114_v53 = vpop.permute.xlu2 %2113 }
 0x17a   : > { %3402 = vrot.lane.b32.xlu0 %v5353_v50, %s4040_s11  ;;  %v5359_v35 = vpop.f32.mrf.mxu3 }
 0x17b   : > { %6460 = vst [vmem:[#allocation16_spill] sm:$0xff] %v5359_v35 }
 0x17c   : > { %2834 = vmatpush.bf16.msra.mxu3 %v5235_v10 }
 0x180   : > { %2835 = vmatpush.bf16.msra.mxu3 %v5279_v8  ;;  %v2118_v8 = vpop.permute.xlu0 %2117 }
 0x181   : > { %3826 = vmatmul.msk.bf16.gmra.mxu3 %vm893_vm0, %v6447_v11  ;;  %2142 = vmatpush.bf16.msra.mxu1 %v2118_v8 }
 0x182   : > { %3400 = vrot.lane.b32.xlu0 %v5361_v33, %s4040_s11 }
 0x184   : > { %v5371_v1 = vpop.f32.mrf.mxu3  ;;  %2836 = vmatpush.bf16.msra.mxu3 %v5299_v2 }
 0x185   : > { %2143 = vmatpush.bf16.msra.mxu1 %v2116_v25 }
 0x189   : > { %2144 = vmatpush.bf16.msra.mxu1 %v2114_v53 }
 0x18c   : > { %v5380_v17 = vpop.f32.mrf.mxu3 }
 0x18d   : > { %6461 = vst [vmem:[#allocation15_spill] sm:$0xff] %v5380_v17 }
 0x18f   : > { %1437 = vadd.xlane.f32.xlu1 %v1436_v4  ;;  %v2193_v3 = vpop.permute.xlu1 %2192 }
 0x190   : > { %2214 = vmatpush.bf16.msra.mxu2 %v2193_v3 }
 0x191   : > { %3827 = vmatmul.msk.bf16.gmra.mxu3 %vm893_vm0, %v6450_v16  ;;  %v5407_v2 = vpop.xlane.xlu0 %968 }
 0x192   : > { %v5505_v48 = vmul.f32 0.5213636, %v5407_v2 }
 0x194   : > { %v5390_v28 = vpop.f32.mrf.mxu3 }
 0x195   : > { %6462 = vst [vmem:[#allocation17_spill] sm:$0xff] %v5390_v28 }
 0x197   : > { %1446 = vadd.xlane.f32.xlu1 %v1445_v38  ;;  %v5409_v34 = vpop.permute.xlu1 %3054 }
 0x198   : > { %v5419_v15 = vpop.xlane.xlu2 %971 }
 0x199   : > { %v5417_v63 = vpop.xlane.xlu0 %980 }
 0x19c   : > { %v5397_v10 = vpop.f32.mrf.mxu3 }
 0x19d   : > { %6463 = vst [vmem:[#allocation21_spill] sm:$0xff] %v5397_v10  ;;  %v6479_v10 = vld [vmem:[#allocation24_spill] sm:$0xff] }
 0x19e   : > { %1434 = vadd.xlane.f32.xlu2 %v1433_v41  ;;  %v6471_v41 = vld [vmem:[#allocation5_spill] sm:$0xff] }
 0x19f   : > { %v5423_v26 = vpop.permute.xlu1 %2989 }
 0x1a0   : > { %v2189_v24 = vpop.permute.xlu2 %2188 }
 0x1a1   : > { %3828 = vmatmul.msk.bf16.gmra.mxu3 %vm893_vm0, %v6452_v47 }
 0x1a4   : > { %v5403_v30 = vpop.f32.mrf.mxu3 }
 0x1a5   : > { %6464 = vst [vmem:[#allocation59_spill] sm:$0xff] %v5403_v30  ;;  %v5478_v30 = vmul.f32 0.5213636, %v5373_v44 }
 0x1a6   : > { %1443 = vadd.xlane.f32.xlu2 %v1442_v52 }
 0x1a7   : > { %v5431_v21 = vpop.permute.xlu1 %2987  ;;  %6478 = vst [vmem:[#allocation65_spill] sm:$0xff] %v5478_v30 }
 0x1a8   : > { %v3118_v38 = vpop.permute.xlu2 %3117 }
 0x1ac   : > { %1431 = vadd.xlane.f32.xlu0 %v1430_v55  ;;  %v5413_v7 = vpop.f32.mrf.mxu3  ;;  %v2191_v0 = vpop.permute.xlu0 %2190 }
 0x1ad   : > { %6465 = vst [vmem:[#allocation60_spill] sm:$0xff] %v5413_v7  ;;  %2215 = vmatpush.bf16.msra.mxu2 %v2191_v0  ;;  %v1863_v0 = vpop.f32.mrf.mxu2 }
 0x1ae   : > { %1452 = vadd.xlane.f32.xlu2 %v1451_v60  ;;  %v1798_v60 = vpop.f32.mrf.mxu1 }
 0x1af   : > { %v5441_v25 = vpop.permute.xlu1 %2985 }
 0x1b1   : > { %3849 = vmatmul.msk.bf16.vlgmr.msrb.gmra.mxu3 %vm893_vm0, %v6466_v37  ;;  %2216 = vmatpush.bf16.msra.mxu2 %v2189_v24 }
 0x1b4   : > { %1440 = vadd.xlane.f32.xlu0 %v1439_v27  ;;  %v5427_v61 = vpop.f32.mrf.mxu3  ;;  %v2187_v49 = vpop.permute.xlu0 %2186  ;;  %v6474_v27 = vld [vmem:[#allocation4_spill] sm:$0xff] }
 0x1b5   : > { %6467 = vst [vmem:[#allocation2_spill] sm:$0xff] %v5427_v61  ;;  %2217 = vmatpush.bf16.msra.mxu2 %v2187_v49 }
 0x1b6   : > { %v1800_v49 = vpop.f32.mrf.mxu1 }
 0x1b7   : > { %v5449_v3 = vpop.permute.xlu1 %2983 }
 0x1b9   : > { %2748 = vmatpush.bf16.msrb.mxu2 %v5277_v18  ;;  %v3128_v18 = vsel %vm893_vm0, %v3118_v38, 0  ;;  %v1818_v38 = vmul.f32 %v1798_v60, %v4527_v14 }
 0x1bc   : > { %1449 = vadd.xlane.f32.xlu0 %v1448_v58  ;;  %v5433_v13 = vpop.f32.mrf.mxu3  ;;  %v3120_v4 = vpop.permute.xlu0 %3119 }
 0x1bd   : > { %6468 = vst [vmem:[#allocation61_spill] sm:$0xff] %v5433_v13  ;;  %2749 = vmatpush.bf16.msrb.mxu2 %v5297_v62  ;;  %v3131_v32 = vsel %vm893_vm0, %v3120_v4, 0  ;;  %v3116_v62 = vpop.permute.xlu2 %3115  ;;  %v1865_v4 = vpop.f32.mrf.mxu2  ;;  %v6484_v13 = vld [vmem:[#allocation30_spill] sm:$0xff] }
 0x1be   : > { %3137 = vmatpush.bf16.xpose.msrb.mxu3 %v3131_v32  ;;  %v3125_v8 = vsel %vm893_vm0, %v3116_v62, 0 }
 0x1c1   : > { %3850 = vmatmul.msk.bf16.gmra.mxu3 %vm893_vm0, %v6469_v46  ;;  %2750 = vmatpush.bf16.msrb.mxu2 %v5321_v36  ;;  %v5456_v36 = vpop.permute.xlu1 %3333 }
 0x1c4   : > { %v5439_v43 = vpop.f32.mrf.mxu3 }
 0x1c5   : > { %2751 = vmatpush.bf16.msrb.mxu2 %v5337_v40  ;;  %v3114_v52 = vpop.permute.xlu2 %3113  ;;  %v1868_v60 = vpop.f32.mrf.mxu2 }
 0x1c6   : > { %3138 = vmatpush.bf16.xpose.msrb.mxu3 %v3128_v18  ;;  %v3122_v40 = vsel %vm893_vm0, %v3114_v52, 0  ;;  %v5471_v18 = vmul.f32 0.5213636, %v5392_v56  ;;  %v2508_v56 = vsel %vm893_vm0, %v6479_v10, 0  ;;  %v5493_v10 = vmul.f32 0.5213636, %v5363_v5 }
 0x1c7   : > { %2514 = vmatpush.bf16.xpose.msrb.mxu0 %v2508_v56 }
 0x1c8   : > { %6477 = vst [vmem:[#allocation64_spill] sm:$0xff] %v5471_v18  ;;  %v1826_v52 = vadd.f32 %v1818_v38, %v5471_v18  ;;  %v6480_v38 = vld [vmem:[#allocation27_spill] sm:$0xff] }
 0x1c9   : > { %v5463_v24 = vpop.permute.xlu1 %3331  ;;  %v1884_v18 = vmul.f32 %v1865_v4, %v6480_v38  ;;  %6482 = vst [vmem:[#allocation24_spill] sm:$0xff] %v5493_v10 }
 0x1ca   : > { %6488 = vst [vmem:[#allocation27_spill] sm:$0xff] %v5505_v48 }
 0x1cc   : > { %v5447_v59 = vpop.f32.mrf.mxu3 }
 0x1cd   : > { %6470 = vst [vmem:[#allocation3_spill] sm:$0xff] %v5447_v59 }
 0x1ce   : > { %3139 = vmatpush.bf16.xpose.msrb.mxu3 %v3125_v8  ;;  %v1883_v8 = vmul.f32 %v1863_v0, %v4554_v9 }
 0x1d1   : > { %3851 = vmatmul.msk.bf16.gmra.mxu3 %vm893_vm0, %v6471_v41  ;;  %v5473_v62 = vpop.permute.xlu1 %3329 }
 0x1d4   : > { %v5454_v53 = vpop.f32.mrf.mxu3 }
 0x1d5   : > { %6472 = vst [vmem:[#allocation5_spill] sm:$0xff] %v5454_v53  ;;  %v2585_v53 = vsel %vm893_vm0, %v5195_v23, 0 }
 0x1d6   : > { %3140 = vmatpush.bf16.xpose.msrb.mxu3 %v3122_v40  ;;  %v1803_v40 = vpop.f32.mrf.mxu1  ;;  %2591 = vmatpush.bf16.xpose.msrb.mxu1 %v2585_v53 }
 0x1d9   : > { %v5486_v28 = vpop.permute.xlu1 %3327 }
 0x1dc   : > { %v5459_v55 = vpop.f32.mrf.mxu3 }
 0x1dd   : > { %6473 = vst [vmem:[#allocation62_spill] sm:$0xff] %v5459_v55  ;;  %v1891_v55 = vadd.f32 %v1883_v8, %v1826_v52 }
 0x1de   : > { %v1805_v52 = vpop.f32.mrf.mxu1 }
 0x1e1   : > { %3852 = vmatmul.msk.bf16.gmra.mxu3 %vm893_vm0, %v6474_v27 }
 0x1e4   : > { %v5465_v58 = vpop.f32.mrf.mxu3 }
 0x1e5   : > { %6475 = vst [vmem:[#allocation4_spill] sm:$0xff] %v5465_v58  ;;  %v1819_v58 = vmul.f32 %v1800_v49, %v4599_v22 }
 0x1e7   : > { %v1827_v44 = vadd.f32 %v1819_v58, %v5478_v30  ;;  %v1870_v58 = vpop.f32.mrf.mxu2  ;;  %v2505_v30 = vsel %vm893_vm0, %v5227_v6, 0 }
 0x1e8   : > { %2515 = vmatpush.bf16.xpose.msrb.mxu0 %v2505_v30  ;;  %v3053_v30 = vpop.permute.xlu0 %3052 }
 0x1e9   : > { %v1892_v23 = vadd.f32 %v1884_v18, %v1827_v44 }
 0x1ec   : > { %v5467_v32 = vpop.f32.mrf.mxu3 }
 0x1ed   : > { %6476 = vst [vmem:[#allocation63_spill] sm:$0xff] %v5467_v32 }
 0x1f4   : > { %v1928_v7 = vpop.f32.mrf.mxu3 }
 0x1f5   : > { %v1948_v32 = vmul.f32 %v1928_v7, %v4601_v57 }
 0x1f7   : > { %v1956_v0 = vadd.f32 %v1948_v32, %v1891_v55  ;;  %v6483_v55 = vld [vmem:[#allocation31_spill] sm:$0xff] }
 0x1f8   : > { %v1820_v32 = vmul.f32 %v1803_v40, %v6483_v55 }
 0x1f9   : > { %v1964_v8 = vsel %vm4493_vm5, %v1956_v0, 0.0  ;;  %v6485_v0 = vld [vmem:[#allocation33_spill] sm:$0xff] }
 0x1fa   : > { %v1972_v7 = vmul.f32 0.0125, %v1964_v8  ;;  %v1828_v49 = vadd.f32 %v1820_v32, %v5493_v10  ;;  %v1885_v8 = vmul.f32 %v1868_v60, %v6485_v0  ;;  %v6489_v32 = vld [vmem:[#allocation37_spill] sm:$0xff]  ;;  %v1808_v60 = vpop.f32.mrf.mxu1 }
 0x1fc   : > { %v1980_v59 = vmax.f32 %v1972_v7, 0.0  ;;  %v1930_v17 = vpop.f32.mrf.mxu3 }
 0x1fd   : > { %v1949_v56 = vmul.f32 %v1930_v17, %v6484_v13 }
 0x1fe   : > { %v1988_v53 = vmin.f32 %v1980_v59, 1.0  ;;  %v1893_v59 = vadd.f32 %v1885_v8, %v1828_v49 }
 0x1ff   : > { %v1957_v35 = vadd.f32 %v1949_v56, %v1892_v23  ;;  %v6487_v23 = vld [vmem:[#allocation34_spill] sm:$0xff] }
 0x200   : > { %v1996_v4 = vsel %vm893_vm0, %v1988_v53, 0.0  ;;  %v1821_v56 = vmul.f32 %v1805_v52, %v6487_v23  ;;  %v2028_v52 = vmul.f32 %v1988_v53, %v4527_v14  ;;  %v2101_v2 = vmul.f32 %v1988_v53, %v4554_v9 }
 0x201   : > { %v1965_v7 = vsel %vm4541_vm9, %v1957_v35, 0.0  ;;  %1997 = vadd.xlane.f32.xlu1 %v1996_v4 }
 0x202   : > { %v1438_v5 = vpop.xlane.xlu1 %1437  ;;  %v1973_v61 = vmul.f32 0.0125, %v1965_v7  ;;  %v1829_v6 = vadd.f32 %v1821_v56, %v5505_v48  ;;  %v5532_v56 = vmul.f32 0.5213636, %v5419_v15 }
 0x203   : > { %v1456_v18 = vmul.f32 0.5213636, %v1438_v5  ;;  %v2174_v5 = vmul.f32 %v1988_v53, %v4601_v57  ;;  %v6492_v57 = vld [vmem:[#allocation42_spill] sm:$0xff] }
 0x204   : > { %v1981_v44 = vmax.f32 %v1973_v61, 0.0  ;;  %v1933_v40 = vpop.f32.mrf.mxu3  ;;  %v2582_v61 = vsel %vm893_vm0, %v5147_v29, 0  ;;  %v1822_v53 = vmul.f32 %v1808_v60, %v6492_v57  ;;  %6493 = vst [vmem:[#allocation14_spill] sm:$0xff] %v5532_v56 }
 0x205   : > { %v1541_v17 = vadd.f32 %v5371_v1, %v1456_v18  ;;  %v1950_v10 = vmul.f32 %v1933_v40, %v6489_v32  ;;  %v6490_v1 = vld [vmem:[#allocation40_spill] sm:$0xff]  ;;  %2592 = vmatpush.bf16.xpose.msrb.mxu1 %v2582_v61  ;;  %v3066_v40 = vsel %vm893_vm0, %v5409_v34, 0 }
 0x206   : > { %v1989_v47 = vmin.f32 %v1981_v44, 1.0  ;;  %v1886_v4 = vmul.f32 %v1870_v58, %v6490_v1 }
 0x207   : > { %v5509_v35 = vadd.f32 %v5439_v43, %v1541_v17  ;;  %v1958_v49 = vadd.f32 %v1950_v10, %v1893_v59  ;;  %v1873_v10 = vpop.f32.mrf.mxu2 }
 0x208   : > { %v1999_v8 = vsel %vm893_vm0, %v1989_v47, 0.0  ;;  %v2029_v43 = vmul.f32 %v1989_v47, %v4599_v22  ;;  %v2102_v7 = vmul.f32 %v1989_v47, %v6480_v38  ;;  %v2175_v14 = vmul.f32 %v1989_v47, %v6484_v13  ;;  %v6494_v47 = vld [vmem:[#allocation41_spill] sm:$0xff] }
 0x209   : > { %v1966_v58 = vsel %vm4585_vm15, %v1958_v49, 0.0  ;;  %2000 = vadd.xlane.f32.xlu0 %v1999_v8  ;;  %v1894_v59 = vadd.f32 %v1886_v4, %v1829_v6 }
 0x20a   : > { %v1974_v18 = vmul.f32 0.0125, %v1966_v58  ;;  %v2036_v44 = vpack.c.bf16 %v2029_v43, %v2028_v52  ;;  %v2109_v9 = vpack.c.bf16 %v2102_v7, %v2101_v2  ;;  %v2182_v22 = vpack.c.bf16 %v2175_v14, %v2174_v5  ;;  %v1810_v52 = vpop.f32.mrf.mxu1  ;;  %v6495_v2 = vld [vmem:[#allocation43_spill] sm:$0xff]  ;;  %v6498_v14 = vld [vmem:[#allocation46_spill] sm:$0xff] }
 0x20b   : > { %v1887_v8 = vmul.f32 %v1873_v10, %v6495_v2  ;;  %v1830_v43 = vadd.f32 %v1822_v53, %v5532_v56  ;;  %v3063_v7 = vsel %vm893_vm0, %v3053_v30, 0  ;;  %v5543_v58 = vmul.f32 0.5213636, %v5375_v54 }
 0x20c   : > { %v1982_v17 = vmax.f32 %v1974_v18, 0.0  ;;  %v1935_v38 = vpop.f32.mrf.mxu3  ;;  %3829 = vmatmul.msk.bf16.vlgmr.msra.gmra.mxu0 %vm893_vm0, %v2036_v44  ;;  %3833 = vmatmul.msk.bf16.vlgmr.msra.gmra.mxu1 %vm893_vm0, %v2109_v9  ;;  %v1823_v18 = vmul.f32 %v1810_v52, %v6498_v14  ;;  %v6499_v9 = vld [vmem:[#allocation47_spill] sm:$0xff] }
 0x20d   : > { %v1951_v13 = vmul.f32 %v1935_v38, %v6494_v47  ;;  %3837 = vmatmul.msk.bf16.vlgmr.msra.gmra.mxu2 %vm893_vm0, %v2182_v22  ;;  %6497 = vst [vmem:[#allocation31_spill] sm:$0xff] %v5543_v58  ;;  %v1895_v44 = vadd.f32 %v1887_v8, %v1830_v43  ;;  %v2579_v38 = vsel %vm893_vm0, %v5201_v42, 0 }
 0x20e   : > { %v1990_v61 = vmin.f32 %v1982_v17, 1.0  ;;  %3072 = vmatpush.bf16.xpose.msra.mxu2 %v3066_v40  ;;  %v2502_v17 = vsel %vm893_vm0, %v5267_v20, 0  ;;  %2593 = vmatpush.bf16.xpose.msrb.mxu1 %v2579_v38  ;;  %v1831_v42 = vadd.f32 %v1823_v18, %v5543_v58  ;;  %v6504_v18 = vld [vmem:[#allocation51_spill] sm:$0xff] }
 0x20f   : > { %v1959_v34 = vadd.f32 %v1951_v13, %v1894_v59  ;;  %v1875_v6 = vpop.f32.mrf.mxu2  ;;  %2516 = vmatpush.bf16.xpose.msrb.mxu0 %v2502_v17  ;;  %v3051_v13 = vpop.permute.xlu0 %3050  ;;  %v3001_v17 = vsel %vm893_vm0, %v5423_v26, 0 }
 0x210   : > { %v2002_v49 = vsel %vm893_vm0, %v1990_v61, 0.0  ;;  %v2030_v22 = vmul.f32 %v1990_v61, %v6483_v55  ;;  %v2103_v59 = vmul.f32 %v1990_v61, %v6485_v0  ;;  %v2176_v54 = vmul.f32 %v1990_v61, %v6489_v32 }
 0x211   : > { %v1967_v4 = vsel %vm4618_vm2, %v1959_v34, 0.0  ;;  %2003 = vadd.xlane.f32.xlu2 %v2002_v49  ;;  %v6500_v49 = vld [vmem:[#allocation50_spill] sm:$0xff] }
 0x212   : > { %v1975_v15 = vmul.f32 0.0125, %v1967_v4  ;;  %v1813_v30 = vpop.f32.mrf.mxu1  ;;  %v1888_v8 = vmul.f32 %v1875_v6, %v6500_v49  ;;  %v6503_v6 = vld [vmem:[#allocation52_spill] sm:$0xff] }
 0x214   : > { %v1983_v5 = vmax.f32 %v1975_v15, 0.0  ;;  %v1938_v29 = vpop.f32.mrf.mxu3  ;;  %v3060_v15 = vsel %vm893_vm0, %v3051_v13, 0 }
 0x215   : > { %v1952_v10 = vmul.f32 %v1938_v29, %v6499_v9  ;;  %v1824_v29 = vmul.f32 %v1813_v30, %v6503_v6 }
 0x216   : > { %v1991_v40 = vmin.f32 %v1983_v5, 1.0  ;;  %3073 = vmatpush.bf16.xpose.msra.mxu2 %v3063_v7 }
 0x217   : > { %v1960_v53 = vadd.f32 %v1952_v10, %v1895_v44  ;;  %v1878_v7 = vpop.f32.mrf.mxu2  ;;  %v3049_v13 = vpop.permute.xlu0 %3048 }
 0x218   : > { %v2005_v34 = vsel %vm893_vm0, %v1991_v40, 0.0  ;;  %v2031_v55 = vmul.f32 %v1991_v40, %v6487_v23  ;;  %v2104_v52 = vmul.f32 %v1991_v40, %v6490_v1  ;;  %v2177_v20 = vmul.f32 %v1991_v40, %v6494_v47 }
 0x219   : > { %v1968_v0 = vsel %vm4674_vm8, %v1960_v53, 0.0  ;;  %2006 = vadd.xlane.f32.xlu1 %v2005_v34  ;;  %v5566_v1 = vmul.f32 0.5213636, %v5384_v19  ;;  %v1896_v47 = vadd.f32 %v1888_v8, %v1831_v42  ;;  %v6505_v53 = vld [vmem:[#allocation54_spill] sm:$0xff]  ;;  %v5585_v8 = vmul.f32 0.5213636, %v5417_v63 }
 0x21a   : > { %v1976_v32 = vmul.f32 0.0125, %v1968_v0  ;;  %v2037_v61 = vpack.c.bf16 %v2031_v55, %v2030_v22  ;;  %v2110_v60 = vpack.c.bf16 %v2104_v52, %v2103_v59  ;;  %v2183_v4 = vpack.c.bf16 %v2177_v20, %v2176_v54  ;;  %v1815_v30 = vpop.f32.mrf.mxu1  ;;  %v6508_v0 = vld [vmem:[#allocation55_spill] sm:$0xff] }
 0x21b   : > { %6502 = vst [vmem:[#allocation30_spill] sm:$0xff] %v5566_v1  ;;  %v1832_v38 = vadd.f32 %v1824_v29, %v5566_v1  ;;  %v1889_v19 = vmul.f32 %v1878_v7, %v6505_v53  ;;  %v2499_v55 = vsel %vm893_vm0, %v5295_v39, 0  ;;  %v2576_v52 = vsel %vm893_vm0, %v5233_v31, 0 }
 0x21c   : > { %v1984_v23 = vmax.f32 %v1976_v32, 0.0  ;;  %v1940_v5 = vpop.f32.mrf.mxu3  ;;  %3830 = vmatmul.msk.bf16.gmra.mxu0 %vm893_vm0, %v2037_v61  ;;  %3834 = vmatmul.msk.bf16.gmra.mxu1 %vm893_vm0, %v2110_v60  ;;  %v3057_v20 = vsel %vm893_vm0, %v3049_v13, 0  ;;  %6507 = vst [vmem:[#allocation33_spill] sm:$0xff] %v5585_v8  ;;  %v1825_v32 = vmul.f32 %v1815_v30, %v6508_v0  ;;  %v6509_v61 = vld [vmem:[#allocation56_spill] sm:$0xff]  ;;  %v2998_v29 = vsel %vm893_vm0, %v5431_v21, 0  ;;  %v6512_v21 = vld [vmem:[#allocation58_spill] sm:$0xff] }
 0x21d   : > { %v1953_v44 = vmul.f32 %v1940_v5, %v6504_v18  ;;  %3838 = vmatmul.msk.bf16.gmra.mxu2 %vm893_vm0, %v2183_v4  ;;  %2517 = vmatpush.bf16.xpose.msrb.mxu0 %v2499_v55  ;;  %v1897_v43 = vadd.f32 %v1889_v19, %v1832_v38 }
 0x21e   : > { %v1992_v10 = vmin.f32 %v1984_v23, 1.0  ;;  %3074 = vmatpush.bf16.xpose.msra.mxu2 %v3060_v15  ;;  %2594 = vmatpush.bf16.xpose.msrb.mxu1 %v2576_v52 }
 0x21f   : > { %v1961_v40 = vadd.f32 %v1953_v44, %v1896_v47  ;;  %v1880_v60 = vpop.f32.mrf.mxu2  ;;  %v1833_v44 = vadd.f32 %v1825_v32, %v5585_v8 }
 0x220   : > { %v2008_v22 = vsel %vm893_vm0, %v1992_v10, 0.0  ;;  %v2032_v15 = vmul.f32 %v1992_v10, %v6492_v57  ;;  %v2105_v7 = vmul.f32 %v1992_v10, %v6495_v2  ;;  %v2178_v23 = vmul.f32 %v1992_v10, %v6499_v9  ;;  %v6510_v57 = vld [vmem:[#allocation57_spill] sm:$0xff] }
 0x221   : > { %v1969_v54 = vsel %vm4751_vm13, %v1961_v40, 0.0  ;;  %2009 = vadd.xlane.f32.xlu0 %v2008_v22  ;;  %v1890_v40 = vmul.f32 %v1880_v60, %v6510_v57  ;;  %v3261_v60 = vpop.permute.xlu2 %3260 }
 0x222   : > { %v1977_v34 = vmul.f32 0.0125, %v1969_v54 }
 0x224   : > { %v1985_v26 = vmax.f32 %v1977_v34, 0.0  ;;  %v1943_v42 = vpop.f32.mrf.mxu3  ;;  %v2995_v34 = vsel %vm893_vm0, %v5441_v25, 0 }
 0x225   : > { %2918 = vmatpush.bf16.msra.mxu0 %v5319_v12  ;;  %v1954_v39 = vmul.f32 %v1943_v42, %v6509_v61 }
 0x226   : > { %3007 = vmatpush.bf16.xpose.msra.mxu1 %v3001_v17  ;;  %v1993_v4 = vmin.f32 %v1985_v26, 1.0  ;;  %3075 = vmatpush.bf16.xpose.msra.mxu2 %v3057_v20 }
 0x227   : > { %v1962_v31 = vadd.f32 %v1954_v39, %v1897_v43 }
 0x228   : > { %v2011_v12 = vsel %vm893_vm0, %v1993_v4, 0.0  ;;  %v2033_v63 = vmul.f32 %v1993_v4, %v6498_v14  ;;  %v2106_v5 = vmul.f32 %v1993_v4, %v6500_v49  ;;  %v2179_v47 = vmul.f32 %v1993_v4, %v6504_v18 }
 0x229   : > { %2919 = vmatpush.bf16.msra.mxu0 %v5335_v51  ;;  %v1970_v9 = vsel %vm4821_vm6, %v1962_v31, 0.0  ;;  %2012 = vadd.xlane.f32.xlu2 %v2011_v12  ;;  %v1898_v51 = vadd.f32 %v1890_v40, %v1833_v44  ;;  %v5641_v12 = vpop.permute.xlu0 %3406 }
 0x22a   : > { %v1978_v10 = vmul.f32 0.0125, %v1970_v9  ;;  %v2038_v22 = vpack.c.bf16 %v2033_v63, %v2032_v15  ;;  %v2111_v14 = vpack.c.bf16 %v2106_v5, %v2105_v7  ;;  %v2184_v17 = vpack.c.bf16 %v2179_v47, %v2178_v23  ;;  %v5623_v15 = vpop.f32.mrf.mxu0 }
 0x22c   : > { %v1986_v49 = vmax.f32 %v1978_v10, 0.0  ;;  %v1945_v38 = vpop.f32.mrf.mxu3  ;;  %3831 = vmatmul.msk.bf16.gmra.mxu0 %vm893_vm0, %v2038_v22  ;;  %3835 = vmatmul.msk.bf16.gmra.mxu1 %vm893_vm0, %v2111_v14 }
 0x22d   : > { %v1955_v18 = vmul.f32 %v1945_v38, %v6512_v21  ;;  %3839 = vmatmul.msk.bf16.gmra.mxu2 %vm893_vm0, %v2184_v17  ;;  %2920 = vmatpush.bf16.msra.mxu0 %v5353_v50 }
 0x22e   : > { %3008 = vmatpush.bf16.xpose.msra.mxu1 %v2998_v29  ;;  %v1994_v19 = vmin.f32 %v1986_v49, 1.0 }
 0x22f   : > { %v1963_v59 = vadd.f32 %v1955_v18, %v1898_v51 }
 0x230   : > { %v2014_v54 = vsel %vm893_vm0, %v1994_v19, 0.0  ;;  %v2034_v26 = vmul.f32 %v1994_v19, %v6503_v6  ;;  %v2107_v50 = vmul.f32 %v1994_v19, %v6505_v53  ;;  %v2180_v42 = vmul.f32 %v1994_v19, %v6509_v61  ;;  %v3259_v53 = vpop.permute.xlu2 %3258 }
 0x231   : > { %v1971_v30 = vsel %vm4897_vm12, %v1963_v59, 0.0  ;;  %2015 = vadd.xlane.f32.xlu1 %v2014_v54  ;;  %2921 = vmatpush.bf16.msra.mxu0 %v5361_v33  ;;  %v2992_v33 = vsel %vm893_vm0, %v5449_v3, 0 }
 0x232   : > { %v1979_v55 = vmul.f32 0.0125, %v1971_v30 }
 0x234   : > { %v1987_v52 = vmax.f32 %v1979_v55, 0.0  ;;  %v6525_v55 = vld [vmem:[#allocation7_spill] sm:$0xff] }
 0x236   : > { %3009 = vmatpush.bf16.xpose.msra.mxu1 %v2995_v34  ;;  %v1995_v20 = vmin.f32 %v1987_v52, 1.0  ;;  %v6526_v52 = vld [vmem:[#allocation6_spill] sm:$0xff] }
 0x238   : > { %v2017_v43 = vsel %vm893_vm0, %v1995_v20, 0.0  ;;  %v2035_v32 = vmul.f32 %v1995_v20, %v6508_v0  ;;  %v2108_v39 = vmul.f32 %v1995_v20, %v6510_v57  ;;  %v2181_v25 = vmul.f32 %v1995_v20, %v6512_v21  ;;  %v5628_v0 = vpop.f32.mrf.mxu0  ;;  %v3257_v3 = vpop.permute.xlu2 %3256 }
 0x239   : > { %2018 = vadd.xlane.f32.xlu0 %v2017_v43  ;;  %v5700_v20 = vadd.s32 %v6526_v52, %v6525_v55 }
 0x23a   : > { %v2039_v4 = vpack.c.bf16 %v2035_v32, %v2034_v26  ;;  %v2112_v31 = vpack.c.bf16 %v2108_v39, %v2107_v50  ;;  %v2185_v6 = vpack.c.bf16 %v2181_v25, %v2180_v42  ;;  %v6530_v32 = vld [vmem:[#allocation8_spill] sm:$0xff] }
 0x23b   : > { %v2280_v39 = vsub.s32 %v6530_v32, %v5700_v20  ;;  %vm2312_vm15 = vcmp.ge.s32.totalorder %v5700_v20, 0 }
 0x23c   : > { %3832 = vmatmul.msk.bf16.gmra.mxu0 %vm893_vm0, %v2039_v4  ;;  %3836 = vmatmul.msk.bf16.gmra.mxu1 %vm893_vm0, %v2112_v31 }
 0x23d   : > { %3840 = vmatmul.msk.bf16.gmra.mxu2 %vm893_vm0, %v2185_v6  ;;  %vm2288_vm3 = vcmp.ge.s32.totalorder %v2280_v39, 0  ;;  %vm2296_vm5 = vcmp.lt.s32.totalorder %v2280_v39, 16 }
 0x23e   : > { %3010 = vmatpush.bf16.xpose.msra.mxu1 %v2992_v33  ;;  %v2321_v33 = vcvt.s32.f32 %v2280_v39  ;;  %vm2304_vm9 = vmand %vm2288_vm3, %vm2296_vm5 }
 0x23f   : > { %vm5731_vm2 = vmand %vm2304_vm9, %vm2312_vm15 }
 0x240   : > { %v5635_v61 = vpop.f32.mrf.mxu0  ;;  %v3255_v7 = vpop.permute.xlu2 %3254 }
 0x248   : > { %v5639_v23 = vpop.f32.mrf.mxu0  ;;  %v5664_v5 = vpop.xlane.xlu2 %1434 }
 0x24c   : > { %3853 = vmatmul.msk.bf16.vlgmr.msrb.gmra.mxu0 %vm893_vm0, %v6466_v37  ;;  %3857 = vmatmul.msk.bf16.vlgmr.msrb.gmra.mxu1 %vm893_vm0, %v6466_v37 }
 0x24d   : > { %3282 = vmatpush.bf16.msrb.mxu0 %v3261_v60  ;;  %3355 = vmatpush.bf16.msrb.mxu1 %v5456_v36  ;;  %v5650_v36 = vpop.permute.xlu0 %3404 }
 0x250   : > { %v5648_v37 = vpop.f32.mrf.mxu0  ;;  %v5676_v29 = vpop.xlane.xlu2 %1443 }
 0x251   : > { %3283 = vmatpush.bf16.msrb.mxu0 %v3259_v53  ;;  %3356 = vmatpush.bf16.msrb.mxu1 %v5463_v24 }
 0x255   : > { %3284 = vmatpush.bf16.msrb.mxu0 %v3257_v3  ;;  %3357 = vmatpush.bf16.msrb.mxu1 %v5473_v62  ;;  %v5658_v62 = vpop.permute.xlu0 %3402  ;;  %v2329_v3 = vmul.f32 -0.1, %v2321_v33 }
 0x258   : > { %v5656_v24 = vpop.f32.mrf.mxu0 }
 0x259   : > { %3285 = vmatpush.bf16.msrb.mxu0 %v3255_v7  ;;  %3358 = vmatpush.bf16.msrb.mxu1 %v5486_v28  ;;  %6514 = vst [vmem:[#allocation19_spill] sm:$0xff] %v5656_v24 }
 0x25c   : > { %3854 = vmatmul.msk.bf16.gmra.mxu0 %vm893_vm0, %v6469_v46  ;;  %3858 = vmatmul.msk.bf16.gmra.mxu1 %vm893_vm0, %v6469_v46  ;;  %v5670_v46 = vpop.xlane.xlu1 %1446 }
 0x25d   : > { %v5662_v63 = vpop.permute.xlu0 %3400  ;;  %6516 = vst [vmem:[#allocation37_spill] sm:$0xff] %v5670_v46 }
 0x260   : > { %v5660_v28 = vpop.f32.mrf.mxu0 }
 0x261   : > { %6515 = vst [vmem:[#allocation34_spill] sm:$0xff] %v5660_v28 }
 0x268   : > { %v5672_v47 = vpop.f32.mrf.mxu0 }
 0x269   : > { %6517 = vst [vmem:[#allocation40_spill] sm:$0xff] %v5672_v47 }
 0x26c   : > { %3855 = vmatmul.msk.bf16.gmra.mxu0 %vm893_vm0, %v6471_v41  ;;  %3859 = vmatmul.msk.bf16.gmra.mxu1 %vm893_vm0, %v6471_v41  ;;  %v5674_v41 = vpop.xlane.xlu0 %1431 }
 0x274   : > { %v1998_v44 = vpop.xlane.xlu1 %1997  ;;  %v5678_v10 = vpop.xlane.xlu0 %1440 }
 0x275   : > { %v2020_v57 = vmul.f32 0.5213636, %v1998_v44 }
 0x27c   : > { %3856 = vmatmul.msk.bf16.gmra.mxu0 %vm893_vm0, %v6474_v27  ;;  %3860 = vmatmul.msk.bf16.gmra.mxu1 %vm893_vm0, %v6474_v27  ;;  %v5682_v27 = vpop.xlane.xlu2 %1452  ;;  %v5690_v51 = vpop.xlane.xlu0 %1449 }
 0x27d   : > { %6518 = vst [vmem:[#allocation25_spill] sm:$0xff] %v5682_v27 }
 0x27e   : > { %6522 = vst [vmem:[#allocation29_spill] sm:$0xff] %v5690_v51 }
 0x284   : > { %v2004_v21 = vpop.xlane.xlu2 %2003  ;;  %v5696_v34 = vpop.xlane.xlu0 %2000 }
 0x285   : > { %v2022_v18 = vmul.f32 0.5213636, %v2004_v21  ;;  %6524 = vst [vmem:[#allocation47_spill] sm:$0xff] %v5696_v34 }
 0x289   : > { %v2073_v40 = vpop.f32.mrf.mxu0  ;;  %v2146_v2 = vpop.f32.mrf.mxu1 }
 0x28a   : > { %v2093_v9 = vadd.f32 %v2073_v40, %v2020_v57  ;;  %v6533_v57 = vld [vmem:[#allocation10_spill] sm:$0xff] }
 0x28b   : > { %v2281_v40 = vsub.s32 %v6533_v57, %v5700_v20 }
 0x28c   : > { %v2166_v22 = vadd.f32 %v2146_v2, %v2093_v9  ;;  %3881 = vmatmul.msk.bf16.vlgmr.msra.gmra.mxu1 %vm893_vm0, %v4558_v45  ;;  %v5714_v44 = vpop.xlane.xlu1 %2006  ;;  %v2337_v2 = vmul.f32 1.442695, %v2329_v3  ;;  %v6541_v3 = vld [vmem:[#allocation12_spill] sm:$0xff] }
 0x28d   : > { %6532 = vst [vmem:[#allocation54_spill] sm:$0xff] %v5714_v44  ;;  %vm2289_vm8 = vcmp.ge.s32.totalorder %v2281_v40, 0  ;;  %vm2297_vm13 = vcmp.lt.s32.totalorder %v2281_v40, 16 }
 0x28e   : > { %3980 = vpow2.f32 %v2337_v2  ;;  %v6542_v2 = vld [vmem:[#allocation28_spill] sm:$0xff]  ;;  %vm2305_vm14 = vmand %vm2289_vm8, %vm2297_vm13 }
 0x28f   : > { %vm5753_vm1 = vmand %vm2305_vm14, %vm2312_vm15 }
 0x290   : > { %v2219_v14 = vpop.f32.mrf.mxu2 }
 0x291   : > { %v5684_v17 = vadd.f32 %v2219_v14, %v2166_v22  ;;  %v5686_v49 = vpop.f32.mrf.mxu0  ;;  %v5688_v38 = vpop.f32.mrf.mxu1 }
 0x292   : > { %6520 = vst [vmem:[#allocation41_spill] sm:$0xff] %v5686_v49 }
 0x293   : > { %6519 = vst [vmem:[#allocation42_spill] sm:$0xff] %v5684_v17 }
 0x294   : > { %6521 = vst [vmem:[#allocation43_spill] sm:$0xff] %v5688_v38  ;;  %v2010_v25 = vpop.xlane.xlu0 %2009 }
 0x295   : > { %v2024_v60 = vmul.f32 0.5213636, %v2010_v25 }
 0x298   : > { %v5692_v19 = vpop.f32.mrf.mxu2 }
 0x299   : > { %6523 = vst [vmem:[#allocation46_spill] sm:$0xff] %v5692_v19  ;;  %v2078_v59 = vpop.f32.mrf.mxu0  ;;  %v2151_v54 = vpop.f32.mrf.mxu1 }
 0x29a   : > { %v2095_v13 = vadd.f32 %v2078_v59, %v2022_v18  ;;  %v2322_v18 = vcvt.s32.f32 %v2281_v40  ;;  %v2442_v59 = vpop.f32.mrf.mxu3  ;;  %v6547_v40 = vmov 0 }
 0x29b   : > { %v6548_v40 = vsel %vm5753_vm1, 4294967295, %v6547_v40 }
 0x29c   : > { %v2168_v30 = vadd.f32 %v2151_v54, %v2095_v13  ;;  %3882 = vmatmul.msk.bf16.gmra.mxu1 %vm893_vm0, %v6447_v11  ;;  %v6537_v54 = vld [vmem:[#allocation11_spill] sm:$0xff]  ;;  %v2330_v55 = vmul.f32 -0.1, %v2322_v18  ;;  %v6543_v18 = vld [vmem:[#allocation18_spill] sm:$0xff]  ;;  %6549 = vst [vmem:[#allocation7_spill] sm:$0xff] %v6548_v40 }
 0x29d   : > { %v2282_v13 = vsub.s32 %v6537_v54, %v5700_v20  ;;  %v2284_v54 = vsub.s32 %v6543_v18, %v5700_v20  ;;  %v6566_v40 = vld [vmem:[#allocation39_spill] sm:$0xff] }
 0x29f   : > { %v2323_v52 = vcvt.s32.f32 %v2282_v13  ;;  %vm2290_vm4 = vcmp.ge.s32.totalorder %v2282_v13, 0  ;;  %vm2298_vm6 = vcmp.lt.s32.totalorder %v2282_v13, 16  ;;  %vm2292_vm3 = vcmp.ge.s32.totalorder %v2284_v54, 0 }
 0x2a0   : > { %v2224_v26 = vpop.f32.mrf.mxu2  ;;  %vm2306_vm7 = vmand %vm2290_vm4, %vm2298_vm6  ;;  %vm2300_vm5 = vcmp.lt.s32.totalorder %v2284_v54, 16 }
 0x2a1   : > { %v5702_v50 = vadd.f32 %v2224_v26, %v2168_v30  ;;  %v5704_v42 = vpop.f32.mrf.mxu0  ;;  %v5706_v43 = vpop.f32.mrf.mxu1  ;;  %vm5769_vm10 = vmand %vm2306_vm7, %vm2312_vm15 }
 0x2a2   : > { %6528 = vst [vmem:[#allocation35_spill] sm:$0xff] %v5704_v42  ;;  %vm2308_vm8 = vmand %vm2292_vm3, %vm2300_vm5 }
 0x2a3   : > { %6527 = vst [vmem:[#allocation50_spill] sm:$0xff] %v5702_v50  ;;  %vm5805_vm14 = vmand %vm2308_vm8, %vm2312_vm15 }
 0x2a4   : > { %6529 = vst [vmem:[#allocation52_spill] sm:$0xff] %v5706_v43  ;;  %v2016_v30 = vpop.xlane.xlu1 %2015 }
 0x2a5   : > { %v2026_v26 = vmul.f32 0.5213636, %v2016_v30  ;;  %v2444_v30 = vpop.f32.mrf.mxu3 }
 0x2a8   : > { %v5710_v4 = vpop.f32.mrf.mxu2 }
 0x2a9   : > { %6531 = vst [vmem:[#allocation51_spill] sm:$0xff] %v5710_v4  ;;  %v2083_v31 = vpop.f32.mrf.mxu0  ;;  %v2156_v6 = vpop.f32.mrf.mxu1 }
 0x2aa   : > { %v2097_v53 = vadd.f32 %v2083_v31, %v2024_v60  ;;  %v3981_v60 = vpop.eup %3980  ;;  %v2339_v31 = vmul.f32 1.442695, %v2330_v55 }
 0x2ac   : > { %v2170_v7 = vadd.f32 %v2156_v6, %v2097_v53  ;;  %3883 = vmatmul.msk.bf16.gmra.mxu1 %vm893_vm0, %v6450_v16  ;;  %v2331_v53 = vmul.f32 -0.1, %v2323_v52  ;;  %3982 = vpow2.f32 %v2339_v31 }
 0x2ad   : > { %v2447_v51 = vpop.f32.mrf.mxu3 }
 0x2b0   : > { %v2229_v9 = vpop.f32.mrf.mxu2 }
 0x2b1   : > { %v5718_v22 = vadd.f32 %v2229_v9, %v2170_v7  ;;  %v5720_v14 = vpop.f32.mrf.mxu0  ;;  %v5722_v21 = vpop.f32.mrf.mxu1  ;;  %v2283_v7 = vsub.s32 %v6541_v3, %v5700_v20  ;;  %v2353_v9 = vsel %vm5731_vm2, %v3981_v60, 0.0  ;;  %v2325_v3 = vcvt.s32.f32 %v2284_v54 }
 0x2b2   : > { %6535 = vst [vmem:[#allocation55_spill] sm:$0xff] %v5720_v14  ;;  %v2361_v55 = vmul.f32 %v2353_v9, %v2353_v9  ;;  %v5749_v60 = vmul.f32 13.612261, %v2353_v9  ;;  %v3983_v18 = vpop.eup %3982 }
 0x2b3   : > { %6534 = vst [vmem:[#allocation44_spill] sm:$0xff] %v5718_v22  ;;  %v2324_v52 = vcvt.s32.f32 %v2283_v7  ;;  %vm2291_vm11 = vcmp.ge.s32.totalorder %v2283_v7, 0  ;;  %vm2299_vm12 = vcmp.lt.s32.totalorder %v2283_v7, 16  ;;  %v6554_v7 = vld [vmem:[#allocation26_spill] sm:$0xff] }
 0x2b4   : > { %6536 = vst [vmem:[#allocation56_spill] sm:$0xff] %v5722_v21  ;;  %v2385_v28 = vmul.f32 %v2361_v55, %v2353_v9  ;;  %v2354_v9 = vsel %vm5753_vm1, %v3983_v18, 0.0  ;;  %v6553_v18 = vld [vmem:[#allocation22_spill] sm:$0xff]  ;;  %vm2307_vm9 = vmand %vm2291_vm11, %vm2299_vm12 }
 0x2b5   : > { %v2332_v31 = vmul.f32 -0.1, %v2324_v52  ;;  %v2362_v46 = vmul.f32 %v2354_v9, %v2354_v9  ;;  %vm5798_vm13 = vmand %vm2307_vm9, %vm2312_vm15 }
 0x2b6   : > { %v5760_v27 = vmul.f32 46.054836, %v2385_v28 }
 0x2b7   : > { %v2343_v24 = vmul.f32 1.442695, %v2332_v31  ;;  %v5777_v31 = vsub.s32 %v6553_v18, %v5700_v20  ;;  %v5782_v21 = vmul.f32 -2.6204457, %v2362_v46 }
 0x2b8   : > { %v5727_v32 = vpop.f32.mrf.mxu2 }
 0x2b9   : > { %6538 = vst [vmem:[#allocation57_spill] sm:$0xff] %v5727_v32  ;;  %v2088_v25 = vpop.f32.mrf.mxu0  ;;  %v2161_v33 = vpop.f32.mrf.mxu1  ;;  %v2326_v18 = vcvt.s32.f32 %v5777_v31  ;;  %vm2293_vm4 = vcmp.ge.s32.totalorder %v5777_v31, 0  ;;  %vm2301_vm6 = vcmp.lt.s32.totalorder %v5777_v31, 16 }
 0x2ba   : > { %v2099_v6 = vadd.f32 %v2088_v25, %v2026_v26  ;;  %v2341_v26 = vmul.f32 1.442695, %v2331_v53  ;;  %v2333_v53 = vmul.f32 -0.1, %v2325_v3  ;;  %v5765_v3 = vmul.f32 13.612261, %v2354_v9  ;;  %vm5847_vm7 = vmand %vm2293_vm4, %vm2301_vm6 }
 0x2bb   : > { %v2334_v14 = vmul.f32 -0.1, %v2326_v18  ;;  %vm5866_vm3 = vmand %vm5847_vm7, %vm2312_vm15 }
 0x2bc   : > { %v2172_v57 = vadd.f32 %v2161_v33, %v2099_v6  ;;  %3884 = vmatmul.msk.bf16.gmra.mxu1 %vm893_vm0, %v6542_v2  ;;  %3984 = vpow2.f32 %v2341_v26  ;;  %v6550_v26 = vld [vmem:[#allocation20_spill] sm:$0xff]  ;;  %v2463_v32 = vmul.f32 %v2444_v30, %v5765_v3 }
 0x2bd   : > { %3986 = vpow2.f32 %v2343_v24  ;;  %v5787_v24 = vsub.s32 %v6554_v7, %v5700_v20  ;;  %v2449_v7 = vpop.f32.mrf.mxu3  ;;  %v2347_v19 = vmul.f32 1.442695, %v2334_v14 }
 0x2bf   : > { %vm2294_vm11 = vcmp.ge.s32.totalorder %v5787_v24, 0  ;;  %vm2302_vm12 = vcmp.lt.s32.totalorder %v5787_v24, 16 }
 0x2c0   : > { %v2234_v25 = vpop.f32.mrf.mxu2  ;;  %vm2310_vm5 = vmand %vm2294_vm11, %vm2302_vm12 }
 0x2c1   : > { %v5743_v33 = vadd.f32 %v2234_v25, %v2172_v57  ;;  %v5745_v6 = vpop.f32.mrf.mxu0  ;;  %v5747_v47 = vpop.f32.mrf.mxu1  ;;  %v2462_v57 = vmul.f32 %v2442_v59, %v5749_v60  ;;  %v5758_v25 = vmul.f32 -2.6204457, %v2361_v55  ;;  %vm5890_vm9 = vmand %vm2310_vm5, %vm2312_vm15 }
 0x2c2   : > { %6545 = vst [vmem:[#allocation58_spill] sm:$0xff] %v5745_v6  ;;  %v3985_v13 = vpop.eup %3984 }
 0x2c3   : > { %6544 = vst [vmem:[#allocation48_spill] sm:$0xff] %v5743_v33  ;;  %v2470_v52 = vadd.f32 %v2462_v57, %v6550_v26  ;;  %v2386_v57 = vmul.f32 %v2362_v46, %v2354_v9  ;;  %v2355_v26 = vsel %vm5769_vm10, %v3985_v13, 0.0  ;;  %v6556_v46 = vld [vmem:[#allocation23_spill] sm:$0xff] }
 0x2c4   : > { %6546 = vst [vmem:[#allocation53_spill] sm:$0xff] %v5747_v47  ;;  %v2345_v47 = vmul.f32 1.442695, %v2333_v53 }
 0x2c5   : > { %v5791_v13 = vmul.f32 46.054836, %v2386_v57 }
 0x2c6   : > { %3988 = vpow2.f32 %v2345_v47 }
 0x2c7   : > { %6555 = vst [vmem:[#allocation6_spill] sm:$0xff] %v5791_v13  ;;  %3990 = vpow2.f32 %v2347_v19 }
 0x2c9   : > { %v2519_v33 = vpop.f32.mrf.mxu0  ;;  %v2596_v6 = vpop.f32.mrf.mxu1 }
 0x2ca   : > { %v2539_v59 = vmul.f32 %v2519_v33, %v5758_v25  ;;  %v2616_v55 = vmul.f32 %v2596_v6, %v5760_v27  ;;  %v2363_v6 = vmul.f32 %v2355_v26, %v2355_v26 }
 0x2cc   : > { %v2547_v53 = vadd.f32 %v2539_v59, %v2470_v52  ;;  %v3987_v52 = vpop.eup %3986  ;;  %v2471_v59 = vadd.f32 %v2463_v32, %v6556_v46  ;;  %v2387_v57 = vmul.f32 %v2363_v6, %v2355_v26  ;;  %v2327_v32 = vcvt.s32.f32 %v5787_v24 }
 0x2cd   : > { %v3989_v22 = vpop.eup %3988  ;;  %v2356_v50 = vsel %vm5798_vm13, %v3987_v52, 0.0  ;;  %v5814_v18 = vmul.f32 -2.6204457, %v2363_v6 }
 0x2ce   : > { %v2624_v33 = vadd.f32 %v2616_v55, %v2547_v53  ;;  %v5794_v55 = vmul.f32 13.612261, %v2355_v26  ;;  %v6557_v53 = vmov 0  ;;  %v2357_v44 = vsel %vm5805_vm14, %v3989_v22, 0.0  ;;  %v3991_v31 = vpop.eup %3990 }
 0x2cf   : > { %v6558_v53 = vsel %vm5798_vm13, 4294967295, %v6557_v53 }
 0x2d0   : > { %v2632_v9 = vsel %vm5731_vm2, %v2624_v33, 0.0  ;;  %6559 = vst [vmem:[#allocation8_spill] sm:$0xff] %v6558_v53  ;;  %v2464_v26 = vmul.f32 %v2447_v51, %v5794_v55  ;;  %v2364_v51 = vmul.f32 %v2356_v50, %v2356_v50 }
 0x2d1   : > { %v2640_v47 = vmul.f32 0.0125, %v2632_v9  ;;  %v2521_v54 = vpop.f32.mrf.mxu0  ;;  %v2598_v30 = vpop.f32.mrf.mxu1 }
 0x2d2   : > { %v2540_v33 = vmul.f32 %v2521_v54, %v5782_v21  ;;  %v2617_v43 = vmul.f32 %v2598_v30, %v5791_v13  ;;  %v6562_v30 = vld [vmem:[#allocation36_spill] sm:$0xff]  ;;  %v2388_v34 = vmul.f32 %v2364_v51, %v2356_v50  ;;  %v5838_v8 = vmul.f32 -2.6204457, %v2364_v51 }
 0x2d3   : > { %v2648_v9 = vmax.f32 %v2640_v47, 0.0  ;;  %v5816_v47 = vmul.f32 46.054836, %v2387_v57 }
 0x2d4   : > { %v2548_v46 = vadd.f32 %v2540_v33, %v2471_v59  ;;  %v2335_v59 = vmul.f32 -0.1, %v2327_v32  ;;  %v5823_v33 = vsub.s32 %v6562_v30, %v5700_v20  ;;  %v5833_v30 = vmul.f32 13.612261, %v2357_v44 }
 0x2d5   : > { %v2656_v42 = vmin.f32 %v2648_v9, 1.0 }
 0x2d6   : > { %v2625_v54 = vadd.f32 %v2617_v43, %v2548_v46  ;;  %v5827_v43 = vmul.f32 13.612261, %v2356_v50  ;;  %v6563_v46 = vld [vmem:[#allocation32_spill] sm:$0xff]  ;;  %v2349_v17 = vmul.f32 1.442695, %v2335_v59  ;;  %vm2295_vm8 = vcmp.ge.s32.totalorder %v5823_v33, 0 }
 0x2d7   : > { %v2664_v38 = vsel %vm893_vm0, %v2656_v42, 0.0  ;;  %v2472_v22 = vadd.f32 %v2464_v26, %v6563_v46  ;;  %v2781_v1 = vmul.f32 %v2656_v42, %v5758_v25  ;;  %v2866_v58 = vmul.f32 %v2656_v42, %v5760_v27 }
 0x2d8   : > { %v2633_v52 = vsel %vm5753_vm1, %v2625_v54, 0.0  ;;  %2665 = vadd.xlane.f32.xlu0 %v2664_v38  ;;  %v2452_v54 = vpop.f32.mrf.mxu3  ;;  %v2465_v26 = vmul.f32 %v2449_v7, %v5827_v43  ;;  %3992 = vpow2.f32 %v2349_v17  ;;  %vm2303_vm4 = vcmp.lt.s32.totalorder %v5823_v33, 16 }
 0x2d9   : > { %v2641_v6 = vmul.f32 0.0125, %v2633_v52  ;;  %v2524_v57 = vpop.f32.mrf.mxu0  ;;  %v2601_v9 = vpop.f32.mrf.mxu1  ;;  %v2328_v52 = vcvt.s32.f32 %v5823_v33  ;;  %v2466_v17 = vmul.f32 %v2452_v54, %v5833_v30  ;;  %vm5913_vm6 = vmand %vm2295_vm8, %vm2303_vm4 }
 0x2da   : > { %v2541_v14 = vmul.f32 %v2524_v57, %v5814_v18  ;;  %v2618_v32 = vmul.f32 %v2601_v9, %v5816_v47  ;;  %v2365_v57 = vmul.f32 %v2357_v44, %v2357_v44  ;;  %v2696_v9 = vmul.f32 %v2656_v42, %v5749_v60  ;;  %vm5933_vm7 = vmand %vm5913_vm6, %vm2312_vm15 }
 0x2db   : > { %v2649_v38 = vmax.f32 %v2641_v6, 0.0  ;;  %v5859_v42 = vmul.f32 46.054836, %v2388_v34 }
 0x2dc   : > { %v2549_v49 = vadd.f32 %v2541_v14, %v2472_v22 }
 0x2dd   : > { %v2657_v46 = vmin.f32 %v2649_v38, 1.0 }
 0x2de   : > { %v2626_v19 = vadd.f32 %v2618_v32, %v2549_v49 }
 0x2df   : > { %v2697_v50 = vmul.f32 %v2657_v46, %v5765_v3  ;;  %v2782_v7 = vmul.f32 %v2657_v46, %v5782_v21  ;;  %v2867_v51 = vmul.f32 %v2657_v46, %v5791_v13  ;;  %v2667_v6 = vsel %vm893_vm0, %v2657_v46, 0.0 }
 0x2e0   : > { %v2634_v49 = vsel %vm5769_vm10, %v2626_v19, 0.0  ;;  %2668 = vadd.xlane.f32.xlu2 %v2667_v6  ;;  %v2473_v13 = vadd.f32 %v2465_v26, %v6566_v40  ;;  %v6567_v46 = vmov 0  ;;  %v2389_v19 = vmul.f32 %v2365_v57, %v2357_v44  ;;  %v2454_v44 = vpop.f32.mrf.mxu3 }
 0x2e1   : > { %v2704_v22 = vpack.c.bf16 %v2697_v50, %v2696_v9  ;;  %v2789_v14 = vpack.c.bf16 %v2782_v7, %v2781_v1  ;;  %v2874_v32 = vpack.c.bf16 %v2867_v51, %v2866_v58  ;;  %v2642_v38 = vmul.f32 0.0125, %v2634_v49  ;;  %v2526_v56 = vpop.f32.mrf.mxu0  ;;  %v2603_v48 = vpop.f32.mrf.mxu1 }
 0x2e2   : > { %v6568_v46 = vsel %vm5866_vm3, 4294967295, %v6567_v46  ;;  %v2542_v34 = vmul.f32 %v2526_v56, %v5838_v8  ;;  %v2336_v9 = vmul.f32 -0.1, %v2328_v52  ;;  %v2619_v40 = vmul.f32 %v2603_v48, %v5859_v42  ;;  %v3993_v50 = vpop.eup %3992 }
 0x2e3   : > { %6569 = vst [vmem:[#allocation10_spill] sm:$0xff] %v6568_v46  ;;  %v2650_v1 = vmax.f32 %v2642_v38, 0.0  ;;  %3861 = vmatmul.msk.bf16.vlgmr.msrb.gmra.mxu2 %vm893_vm0, %v2704_v22  ;;  %3865 = vmatmul.msk.bf16.vlgmr.msra.gmra.mxu3 %vm893_vm0, %v2789_v14  ;;  %v2358_v26 = vsel %vm5866_vm3, %v3991_v31, 0.0  ;;  %v5885_v48 = vmul.f32 46.054836, %v2389_v19  ;;  %v6572_v31 = vld [vmem:[#allocation38_spill] sm:$0xff] }
 0x2e4   : > { %v2550_v58 = vadd.f32 %v2542_v34, %v2473_v13  ;;  %3869 = vmatmul.msk.bf16.vlgmr.msra.gmra.mxu0 %vm893_vm0, %v2874_v32  ;;  %3428 = vmatpush.bf16.msrb.mxu2 %v5641_v12  ;;  %v5883_v13 = vmul.f32 -2.6204457, %v2365_v57  ;;  %v2351_v59 = vmul.f32 1.442695, %v2336_v9  ;;  %v2366_v54 = vmul.f32 %v2358_v26, %v2358_v26 }
 0x2e5   : > { %v2658_v56 = vmin.f32 %v2650_v1, 1.0  ;;  %v5897_v57 = vmul.f32 13.612261, %v2358_v26  ;;  %v2474_v22 = vadd.f32 %v2466_v17, %v6572_v31  ;;  %v2359_v38 = vsel %vm5890_vm9, %v3993_v50, 0.0 }
 0x2e6   : > { %v2627_v52 = vadd.f32 %v2619_v40, %v2550_v58  ;;  %3994 = vpow2.f32 %v2351_v59  ;;  %v2390_v19 = vmul.f32 %v2366_v54, %v2358_v26  ;;  %v5908_v58 = vmul.f32 -2.6204457, %v2366_v54 }
 0x2e7   : > { %v2670_v12 = vsel %vm893_vm0, %v2658_v56, 0.0  ;;  %v2467_v9 = vmul.f32 %v2454_v44, %v5897_v57  ;;  %v2367_v40 = vmul.f32 %v2359_v38, %v2359_v38  ;;  %v2783_v59 = vmul.f32 %v2658_v56, %v5814_v18 }
 0x2e8   : > { %v2635_v24 = vsel %vm5798_vm13, %v2627_v52, 0.0  ;;  %2671 = vadd.xlane.f32.xlu1 %v2670_v12  ;;  %3429 = vmatpush.bf16.msrb.mxu2 %v5650_v36  ;;  %v2698_v52 = vmul.f32 %v2658_v56, %v5794_v55  ;;  %v2868_v12 = vmul.f32 %v2658_v56, %v5816_v47  ;;  %v5927_v53 = vmul.f32 13.612261, %v2359_v38 }
 0x2e9   : > { %v2643_v51 = vmul.f32 0.0125, %v2635_v24  ;;  %v2529_v6 = vpop.f32.mrf.mxu0  ;;  %v2606_v49 = vpop.f32.mrf.mxu1 }
 0x2ea   : > { %v2543_v14 = vmul.f32 %v2529_v6, %v5883_v13  ;;  %v2620_v32 = vmul.f32 %v2606_v49, %v5885_v48  ;;  %v2457_v24 = vpop.f32.mrf.mxu3 }
 0x2eb   : > { %v2651_v34 = vmax.f32 %v2643_v51, 0.0  ;;  %v5923_v51 = vmul.f32 46.054836, %v2390_v19 }
 0x2ec   : > { %v2551_v36 = vadd.f32 %v2543_v14, %v2474_v22  ;;  %3430 = vmatpush.bf16.msrb.mxu2 %v5658_v62  ;;  %v3995_v56 = vpop.eup %3994 }
 0x2ed   : > { %v2659_v1 = vmin.f32 %v2651_v34, 1.0  ;;  %v6575_v34 = vld [vmem:[#allocation45_spill] sm:$0xff]  ;;  %v2360_v20 = vsel %vm5933_vm7, %v3995_v56, 0.0 }
 0x2ee   : > { %v2628_v17 = vadd.f32 %v2620_v32, %v2551_v36  ;;  %v2475_v36 = vadd.f32 %v2467_v9, %v6575_v34 }
 0x2ef   : > { %v2673_v33 = vsel %vm893_vm0, %v2659_v1, 0.0  ;;  %v2699_v62 = vmul.f32 %v2659_v1, %v5827_v43  ;;  %v2784_v26 = vmul.f32 %v2659_v1, %v5838_v8  ;;  %v2869_v44 = vmul.f32 %v2659_v1, %v5859_v42 }
 0x2f0   : > { %v2636_v54 = vsel %vm5805_vm14, %v2628_v17, 0.0  ;;  %2674 = vadd.xlane.f32.xlu0 %v2673_v33  ;;  %3431 = vmatpush.bf16.msrb.mxu2 %v5662_v63  ;;  %v2391_v1 = vmul.f32 %v2367_v40, %v2359_v38  ;;  %v5945_v33 = vmul.f32 -2.6204457, %v2367_v40 }
 0x2f1   : > { %v2644_v6 = vmul.f32 0.0125, %v2636_v54  ;;  %v2531_v49 = vpop.f32.mrf.mxu0  ;;  %v2608_v31 = vpop.f32.mrf.mxu1  ;;  %v2705_v22 = vpack.c.bf16 %v2699_v62, %v2698_v52  ;;  %v2790_v14 = vpack.c.bf16 %v2784_v26, %v2783_v59  ;;  %v2875_v32 = vpack.c.bf16 %v2869_v44, %v2868_v12 }
 0x2f2   : > { %v2544_v63 = vmul.f32 %v2531_v49, %v5908_v58  ;;  %v2621_v9 = vmul.f32 %v2608_v31, %v5923_v51  ;;  %v2468_v12 = vmul.f32 %v2457_v24, %v5927_v53  ;;  %v5947_v38 = vmul.f32 46.054836, %v2391_v1  ;;  %v6578_v31 = vld [vmem:[#allocation49_spill] sm:$0xff]  ;;  %v2459_v24 = vpop.f32.mrf.mxu3 }
 0x2f3   : > { %v2652_v17 = vmax.f32 %v2644_v6, 0.0  ;;  %3862 = vmatmul.msk.bf16.gmra.mxu2 %vm893_vm0, %v2705_v22  ;;  %3866 = vmatmul.msk.bf16.gmra.mxu3 %vm893_vm0, %v2790_v14  ;;  %v2368_v44 = vmul.f32 %v2360_v20, %v2360_v20  ;;  %v5952_v54 = vmul.f32 13.612261, %v2360_v20 }
 0x2f4   : > { %v2552_v52 = vadd.f32 %v2544_v63, %v2475_v36  ;;  %3870 = vmatmul.msk.bf16.gmra.mxu0 %vm893_vm0, %v2875_v32  ;;  %v2476_v22 = vadd.f32 %v2468_v12, %v6578_v31 }
 0x2f5   : > { %v2660_v59 = vmin.f32 %v2652_v17, 1.0  ;;  %v2392_v36 = vmul.f32 %v2368_v44, %v2360_v20  ;;  %v2469_v63 = vmul.f32 %v2459_v24, %v5952_v54  ;;  %v5958_v17 = vmul.f32 -2.6204457, %v2368_v44 }
 0x2f6   : > { %v2629_v50 = vadd.f32 %v2621_v9, %v2552_v52 }
 0x2f7   : > { %v2676_v62 = vsel %vm893_vm0, %v2660_v59, 0.0  ;;  %v2700_v9 = vmul.f32 %v2660_v59, %v5833_v30  ;;  %v2870_v12 = vmul.f32 %v2660_v59, %v5885_v48  ;;  %v5969_v44 = vmul.f32 46.054836, %v2392_v36 }
 0x2f8   : > { %v2637_v26 = vsel %vm5866_vm3, %v2629_v50, 0.0  ;;  %2677 = vadd.xlane.f32.xlu2 %v2676_v62  ;;  %v2785_v50 = vmul.f32 %v2660_v59, %v5883_v13 }
 0x2f9   : > { %v2645_v6 = vmul.f32 0.0125, %v2637_v26  ;;  %v2534_v49 = vpop.f32.mrf.mxu0  ;;  %v2611_v56 = vpop.f32.mrf.mxu1 }
 0x2fa   : > { %v2545_v40 = vmul.f32 %v2534_v49, %v5945_v33  ;;  %v2622_v14 = vmul.f32 %v2611_v56, %v5947_v38 }
 0x2fb   : > { %v2653_v32 = vmax.f32 %v2645_v6, 0.0 }
 0x2fc   : > { %v2553_v34 = vadd.f32 %v2545_v40, %v2476_v22 }
 0x2fd   : > { %v2661_v1 = vmin.f32 %v2653_v32, 1.0 }
 0x2fe   : > { %v2630_v52 = vadd.f32 %v2622_v14, %v2553_v34  ;;  %v6579_v14 = vld [vmem:[#allocation9_spill] sm:$0xff] }
 0x2ff   : > { %v2679_v62 = vsel %vm893_vm0, %v2661_v1, 0.0  ;;  %v2701_v26 = vmul.f32 %v2661_v1, %v5897_v57  ;;  %v2786_v6 = vmul.f32 %v2661_v1, %v5908_v58  ;;  %v2871_v20 = vmul.f32 %v2661_v1, %v5923_v51 }
 0x300   : > { %v2638_v49 = vsel %vm5890_vm9, %v2630_v52, 0.0  ;;  %2680 = vadd.xlane.f32.xlu1 %v2679_v62  ;;  %v2477_v32 = vadd.f32 %v2469_v63, %v6579_v14  ;;  %v6013_v14 = vpop.f32.mrf.mxu2 }
 0x301   : > { %v2646_v56 = vmul.f32 0.0125, %v2638_v49  ;;  %v2536_v31 = vpop.f32.mrf.mxu0  ;;  %v2613_v22 = vpop.f32.mrf.mxu1  ;;  %v2706_v24 = vpack.c.bf16 %v2701_v26, %v2700_v9  ;;  %v2791_v40 = vpack.c.bf16 %v2786_v6, %v2785_v50  ;;  %v2876_v59 = vpack.c.bf16 %v2871_v20, %v2870_v12  ;;  %6580 = vst [vmem:[#allocation11_spill] sm:$0xff] %v6013_v14 }
 0x302   : > { %v2546_v34 = vmul.f32 %v2536_v31, %v5958_v17  ;;  %v2623_v52 = vmul.f32 %v2613_v22, %v5969_v44 }
 0x303   : > { %v2654_v46 = vmax.f32 %v2646_v56, 0.0  ;;  %3863 = vmatmul.msk.bf16.gmra.mxu2 %vm893_vm0, %v2706_v24  ;;  %3867 = vmatmul.msk.bf16.gmra.mxu3 %vm893_vm0, %v2791_v40 }
 0x304   : > { %v2554_v1 = vadd.f32 %v2546_v34, %v2477_v32  ;;  %3871 = vmatmul.msk.bf16.gmra.mxu0 %vm893_vm0, %v2876_v59  ;;  %v6010_v59 = vpop.xlane.xlu0 %2018  ;;  %v6581_v32 = vld [vmem:[#allocation13_spill] sm:$0xff] }
 0x305   : > { %v2662_v36 = vmin.f32 %v2654_v46, 1.0 }
 0x306   : > { %v2631_v62 = vadd.f32 %v2623_v52, %v2554_v1  ;;  %v6016_v1 = vpop.xlane.xlu2 %2012 }
 0x307   : > { %v2682_v9 = vsel %vm893_vm0, %v2662_v36, 0.0  ;;  %v2702_v6 = vmul.f32 %v2662_v36, %v5927_v53  ;;  %v2787_v20 = vmul.f32 %v2662_v36, %v5945_v33  ;;  %v2872_v56 = vmul.f32 %v2662_v36, %v5947_v38  ;;  %v6582_v36 = vld [vmem:[#allocation2_spill] sm:$0xff] }
 0x308   : > { %v2639_v50 = vsel %vm5933_vm7, %v2631_v62, 0.0  ;;  %2683 = vadd.xlane.f32.xlu0 %v2682_v9 }
 0x309   : > { %v2647_v63 = vmul.f32 0.0125, %v2639_v50 }
 0x30b   : > { %v2655_v12 = vmax.f32 %v2647_v63, 0.0 }
 0x30d   : > { %v5980_v26 = vmin.f32 %v2655_v12, 1.0 }
 0x30f   : > { %v2703_v49 = vmul.f32 %v5980_v26, %v5952_v54  ;;  %v2788_v46 = vmul.f32 %v5980_v26, %v5958_v17  ;;  %v2873_v31 = vmul.f32 %v5980_v26, %v5969_v44 }
 0x311   : > { %v2707_v22 = vpack.c.bf16 %v2703_v49, %v2702_v6  ;;  %v2792_v24 = vpack.c.bf16 %v2788_v46, %v2787_v20  ;;  %v2877_v40 = vpack.c.bf16 %v2873_v31, %v2872_v56  ;;  %v6584_v56 = vld [vmem:[#allocation61_spill] sm:$0xff] }
 0x313   : > { %3864 = vmatmul.msk.bf16.gmra.mxu2 %vm893_vm0, %v2707_v22  ;;  %3868 = vmatmul.msk.bf16.gmra.mxu3 %vm893_vm0, %v2792_v24 }
 0x314   : > { %3872 = vmatmul.msk.bf16.gmra.mxu0 %vm893_vm0, %v2877_v40 }
 0x323   : > { %3885 = vmatmul.msk.bf16.vlgmr.msra.gmra.mxu2 %vm893_vm0, %v4558_v45  ;;  %3889 = vmatmul.msk.bf16.vlgmr.msrb.gmra.mxu3 %vm893_vm0, %v4558_v45  ;;  %v1454_v45 = vmul.f32 0.5213636, %v5674_v41 }
 0x333   : > { %3886 = vmatmul.msk.bf16.gmra.mxu2 %vm893_vm0, %v6447_v11  ;;  %3890 = vmatmul.msk.bf16.gmra.mxu3 %vm893_vm0, %v6447_v11  ;;  %v1539_v11 = vadd.f32 %v6581_v32, %v1454_v45 }
 0x335   : > { %v1624_v62 = vadd.f32 %v6582_v36, %v1539_v11 }
 0x337   : > { %v1709_v6 = vadd.f32 %v5623_v15, %v1624_v62 }
 0x339   : > { %v1717_v22 = vmul.f32 0.025, %v1709_v6  ;;  %v1711_v6 = vadd.f32 %v5635_v61, %v5509_v35 }
 0x343   : > { %3887 = vmatmul.msk.bf16.gmra.mxu2 %vm893_vm0, %v6450_v16  ;;  %3891 = vmatmul.msk.bf16.gmra.mxu3 %vm893_vm0, %v6450_v16  ;;  %v1455_v16 = vmul.f32 0.5213636, %v5664_v5 }
 0x34b   : > { %v2666_v52 = vpop.xlane.xlu0 %2665 }
 0x34c   : > { %v2688_v9 = vmul.f32 0.5213636, %v2666_v52  ;;  %v3809_v52 = vclamps-f32 %v1717_v22, 1.0 }
 0x353   : > { %3888 = vmatmul.msk.bf16.gmra.mxu2 %vm893_vm0, %v6542_v2  ;;  %3892 = vmatmul.msk.bf16.gmra.mxu3 %vm893_vm0, %v6542_v2  ;;  %v6583_v2 = vld [vmem:[#allocation16_spill] sm:$0xff]  ;;  %v2669_v46 = vpop.xlane.xlu2 %2668 }
 0x354   : > { %v1540_v12 = vadd.f32 %v6583_v2, %v1455_v16  ;;  %v2689_v40 = vmul.f32 0.5213636, %v2669_v46 }
 0x356   : > { %v1625_v31 = vadd.f32 %v6584_v56, %v1540_v12 }
 0x358   : > { %v1710_v11 = vadd.f32 %v5628_v0, %v1625_v31  ;;  %v6585_v0 = vld [vmem:[#allocation15_spill] sm:$0xff] }
 0x361   : > { %v2923_v34 = vpop.f32.mrf.mxu0 }
 0x366   : > { %v2753_v50 = vpop.f32.mrf.mxu2  ;;  %v2838_v63 = vpop.f32.mrf.mxu3 }
 0x367   : > { %v2773_v41 = vadd.f32 %v2753_v50, %v2688_v9  ;;  %v2672_v9 = vpop.xlane.xlu1 %2671  ;;  %v1718_v50 = vmul.f32 0.025, %v1710_v11 }
 0x368   : > { %v2690_v12 = vmul.f32 0.5213636, %v2672_v9  ;;  %v6587_v9 = vld [vmem:[#allocation17_spill] sm:$0xff] }
 0x369   : > { %v2858_v20 = vadd.f32 %v2838_v63, %v2773_v41  ;;  %v2925_v49 = vpop.f32.mrf.mxu0  ;;  %v1457_v63 = vmul.f32 0.5213636, %v5678_v10  ;;  %v3810_v56 = vclamps-f32 %v1718_v50, 1.0  ;;  %v1458_v10 = vmul.f32 0.5213636, %v5676_v29  ;;  %v6588_v29 = vld [vmem:[#allocation5_spill] sm:$0xff] }
 0x36b   : > { %v2943_v24 = vadd.f32 %v2923_v34, %v2858_v20  ;;  %v1542_v46 = vadd.f32 %v6585_v0, %v1457_v63  ;;  %v1543_v50 = vadd.f32 %v6587_v9, %v1458_v10 }
 0x36d   : > { %v2951_v45 = vmul.f32 0.025, %v2943_v24 }
 0x36e   : > { %v2755_v5 = vpop.f32.mrf.mxu2  ;;  %v2840_v32 = vpop.f32.mrf.mxu3 }
 0x36f   : > { %v3873_v36 = vclamps-f32 %v2951_v45, 1.0  ;;  %v2774_v14 = vadd.f32 %v2755_v5, %v2689_v40  ;;  %v1719_v40 = vmul.f32 0.025, %v1711_v6  ;;  %v2675_v45 = vpop.xlane.xlu0 %2674 }
 0x371   : > { %v6024_v16 = vadd.f32 %v3873_v36, %v3809_v52  ;;  %v2859_v15 = vadd.f32 %v2840_v32, %v2774_v14  ;;  %v2928_v62 = vpop.f32.mrf.mxu0  ;;  %v2691_v52 = vmul.f32 0.5213636, %v2675_v45  ;;  %v3811_v61 = vclamps-f32 %v1719_v40, 1.0 }
 0x373   : > { %v2944_v2 = vadd.f32 %v2925_v49, %v2859_v15  ;;  %v6586_v49 = vld [vmem:[#allocation3_spill] sm:$0xff] }
 0x374   : > { %v1627_v5 = vadd.f32 %v6586_v49, %v1542_v46 }
 0x375   : > { %v2952_v34 = vmul.f32 0.025, %v2944_v2 }
 0x376   : > { %v2758_v41 = vpop.f32.mrf.mxu2  ;;  %v2843_v20 = vpop.f32.mrf.mxu3  ;;  %v1712_v63 = vadd.f32 %v5639_v23, %v1627_v5 }
 0x377   : > { %v3874_v31 = vclamps-f32 %v2952_v34, 1.0  ;;  %v2775_v22 = vadd.f32 %v2758_v41, %v2690_v12  ;;  %v2678_v41 = vpop.xlane.xlu2 %2677 }
 0x378   : > { %v1720_v0 = vmul.f32 0.025, %v1712_v63  ;;  %v2692_v46 = vmul.f32 0.5213636, %v2678_v41 }
 0x379   : > { %v6030_v24 = vadd.f32 %v3874_v31, %v3810_v56  ;;  %v2860_v14 = vadd.f32 %v2843_v20, %v2775_v22  ;;  %v2930_v11 = vpop.f32.mrf.mxu0  ;;  %v1628_v20 = vadd.f32 %v6588_v29, %v1543_v50 }
 0x37a   : > { %v3812_v45 = vclamps-f32 %v1720_v0, 1.0 }
 0x37b   : > { %v2945_v32 = vadd.f32 %v2928_v62, %v2860_v14  ;;  %v1713_v40 = vadd.f32 %v5648_v37, %v1628_v20  ;;  %v2684_v41 = vpop.xlane.xlu0 %2683 }
 0x37c   : > { %v2694_v20 = vmul.f32 0.5213636, %v2684_v41 }
 0x37d   : > { %v2953_v35 = vmul.f32 0.025, %v2945_v32  ;;  %v2681_v32 = vpop.xlane.xlu1 %2680 }
 0x37e   : > { %v2760_v36 = vpop.f32.mrf.mxu2  ;;  %v2845_v15 = vpop.f32.mrf.mxu3 }
 0x37f   : > { %v3875_v2 = vclamps-f32 %v2953_v35, 1.0  ;;  %v2776_v12 = vadd.f32 %v2760_v36, %v2691_v52  ;;  %v1721_v52 = vmul.f32 0.025, %v1713_v40 }
 0x381   : > { %v6036_v34 = vadd.f32 %v3875_v2, %v3811_v61  ;;  %v2861_v6 = vadd.f32 %v2845_v15, %v2776_v12  ;;  %v2933_v31 = vpop.f32.mrf.mxu0  ;;  %v2693_v61 = vmul.f32 0.5213636, %v2681_v32  ;;  %v3813_v9 = vclamps-f32 %v1721_v52, 1.0  ;;  %v3012_v12 = vpop.f32.mrf.mxu1  ;;  %v6589_v52 = vld [vmem:[#allocation64_spill] sm:$0xff] }
 0x383   : > { %v2946_v62 = vadd.f32 %v2930_v11, %v2861_v6 }
 0x385   : > { %v2954_v56 = vmul.f32 0.025, %v2946_v62 }
 0x386   : > { %v2763_v22 = vpop.f32.mrf.mxu2  ;;  %v2848_v14 = vpop.f32.mrf.mxu3 }
 0x387   : > { %v3876_v10 = vclamps-f32 %v2954_v56, 1.0  ;;  %v2777_v23 = vadd.f32 %v2763_v22, %v2692_v46 }
 0x389   : > { %v6040_v49 = vadd.f32 %v3876_v10, %v3812_v45  ;;  %v2862_v5 = vadd.f32 %v2848_v14, %v2777_v23  ;;  %v2935_v2 = vpop.f32.mrf.mxu0  ;;  %v3014_v22 = vpop.f32.mrf.mxu1  ;;  %v3032_v10 = vmul.f32 %v3012_v12, %v5749_v60  ;;  %v6590_v12 = vld [vmem:[#allocation65_spill] sm:$0xff] }
 0x38b   : > { %v2947_v35 = vadd.f32 %v2933_v31, %v2862_v5 }
 0x38d   : > { %v2955_v36 = vmul.f32 0.025, %v2947_v35  ;;  %v3040_v35 = vadd.f32 %v3032_v10, %v6589_v52 }
 0x38e   : > { %v2765_v15 = vpop.f32.mrf.mxu2  ;;  %v2850_v11 = vpop.f32.mrf.mxu3 }
 0x38f   : > { %v3877_v50 = vclamps-f32 %v2955_v36, 1.0  ;;  %v2778_v63 = vadd.f32 %v2765_v15, %v2693_v61 }
 0x391   : > { %v6042_v6 = vadd.f32 %v3877_v50, %v3813_v9  ;;  %v2863_v37 = vadd.f32 %v2850_v11, %v2778_v63  ;;  %v2938_v31 = vpop.f32.mrf.mxu0  ;;  %v3017_v23 = vpop.f32.mrf.mxu1  ;;  %v3033_v11 = vmul.f32 %v3014_v22, %v5765_v3 }
 0x393   : > { %v6044_v29 = vadd.f32 %v2935_v2, %v2863_v37  ;;  %v3041_v41 = vadd.f32 %v3033_v11, %v6590_v12 }
 0x396   : > { %v2768_v0 = vpop.f32.mrf.mxu2  ;;  %v2853_v62 = vpop.f32.mrf.mxu3 }
 0x397   : > { %v2779_v46 = vadd.f32 %v2768_v0, %v2694_v20 }
 0x399   : > { %v2864_v56 = vadd.f32 %v2853_v62, %v2779_v46  ;;  %v3019_v20 = vpop.f32.mrf.mxu1 }
 0x39b   : > { %v6046_v14 = vadd.f32 %v2938_v31, %v2864_v56  ;;  %v6591_v56 = vld [vmem:[#allocation6_spill] sm:$0xff] }
 0x39e   : > { %v6048_v40 = vpop.f32.mrf.mxu2  ;;  %v6050_v45 = vpop.f32.mrf.mxu3 }
 0x3a6   : > { %v3077_v5 = vpop.f32.mrf.mxu2  ;;  %v3142_v32 = vpop.f32.mrf.mxu3 }
 0x3a7   : > { %v3097_v61 = vmul.f32 %v3077_v5, %v5758_v25  ;;  %v3162_v15 = vmul.f32 %v3142_v32, %v5760_v27  ;;  %v3034_v5 = vmul.f32 %v3017_v23, %v5794_v55  ;;  %v3035_v23 = vmul.f32 %v3019_v20, %v5827_v43 }
 0x3a9   : > { %v3105_v36 = vadd.f32 %v3097_v61, %v3040_v35 }
 0x3ab   : > { %v3170_v9 = vadd.f32 %v3162_v15, %v3105_v36  ;;  %v6593_v15 = vld [vmem:[#allocation24_spill] sm:$0xff] }
 0x3ac   : > { %v3042_v11 = vadd.f32 %v3034_v5, %v6593_v15 }
 0x3ad   : > { %v3178_v50 = vsel %vm5731_vm2, %v3170_v9, 0.0 }
 0x3ae   : > { %v3186_v63 = vmul.f32 0.0125, %v3178_v50  ;;  %v3079_v2 = vpop.f32.mrf.mxu2  ;;  %v3144_v37 = vpop.f32.mrf.mxu3 }
 0x3af   : > { %v3098_v0 = vmul.f32 %v3079_v2, %v5782_v21  ;;  %v3163_v31 = vmul.f32 %v3144_v37, %v6591_v56 }
 0x3b0   : > { %v3194_v62 = vmax.f32 %v3186_v63, 0.0  ;;  %v3022_v63 = vpop.f32.mrf.mxu1 }
 0x3b1   : > { %v3106_v46 = vadd.f32 %v3098_v0, %v3041_v41  ;;  %v3036_v15 = vmul.f32 %v3022_v63, %v5833_v30 }
 0x3b2   : > { %v3202_v10 = vmin.f32 %v3194_v62, 1.0 }
 0x3b3   : > { %v3171_v22 = vadd.f32 %v3163_v31, %v3106_v46 }
 0x3b4   : > { %v3210_v32 = vsel %vm893_vm0, %v3202_v10, 0.0  ;;  %v3242_v41 = vmul.f32 %v3202_v10, %v5749_v60  ;;  %v3315_v0 = vmul.f32 %v3202_v10, %v5758_v25  ;;  %v3388_v62 = vmul.f32 %v3202_v10, %v5760_v27  ;;  %v6594_v27 = vld [vmem:[#allocation27_spill] sm:$0xff] }
 0x3b5   : > { %v3179_v52 = vsel %vm5753_vm1, %v3171_v22, 0.0  ;;  %3211 = vadd.xlane.f32.xlu2 %v3210_v32  ;;  %v3043_v10 = vadd.f32 %v3035_v23, %v6594_v27 }
 0x3b6   : > { %v3187_v35 = vmul.f32 0.0125, %v3179_v52  ;;  %v3082_v61 = vpop.f32.mrf.mxu2  ;;  %v3147_v36 = vpop.f32.mrf.mxu3 }
 0x3b7   : > { %v3099_v9 = vmul.f32 %v3082_v61, %v5814_v18  ;;  %v3164_v37 = vmul.f32 %v3147_v36, %v5816_v47 }
 0x3b8   : > { %v3195_v50 = vmax.f32 %v3187_v35, 0.0 }
 0x3b9   : > { %v3107_v2 = vadd.f32 %v3099_v9, %v3042_v11  ;;  %v3024_v11 = vpop.f32.mrf.mxu1 }
 0x3ba   : > { %v3203_v12 = vmin.f32 %v3195_v50, 1.0  ;;  %v3037_v63 = vmul.f32 %v3024_v11, %v5897_v57 }
 0x3bb   : > { %v3172_v46 = vadd.f32 %v3164_v37, %v3107_v2 }
 0x3bc   : > { %v3243_v31 = vmul.f32 %v3203_v12, %v5765_v3  ;;  %v3316_v5 = vmul.f32 %v3203_v12, %v5782_v21  ;;  %v3389_v22 = vmul.f32 %v3203_v12, %v6591_v56  ;;  %v3213_v32 = vsel %vm893_vm0, %v3203_v12, 0.0 }
 0x3bd   : > { %v3180_v39 = vsel %vm5769_vm10, %v3172_v46, 0.0  ;;  %3214 = vadd.xlane.f32.xlu1 %v3213_v32 }
 0x3be   : > { %v3250_v20 = vpack.c.bf16 %v3243_v31, %v3242_v41  ;;  %v3323_v52 = vpack.c.bf16 %v3316_v5, %v3315_v0  ;;  %v3396_v60 = vpack.c.bf16 %v3389_v22, %v3388_v62  ;;  %v3188_v35 = vmul.f32 0.0125, %v3180_v39  ;;  %v3084_v25 = vpop.f32.mrf.mxu2  ;;  %v3149_v61 = vpop.f32.mrf.mxu3  ;;  %v6596_v0 = vld [vmem:[#allocation14_spill] sm:$0xff] }
 0x3bf   : > { %v3100_v3 = vmul.f32 %v3084_v25, %v5838_v8  ;;  %v3165_v28 = vmul.f32 %v3149_v61, %v5859_v42  ;;  %v3044_v62 = vadd.f32 %v3036_v15, %v6596_v0 }
 0x3c0   : > { %v3196_v36 = vmax.f32 %v3188_v35, 0.0  ;;  %3893 = vmatmul.msk.bf16.vlgmr.msrb.gmra.mxu0 %vm893_vm0, %v3250_v20  ;;  %3897 = vmatmul.msk.bf16.vlgmr.msrb.gmra.mxu1 %vm893_vm0, %v3323_v52 }
 0x3c1   : > { %v3108_v21 = vadd.f32 %v3100_v3, %v3043_v10  ;;  %3901 = vmatmul.msk.bf16.vlgmr.msrb.gmra.mxu2 %vm893_vm0, %v3396_v60  ;;  %v3027_v10 = vpop.f32.mrf.mxu1 }
 0x3c2   : > { %v3204_v56 = vmin.f32 %v3196_v36, 1.0 }
 0x3c3   : > { %v3173_v9 = vadd.f32 %v3165_v28, %v3108_v21 }
 0x3c4   : > { %v3216_v50 = vsel %vm893_vm0, %v3204_v56, 0.0  ;;  %v3244_v20 = vmul.f32 %v3204_v56, %v5794_v55  ;;  %v3317_v52 = vmul.f32 %v3204_v56, %v5814_v18  ;;  %v3390_v60 = vmul.f32 %v3204_v56, %v5816_v47  ;;  %v6597_v47 = vld [vmem:[#allocation31_spill] sm:$0xff] }
 0x3c5   : > { %v3181_v37 = vsel %vm5798_vm13, %v3173_v9, 0.0  ;;  %3217 = vadd.xlane.f32.xlu0 %v3216_v50  ;;  %v3045_v56 = vadd.f32 %v3037_v63, %v6597_v47  ;;  %v3038_v9 = vmul.f32 %v3027_v10, %v5927_v53 }
 0x3c6   : > { %v3189_v23 = vmul.f32 0.0125, %v3181_v37  ;;  %v3087_v12 = vpop.f32.mrf.mxu2  ;;  %v3152_v41 = vpop.f32.mrf.mxu3 }
 0x3c7   : > { %v3101_v46 = vmul.f32 %v3087_v12, %v5883_v13  ;;  %v3166_v22 = vmul.f32 %v3152_v41, %v5885_v48 }
 0x3c8   : > { %v3197_v31 = vmax.f32 %v3189_v23, 0.0 }
 0x3c9   : > { %v3109_v5 = vadd.f32 %v3101_v46, %v3044_v62  ;;  %v6599_v62 = vld [vmem:[#allocation30_spill] sm:$0xff] }
 0x3ca   : > { %v3205_v32 = vmin.f32 %v3197_v31, 1.0  ;;  %v3046_v46 = vadd.f32 %v3038_v9, %v6599_v62  ;;  %v3029_v31 = vpop.f32.mrf.mxu1  ;;  %v2685_v9 = vsel %vm893_vm0, %v5980_v26, 0.0 }
 0x3cb   : > { %v3174_v39 = vadd.f32 %v3166_v22, %v3109_v5 }
 0x3cc   : > { %v3219_v35 = vsel %vm893_vm0, %v3205_v32, 0.0  ;;  %v3245_v25 = vmul.f32 %v3205_v32, %v5827_v43  ;;  %v3318_v61 = vmul.f32 %v3205_v32, %v5838_v8  ;;  %v3391_v27 = vmul.f32 %v3205_v32, %v5859_v42 }
 0x3cd   : > { %v3182_v3 = vsel %vm5805_vm14, %v3174_v39, 0.0  ;;  %3220 = vadd.xlane.f32.xlu2 %v3219_v35  ;;  %v3039_v39 = vmul.f32 %v3029_v31, %v5952_v54  ;;  %v6601_v31 = vld [vmem:[#allocation47_spill] sm:$0xff] }
 0x3ce   : > { %v3190_v36 = vmul.f32 0.0125, %v3182_v3  ;;  %v3089_v21 = vpop.f32.mrf.mxu2  ;;  %v3154_v55 = vpop.f32.mrf.mxu3  ;;  %v3251_v28 = vpack.c.bf16 %v3245_v25, %v3244_v20  ;;  %v3324_v18 = vpack.c.bf16 %v3318_v61, %v3317_v52  ;;  %v3397_v15 = vpack.c.bf16 %v3391_v27, %v3390_v60 }
 0x3cf   : > { %v3102_v11 = vmul.f32 %v3089_v21, %v5908_v58  ;;  %v3167_v4 = vmul.f32 %v3154_v55, %v5923_v51 }
 0x3d0   : > { %v3198_v43 = vmax.f32 %v3190_v36, 0.0  ;;  %3894 = vmatmul.msk.bf16.gmra.mxu0 %vm893_vm0, %v3251_v28  ;;  %3898 = vmatmul.msk.bf16.gmra.mxu1 %vm893_vm0, %v3324_v18 }
 0x3d1   : > { %v3110_v8 = vadd.f32 %v3102_v11, %v3045_v56  ;;  %3902 = vmatmul.msk.bf16.gmra.mxu2 %vm893_vm0, %v3397_v15  ;;  %v6600_v15 = vld [vmem:[#allocation33_spill] sm:$0xff] }
 0x3d2   : > { %v3206_v42 = vmin.f32 %v3198_v43, 1.0 }
 0x3d3   : > { %v3175_v50 = vadd.f32 %v3167_v4, %v3110_v8 }
 0x3d4   : > { %v3222_v2 = vsel %vm893_vm0, %v3206_v42, 0.0  ;;  %v3246_v60 = vmul.f32 %v3206_v42, %v5833_v30  ;;  %v3319_v35 = vmul.f32 %v3206_v42, %v5883_v13  ;;  %v3392_v25 = vmul.f32 %v3206_v42, %v5885_v48 }
 0x3d5   : > { %v3183_v23 = vsel %vm5866_vm3, %v3175_v50, 0.0  ;;  %3223 = vadd.xlane.f32.xlu1 %v3222_v2  ;;  %v3047_v48 = vadd.f32 %v3039_v39, %v6600_v15 }
 0x3d6   : > { %v3191_v12 = vmul.f32 0.0125, %v3183_v23  ;;  %v3092_v41 = vpop.f32.mrf.mxu2  ;;  %v3157_v0 = vpop.f32.mrf.mxu3 }
 0x3d7   : > { %v3103_v5 = vmul.f32 %v3092_v41, %v5945_v33  ;;  %v3168_v32 = vmul.f32 %v3157_v0, %v5947_v38 }
 0x3d8   : > { %v3199_v22 = vmax.f32 %v3191_v12, 0.0 }
 0x3d9   : > { %v3111_v63 = vadd.f32 %v3103_v5, %v3046_v46 }
 0x3da   : > { %v3207_v20 = vmin.f32 %v3199_v22, 1.0  ;;  %v6602_v22 = vld [vmem:[#allocation41_spill] sm:$0xff] }
 0x3db   : > { %v3176_v52 = vadd.f32 %v3168_v32, %v3111_v63 }
 0x3dc   : > { %v3225_v61 = vsel %vm893_vm0, %v3207_v20, 0.0  ;;  %v3247_v27 = vmul.f32 %v3207_v20, %v5897_v57  ;;  %v3320_v10 = vmul.f32 %v3207_v20, %v5908_v58  ;;  %v3393_v3 = vmul.f32 %v3207_v20, %v5923_v51  ;;  %v6603_v20 = vld [vmem:[#allocation42_spill] sm:$0xff] }
 0x3dd   : > { %v3184_v36 = vsel %vm5890_vm9, %v3176_v52, 0.0  ;;  %3226 = vadd.xlane.f32.xlu0 %v3225_v61  ;;  %v2247_v52 = vmul.f32 0.025, %v6603_v20 }
 0x3de   : > { %v3192_v21 = vmul.f32 0.0125, %v3184_v36  ;;  %v3094_v55 = vpop.f32.mrf.mxu2  ;;  %v3159_v28 = vpop.f32.mrf.mxu3  ;;  %v3252_v30 = vpack.c.bf16 %v3247_v27, %v3246_v60  ;;  %v3325_v18 = vpack.c.bf16 %v3320_v10, %v3319_v35  ;;  %v3398_v13 = vpack.c.bf16 %v3393_v3, %v3392_v25  ;;  %v6604_v27 = vld [vmem:[#allocation43_spill] sm:$0xff] }
 0x3df   : > { %v3104_v47 = vmul.f32 %v3094_v55, %v5958_v17  ;;  %v3169_v7 = vmul.f32 %v3159_v28, %v5969_v44  ;;  %v6605_v55 = vld [vmem:[#allocation46_spill] sm:$0xff] }
 0x3e0   : > { %v3200_v56 = vmax.f32 %v3192_v21, 0.0  ;;  %3895 = vmatmul.msk.bf16.gmra.mxu0 %vm893_vm0, %v3252_v30  ;;  %3899 = vmatmul.msk.bf16.gmra.mxu1 %vm893_vm0, %v3325_v18  ;;  %v3841_v21 = vclamps-f32 %v2247_v52, 1.0 }
 0x3e1   : > { %v3112_v57 = vadd.f32 %v3104_v47, %v3047_v48  ;;  %3903 = vmatmul.msk.bf16.gmra.mxu2 %vm893_vm0, %v3398_v13 }
 0x3e2   : > { %v3208_v58 = vmin.f32 %v3200_v56, 1.0 }
 0x3e3   : > { %v3177_v51 = vadd.f32 %v3169_v7, %v3112_v57 }
 0x3e4   : > { %v3228_v11 = vsel %vm893_vm0, %v3208_v58, 0.0  ;;  %v3248_v50 = vmul.f32 %v3208_v58, %v5927_v53  ;;  %v3321_v2 = vmul.f32 %v3208_v58, %v5945_v33  ;;  %v3394_v37 = vmul.f32 %v3208_v58, %v5947_v38  ;;  %v6146_v53 = vpop.f32.mrf.mxu0 }
 0x3e5   : > { %v3185_v43 = vsel %vm5933_vm7, %v3177_v51, 0.0  ;;  %3229 = vadd.xlane.f32.xlu2 %v3228_v11 }
 0x3e6   : > { %v3193_v8 = vmul.f32 0.0125, %v3185_v43  ;;  %v6606_v43 = vld [vmem:[#allocation54_spill] sm:$0xff] }
 0x3e8   : > { %v3201_v4 = vmax.f32 %v3193_v8, 0.0  ;;  %v2023_v8 = vmul.f32 0.5213636, %v6606_v43 }
 0x3ea   : > { %v3209_v42 = vmin.f32 %v3201_v4, 1.0 }
 0x3ec   : > { %v3231_v23 = vsel %vm893_vm0, %v3209_v42, 0.0  ;;  %v3249_v12 = vmul.f32 %v3209_v42, %v5952_v54  ;;  %v3322_v19 = vmul.f32 %v3209_v42, %v5958_v17  ;;  %v3395_v41 = vmul.f32 %v3209_v42, %v5969_v44 }
 0x3ed   : > { %3232 = vadd.xlane.f32.xlu1 %v3231_v23  ;;  %2686 = vadd.xlane.f32.xlu2 %v2685_v9  ;;  %v2021_v44 = vmul.f32 0.5213636, %v6601_v31 }
 0x3ee   : > { %v3253_v0 = vpack.c.bf16 %v3249_v12, %v3248_v50  ;;  %v3326_v62 = vpack.c.bf16 %v3322_v19, %v3321_v2  ;;  %v3399_v46 = vpack.c.bf16 %v3395_v41, %v3394_v37  ;;  %v6607_v50 = vld [vmem:[#allocation35_spill] sm:$0xff]  ;;  %v6608_v19 = vld [vmem:[#allocation50_spill] sm:$0xff] }
 0x3ef   : > { %v2094_v63 = vadd.f32 %v6602_v22, %v2021_v44  ;;  %v2096_v2 = vadd.f32 %v6607_v50, %v2023_v8  ;;  %v2249_v41 = vmul.f32 0.025, %v6608_v19  ;;  %v6610_v44 = vld [vmem:[#allocation51_spill] sm:$0xff] }
 0x3f0   : > { %3896 = vmatmul.msk.bf16.gmra.mxu0 %vm893_vm0, %v3253_v0  ;;  %3900 = vmatmul.msk.bf16.gmra.mxu1 %vm893_vm0, %v3326_v62 }
 0x3f1   : > { %3904 = vmatmul.msk.bf16.gmra.mxu2 %vm893_vm0, %v3399_v46  ;;  %v2167_v10 = vadd.f32 %v6604_v27, %v2094_v63  ;;  %v3843_v31 = vclamps-f32 %v2249_v41, 1.0 }
 0x3f3   : > { %v2240_v28 = vadd.f32 %v6605_v55, %v2167_v10 }
 0x3f5   : > { %v2248_v47 = vmul.f32 0.025, %v2240_v28  ;;  %v6611_v28 = vld [vmem:[#allocation55_spill] sm:$0xff] }
 0x3f7   : > { %v3842_v4 = vclamps-f32 %v2248_v47, 1.0 }
 0x428   : > { %v3212_v33 = vpop.xlane.xlu2 %3211 }
 0x429   : > { %v3234_v38 = vmul.f32 0.5213636, %v3212_v33 }
 0x430   : > { %v3215_v5 = vpop.xlane.xlu1 %3214 }
 0x431   : > { %v3235_v60 = vmul.f32 0.5213636, %v3215_v5 }
 0x438   : > { %v3218_v18 = vpop.xlane.xlu0 %3217 }
 0x439   : > { %v3236_v56 = vmul.f32 0.5213636, %v3218_v18 }
 0x43d   : > { %v3287_v54 = vpop.f32.mrf.mxu0  ;;  %v3360_v26 = vpop.f32.mrf.mxu1 }
 0x43e   : > { %v3307_v17 = vadd.f32 %v3287_v54, %v3234_v38  ;;  %v6609_v38 = vld [vmem:[#allocation52_spill] sm:$0xff] }
 0x43f   : > { %v2169_v54 = vadd.f32 %v6609_v38, %v2096_v2  ;;  %v2027_v38 = vmul.f32 0.5213636, %v6010_v59 }
 0x440   : > { %v3380_v32 = vadd.f32 %v3360_v26, %v3307_v17  ;;  %v3221_v9 = vpop.xlane.xlu2 %3220 }
 0x441   : > { %v3237_v0 = vmul.f32 0.5213636, %v3221_v9  ;;  %v2242_v5 = vadd.f32 %v6610_v44, %v2169_v54 }
 0x443   : > { %v2250_v52 = vmul.f32 0.025, %v2242_v5 }
 0x444   : > { %v3433_v39 = vpop.f32.mrf.mxu2 }
 0x445   : > { %v3453_v35 = vadd.f32 %v3433_v39, %v3380_v32  ;;  %v3289_v25 = vpop.f32.mrf.mxu0  ;;  %v3362_v61 = vpop.f32.mrf.mxu1 }
 0x446   : > { %v3308_v36 = vadd.f32 %v3289_v25, %v3235_v60 }
 0x447   : > { %v3461_v3 = vmul.f32 0.025, %v3453_v35 }
 0x448   : > { %v3381_v15 = vadd.f32 %v3362_v61, %v3308_v36  ;;  %v3224_v63 = vpop.xlane.xlu1 %3223  ;;  %v3844_v36 = vclamps-f32 %v2250_v52, 1.0 }
 0x449   : > { %v3905_v30 = vclamps-f32 %v3461_v3, 1.0  ;;  %v3238_v60 = vmul.f32 0.5213636, %v3224_v63  ;;  %v2025_v3 = vmul.f32 0.5213636, %v6016_v1 }
 0x44b   : > { %v3485_v13 = vadd.f32 %v3905_v30, %v3841_v21  ;;  %v2098_v30 = vadd.f32 %v6611_v28, %v2025_v3 }
 0x44c   : > { %v3435_v48 = vpop.f32.mrf.mxu2 }
 0x44d   : > { %v3454_v57 = vadd.f32 %v3435_v48, %v3381_v15  ;;  %3501 = vrot.lane.b32.xlu1 %v3485_v13, %s4040_s11  ;;  %v3292_v7 = vpop.f32.mrf.mxu0  ;;  %v3365_v58 = vpop.f32.mrf.mxu1  ;;  %v6612_v48 = vld [vmem:[#allocation44_spill] sm:$0xff] }
 0x44e   : > { %v3309_v11 = vadd.f32 %v3292_v7, %v3236_v56  ;;  %v2251_v47 = vmul.f32 0.025, %v6612_v48 }
 0x44f   : > { %v3462_v51 = vmul.f32 0.025, %v3454_v57 }
 0x450   : > { %v3382_v23 = vadd.f32 %v3365_v58, %v3309_v11  ;;  %v3227_v55 = vpop.xlane.xlu0 %3226  ;;  %v3845_v8 = vclamps-f32 %v2251_v47, 1.0 }
 0x451   : > { %v3906_v42 = vclamps-f32 %v3462_v51, 1.0  ;;  %v3239_v56 = vmul.f32 0.5213636, %v3227_v55  ;;  %v6613_v51 = vld [vmem:[#allocation56_spill] sm:$0xff] }
 0x452   : > { %v2171_v11 = vadd.f32 %v6613_v51, %v2098_v30 }
 0x453   : > { %v3486_v37 = vadd.f32 %v3906_v42, %v3842_v4  ;;  %v6614_v4 = vld [vmem:[#allocation57_spill] sm:$0xff] }
 0x454   : > { %v3438_v12 = vpop.f32.mrf.mxu2  ;;  %v2244_v42 = vadd.f32 %v6614_v4, %v2171_v11  ;;  %v6619_v11 = vld [vmem:[#allocation37_spill] sm:$0xff] }
 0x455   : > { %v3455_v62 = vadd.f32 %v3438_v12, %v3382_v23  ;;  %3503 = vrot.lane.b32.xlu0 %v3486_v37, %s4040_s11  ;;  %v3294_v46 = vpop.f32.mrf.mxu0  ;;  %v3367_v33 = vpop.f32.mrf.mxu1 }
 0x456   : > { %v3310_v17 = vadd.f32 %v3294_v46, %v3237_v0  ;;  %v2252_v12 = vmul.f32 0.025, %v2244_v42  ;;  %v6620_v42 = vld [vmem:[#allocation21_spill] sm:$0xff] }
 0x457   : > { %v3463_v26 = vmul.f32 0.025, %v3455_v62 }
 0x458   : > { %v3383_v39 = vadd.f32 %v3367_v33, %v3310_v17  ;;  %v3230_v50 = vpop.xlane.xlu2 %3229  ;;  %v3846_v54 = vclamps-f32 %v2252_v12, 1.0 }
 0x459   : > { %v3907_v22 = vclamps-f32 %v3463_v26, 1.0  ;;  %v3240_v19 = vmul.f32 0.5213636, %v3230_v50 }
 0x45b   : > { %v3487_v32 = vadd.f32 %v3907_v22, %v3843_v31  ;;  %v6615_v31 = vld [vmem:[#allocation58_spill] sm:$0xff] }
 0x45c   : > { %v3440_v20 = vpop.f32.mrf.mxu2  ;;  %v2100_v44 = vadd.f32 %v6615_v31, %v2027_v38 }
 0x45d   : > { %v3456_v35 = vadd.f32 %v3440_v20, %v3383_v39  ;;  %3505 = vrot.lane.b32.xlu2 %v3487_v32, %s4040_s11  ;;  %v3297_v25 = vpop.f32.mrf.mxu0  ;;  %v3370_v61 = vpop.f32.mrf.mxu1  ;;  %v6616_v32 = vld [vmem:[#allocation48_spill] sm:$0xff] }
 0x45e   : > { %v3311_v10 = vadd.f32 %v3297_v25, %v3238_v60  ;;  %v2253_v39 = vmul.f32 0.025, %v6616_v32 }
 0x45f   : > { %v3464_v27 = vmul.f32 0.025, %v3456_v35  ;;  %v6617_v35 = vld [vmem:[#allocation53_spill] sm:$0xff] }
 0x460   : > { %v3384_v13 = vadd.f32 %v3370_v61, %v3311_v10  ;;  %v3233_v17 = vpop.xlane.xlu1 %3232  ;;  %v2173_v25 = vadd.f32 %v6617_v35, %v2100_v44  ;;  %v3847_v59 = vclamps-f32 %v2253_v39, 1.0  ;;  %v6618_v10 = vld [vmem:[#allocation11_spill] sm:$0xff] }
 0x461   : > { %v3908_v21 = vclamps-f32 %v3464_v27, 1.0  ;;  %v3241_v20 = vmul.f32 0.5213636, %v3233_v17 }
 0x462   : > { %v2246_v3 = vadd.f32 %v6618_v10, %v2173_v25 }
 0x463   : > { %v3488_v18 = vadd.f32 %v3908_v21, %v3844_v36 }
 0x464   : > { %v3443_v15 = vpop.f32.mrf.mxu2 }
 0x465   : > { %v3457_v57 = vadd.f32 %v3443_v15, %v3384_v13  ;;  %3507 = vrot.lane.b32.xlu0 %v3488_v18, %s4040_s11  ;;  %v3299_v7 = vpop.f32.mrf.mxu0  ;;  %v3372_v58 = vpop.f32.mrf.mxu1  ;;  %v2254_v18 = vmul.f32 0.025, %v2246_v3 }
 0x466   : > { %v3312_v1 = vadd.f32 %v3299_v7, %v3239_v56  ;;  %v6179_v7 = vld [vmem:[%s6261_s0 + $0x6] ss:$0 sm:$0xff] }
 0x467   : > { %v3465_v43 = vmul.f32 0.025, %v3457_v57  ;;  %v3848_v48 = vclamps-f32 %v2254_v18, 1.0  ;;  %v2687_v57 = vpop.xlane.xlu2 %2686 }
 0x468   : > { %v3385_v37 = vadd.f32 %v3372_v58, %v3312_v1  ;;  %v6184_v58 = vld [vmem:[%s6261_s0 + $0x7] ss:$0 sm:$0xff]  ;;  %v2695_v35 = vmul.f32 0.5213636, %v2687_v57 }
 0x469   : > { %v3909_v9 = vclamps-f32 %v3465_v43, 1.0  ;;  %v1459_v43 = vmul.f32 0.5213636, %v6619_v11 }
 0x46b   : > { %v3489_v2 = vadd.f32 %v3909_v9, %v3845_v8  ;;  %v1544_v9 = vadd.f32 %v6620_v42, %v1459_v43 }
 0x46c   : > { %v3445_v23 = vpop.f32.mrf.mxu2 }
 0x46d   : > { %v3458_v41 = vadd.f32 %v3445_v23, %v3385_v37  ;;  %3509 = vrot.lane.b32.xlu1 %v3489_v2, %s4040_s11  ;;  %v3302_v0 = vpop.f32.mrf.mxu0  ;;  %v3375_v33 = vpop.f32.mrf.mxu1  ;;  %v6621_v2 = vld [vmem:[#allocation62_spill] sm:$0xff] }
 0x46e   : > { %v3313_v46 = vadd.f32 %v3302_v0, %v3240_v19  ;;  %v1629_v37 = vadd.f32 %v6621_v2, %v1544_v9  ;;  %v6622_v19 = vld [vmem:[#allocation19_spill] sm:$0xff]  ;;  %v2956_v0 = vmul.f32 0.025, %v6044_v29 }
 0x46f   : > { %v3466_v62 = vmul.f32 0.025, %v3458_v41 }
 0x470   : > { %v3386_v22 = vadd.f32 %v3375_v33, %v3313_v46  ;;  %v1714_v41 = vadd.f32 %v6622_v19, %v1629_v37 }
 0x471   : > { %v3910_v26 = vclamps-f32 %v3466_v62, 1.0 }
 0x472   : > { %v1722_v46 = vmul.f32 0.025, %v1714_v41 }
 0x473   : > { %v3490_v5 = vadd.f32 %v3910_v26, %v3846_v54  ;;  %v3878_v54 = vclamps-f32 %v2956_v0, 1.0 }
 0x474   : > { %v3448_v63 = vpop.f32.mrf.mxu2  ;;  %v3814_v26 = vclamps-f32 %v1722_v46, 1.0 }
 0x475   : > { %v3459_v52 = vadd.f32 %v3448_v63, %v3386_v22  ;;  %3511 = vrot.lane.b32.xlu2 %v3490_v5, %s4040_s11  ;;  %v3304_v60 = vpop.f32.mrf.mxu0  ;;  %v3377_v21 = vpop.f32.mrf.mxu1  ;;  %v6623_v63 = vld [vmem:[#allocation29_spill] sm:$0xff] }
 0x476   : > { %v3314_v27 = vadd.f32 %v3304_v60, %v3241_v20  ;;  %v2980_v17 = vadd.f32 %v3878_v54, %v3814_v26 }
 0x477   : > { %v3467_v61 = vmul.f32 0.025, %v3459_v52  ;;  %v6624_v52 = vld [vmem:[#allocation59_spill] sm:$0xff] }
 0x478   : > { %v3387_v28 = vadd.f32 %v3377_v21, %v3314_v27 }
 0x479   : > { %v3911_v36 = vclamps-f32 %v3467_v61, 1.0  ;;  %v6625_v61 = vld [vmem:[#allocation25_spill] sm:$0xff] }
 0x47a   : > { %v1461_v27 = vmul.f32 0.5213636, %v6625_v61 }
 0x47b   : > { %v3491_v55 = vadd.f32 %v3911_v36, %v3847_v59  ;;  %v6626_v59 = vld [vmem:[#allocation4_spill] sm:$0xff] }
 0x47c   : > { %v3450_v30 = vpop.f32.mrf.mxu2 }
 0x47d   : > { %v3460_v13 = vadd.f32 %v3450_v30, %v3387_v28  ;;  %3513 = vrot.lane.b32.xlu0 %v3491_v55, %s4040_s11  ;;  %v6627_v55 = vld [vmem:[#allocation60_spill] sm:$0xff]  ;;  %v6628_v30 = vld [vmem:[#allocation34_spill] sm:$0xff] }
 0x47e   : > { %v1546_v28 = vadd.f32 %v6627_v55, %v1461_v27 }
 0x47f   : > { %v3468_v15 = vmul.f32 0.025, %v3460_v13  ;;  %v2957_v13 = vmul.f32 0.025, %v6046_v14 }
 0x481   : > { %v3912_v47 = vclamps-f32 %v3468_v15, 1.0 }
 0x483   : > { %v3492_v56 = vadd.f32 %v3912_v47, %v3848_v48  ;;  %v6629_v48 = vld [vmem:[#allocation63_spill] sm:$0xff] }
 0x484   : > { %v1631_v47 = vadd.f32 %v6629_v48, %v1546_v28 }
 0x485   : > { %3515 = vrot.lane.b32.xlu1 %v3492_v56, %s4040_s11 }
 0x4b7   : > { %v3506_v51 = vpop.permute.xlu2 %3505 }
 0x4b8   : > { %v3527_v1 = vsel %vm893_vm0, %v6036_v34, %v3506_v51  ;;  %v6630_v51 = vld [vmem:[#allocation40_spill] sm:$0xff] }
 0x4b9   : > { %v3536_v8 = vmul.f32 %v6179_v7, %v3527_v1 }
 0x4bb   : > { %v3545_v4 = vadd.f32 %v6184_v58, %v3536_v8 }
 0x4bd   : > { %3553 = vst [vmem:[%s6194_s28 + $0x10] sm:$0xff] %v3545_v4 }
 0x4bf   : > { %v3502_v50 = vpop.permute.xlu1 %3501 }
 0x4c0   : > { %v3525_v34 = vsel %vm893_vm0, %v6024_v16, %v3502_v50 }
 0x4c1   : > { %v3534_v23 = vmul.f32 %v6179_v7, %v3525_v34 }
 0x4c3   : > { %v3543_v12 = vadd.f32 %v6184_v58, %v3534_v23 }
 0x4c5   : > { %3551 = vst [vmem:[%s6194_s28] sm:$0xff] %v3543_v12 }
 0x4c7   : > { %v3504_v62 = vpop.permute.xlu0 %3503 }
 0x4c8   : > { %v3526_v33 = vsel %vm893_vm0, %v6030_v24, %v3504_v62  ;;  %v1460_v24 = vmul.f32 0.5213636, %v6623_v63 }
 0x4c9   : > { %v3535_v38 = vmul.f32 %v6179_v7, %v3526_v33 }
 0x4ca   : > { %v1545_v60 = vadd.f32 %v6624_v52, %v1460_v24 }
 0x4cb   : > { %v3544_v16 = vadd.f32 %v6184_v58, %v3535_v38 }
 0x4cc   : > { %v1630_v10 = vadd.f32 %v6626_v59, %v1545_v60 }
 0x4cd   : > { %3552 = vst [vmem:[%s6194_s28 + $0x8] sm:$0xff] %v3544_v16 }
 0x4ce   : > { %v1715_v18 = vadd.f32 %v6628_v30, %v1630_v10 }
 0x4cf   : > { %v3512_v31 = vpop.permute.xlu2 %3511 }
 0x4d0   : > { %v3530_v44 = vsel %vm893_vm0, %v2980_v17, %v3512_v31  ;;  %v1723_v56 = vmul.f32 0.025, %v1715_v18 }
 0x4d1   : > { %v3539_v5 = vmul.f32 %v6179_v7, %v3530_v44 }
 0x4d2   : > { %v3815_v11 = vclamps-f32 %v1723_v56, 1.0 }
 0x4d3   : > { %v3548_v29 = vadd.f32 %v6184_v58, %v3539_v5 }
 0x4d5   : > { %3556 = vst [vmem:[%s6194_s28 + $0x28] sm:$0xff] %v3548_v29 }
 0x4d7   : > { %v3508_v22 = vpop.permute.xlu0 %3507 }
 0x4d8   : > { %v3528_v32 = vsel %vm893_vm0, %v6040_v49, %v3508_v22  ;;  %v2780_v49 = vadd.f32 %v6048_v40, %v2695_v35  ;;  %v1716_v40 = vadd.f32 %v6630_v51, %v1631_v47 }
 0x4d9   : > { %v3537_v39 = vmul.f32 %v6179_v7, %v3528_v32 }
 0x4da   : > { %v2865_v15 = vadd.f32 %v6050_v45, %v2780_v49  ;;  %v1724_v4 = vmul.f32 0.025, %v1716_v40 }
 0x4db   : > { %v3546_v20 = vadd.f32 %v6184_v58, %v3537_v39 }
 0x4dc   : > { %v2950_v57 = vadd.f32 %v6146_v53, %v2865_v15  ;;  %v3816_v50 = vclamps-f32 %v1724_v4, 1.0 }
 0x4dd   : > { %3554 = vst [vmem:[%s6194_s28 + $0x18] sm:$0xff] %v3546_v20 }
 0x4de   : > { %v2958_v1 = vmul.f32 0.025, %v2950_v57 }
 0x4df   : > { %v3510_v25 = vpop.permute.xlu1 %3509 }
 0x4e0   : > { %v3529_v3 = vsel %vm893_vm0, %v6042_v6, %v3510_v25  ;;  %v3879_v6 = vclamps-f32 %v2957_v13, 1.0  ;;  %v3880_v45 = vclamps-f32 %v2958_v1, 1.0 }
 0x4e1   : > { %v3538_v36 = vmul.f32 %v6179_v7, %v3529_v3 }
 0x4e2   : > { %v2981_v43 = vadd.f32 %v3879_v6, %v3815_v11  ;;  %v2982_v2 = vadd.f32 %v3880_v45, %v3816_v50 }
 0x4e3   : > { %v3547_v21 = vadd.f32 %v6184_v58, %v3538_v36 }
 0x4e5   : > { %3555 = vst [vmem:[%s6194_s28 + $0x20] sm:$0xff] %v3547_v21 }
 0x4ef   : > { %v3514_v8 = vpop.permute.xlu0 %3513 }
 0x4f0   : > { %v3531_v42 = vsel %vm893_vm0, %v2981_v43, %v3514_v8 }
 0x4f1   : > { %v3540_v14 = vmul.f32 %v6179_v7, %v3531_v42 }
 0x4f3   : > { %v3549_v9 = vadd.f32 %v6184_v58, %v3540_v14 }
 0x4f5   : > { %3557 = vst [vmem:[%s6194_s28 + $0x30] sm:$0xff] %v3549_v9 }
 0x4f7   : > { %v3516_v37 = vpop.permute.xlu1 %3515 }
 0x4f8   : > { %v3532_v53 = vsel %vm893_vm0, %v2982_v2, %v3516_v37 }
 0x4f9   : > { %v3541_v34 = vmul.f32 %v6179_v7, %v3532_v53 }
 0x4fb   : > { %v3550_v23 = vadd.f32 %v6184_v58, %v3541_v34 }
 0x4fd   : > { %3558 = vst [vmem:[%s6194_s28 + $0x38] sm:$0xff] %v3550_v23 }
 0x4fe PF: > { %s16_s25 = sadd.s32 1, %s4038_s25   ;;  %s6631_s21 = smov %s4030_s23 }
 0x4ff   : > { %p13_p9 = scmp.ge.s32.totalorder %s16_s25, 6   ;;  %s6632_s22 = smov %s4034_s24 }
 0x500   : > { %s6633_s23 = smov %s6636_s26  ;;  %s6634_s24 = smov %s6640_s27 }
 0x501   :  { %15 = sbr.rel (!%p13_p9) target bundleno = 3 (0x3), region = 86 }

</bundles_post_ra>
